<compile_context>
chip_gen: v7x
topology: tpu7x:2x2x1
jax: 0.10.0
libtpu: 0.0.40
codegen_flags: <defaults>
</compile_context>

<pallas_src>
import jax
import jax.numpy as jnp
import numpy as np
from jax import lax
from jax.experimental import pallas as pl
from jax.experimental.pallas import tpu as pltpu


# ----------------------------- kernels ------------------------------------ #

def _conv3d_s2_kernel(x_ref, w_ref, b_ref, o_ref):
    # x_ref: (1, TD, Ho+1, Wo+1, 12*Cin)  bf16   packed padded input tile
    # w_ref: (4, 12*Cin, Cout)            bf16   folded weights per (oh_off, ow_off)
    # b_ref: (1, Cout)                    f32
    # o_ref: (1, TD, Ho, Wo, Cout)        f32
    _, TD, Ho, Wo, Co = o_ref.shape
    K = x_ref.shape[-1]
    M = TD * Ho * Wo

    acc = None
    # 4 shift groups instead of 27 taps: each is one big-K MXU matmul.
    for idx, (ohf, owf) in enumerate(((0, 0), (0, 1), (1, 0), (1, 1))):
        xt = x_ref[0, :, ohf:ohf + Ho, owf:owf + Wo, :].reshape(M, K)
        part = jnp.dot(xt, w_ref[idx], preferred_element_type=jnp.float32)
        acc = part if acc is None else acc + part

    acc = acc + b_ref[...]                                  # (M, Co) + (1, Co)
    o_ref[...] = acc.reshape(1, TD, Ho, Wo, Co).astype(o_ref.dtype)


def _avgpool3d_kernel(x_ref, o_ref):
    # x_ref: (1, 8, TD, Ho*Wo*C)   parity-split input  (lane-dense last dim)
    # o_ref: (1, TD, Ho*Wo*C)
    acc = x_ref[0, 0].astype(jnp.float32)
    for p in range(1, 8):
        acc = acc + x_ref[0, p].astype(jnp.float32)
    o_ref[...] = (acc * 0.125)[None].astype(o_ref.dtype)


# --------------------------- tile-size helpers ----------------------------- #

def _pick_td_conv(Do, Ho, Wo, C, budget_bytes=4 << 20, m_cap=1024):
    """Largest divisor of Do keeping the bf16 input tile under budget and M modest."""
    slice_bytes = (Ho + 1) * (Wo + 1) * 12 * C * 2
    best = 1
    for td in range(1, Do + 1):
        if Do % td:
            continue
        if td * slice_bytes <= budget_bytes and td * Ho * Wo <= m_cap:
            best = td
    return best


def _pick_td_pool(Do, hwc, itemsize, budget_bytes=1 << 20):
    """Depth tile for avgpool; keeps the second-minor block dim a multiple of 8."""
    if Do % 8 != 0:
        return Do
    best = 8
    for td in range(8, Do + 1, 8):
        if Do % td == 0 and 8 * td * hwc * itemsize <= budget_bytes:
            best = td
    return best


# ----------------------------- glue / wrappers ----------------------------- #

def _fold_offset_weights(w_dhwio):
    """(3,3,3,Cin,Cout) DHWIO -> (4, 12*Cin, Cout) folded per (oh_off, ow_off) group.

    Row order of the K axis is (kd, ph, pw, cin); rows for (ph/pw, offset) combos that
    do not correspond to a real tap are zero.
    """
    w_np = np.asarray(w_dhwio, np.float32)
    _, _, _, Cin, Cout = w_np.shape
    w4 = np.zeros((4, 3, 2, 2, Cin, Cout), np.float32)
    for off_idx, (ohf, owf) in enumerate(((0, 0), (0, 1), (1, 0), (1, 1))):
        for ph in range(2):
            kh = ph if ohf == 0 else (2 if ph == 0 else None)
            if kh is None:
                continue
            for pw in range(2):
                kw = pw if owf == 0 else (2 if pw == 0 else None)
                if kw is None:
                    continue
                w4[off_idx, :, ph, pw] = w_np[:, kh, kw]
    return jnp.asarray(w4.reshape(4, 12 * Cin, Cout))


@jax.jit
def conv3d_stride2(x_ncdhw, w4_bf16, bias_2d):
    N, C, D, H, W = x_ncdhw.shape
    if D % 2 or H % 2 or W % 2:
        raise NotImplementedError("even spatial dims required")  # TODO(synk): odd sizes
    Do, Ho, Wo = D // 2, H // 2, W // 2
    Hh, Wh = Ho + 1, Wo + 1
    K = 12 * C
    Co = w4_bf16.shape[-1]

    # NCDHW f32 -> NDHWC bf16, zero pad spatial by 1.
    x = jnp.transpose(x_ncdhw, (0, 2, 3, 4, 1)).astype(jnp.bfloat16)
    xp = jnp.pad(x, ((0, 0), (1, 1), (1, 1), (1, 1), (0, 0)))          # (N, D+2, H+2, W+2, C)

    # Split H/W into (half, parity) and gather the 3 depth taps per output depth so the
    # kernel only needs contiguous, non-overlapping depth tiles.
    xp = xp.reshape(N, D + 2, Hh, 2, Wh, 2, C)                         # (n,dp,ih,ph,iw,pw,c)
    xg = jnp.stack([xp[:, kd:kd + 2 * Do:2] for kd in range(3)], axis=2)
    #                                                                   (n,od,kd,ih,ph,iw,pw,c)
    xg = xg.transpose(0, 1, 3, 5, 2, 4, 6, 7)                          # (n,od,ih,iw,kd,ph,pw,c)
    xg = xg.reshape(N, Do, Hh, Wh, K)

    TD = _pick_td_conv(Do, Ho, Wo, C)
    grid = (N, Do // TD)

    out = pl.pallas_call(
        _conv3d_s2_kernel,
        out_shape=jax.ShapeDtypeStruct((N, Do, Ho, Wo, Co), jnp.float32),
        grid_spec=pltpu.PrefetchScalarGridSpec(
            num_scalar_prefetch=0,
            grid=grid,
            in_specs=[
                pl.BlockSpec((1, TD, Hh, Wh, K), lambda n, d: (n, d, 0, 0, 0)),
                pl.BlockSpec((4, K, Co), lambda n, d: (0, 0, 0)),
                pl.BlockSpec((1, Co), lambda n, d: (0, 0)),
            ],
            out_specs=pl.BlockSpec((1, TD, Ho, Wo, Co), lambda n, d: (n, d, 0, 0, 0)),
        ),
        compiler_params=pltpu.CompilerParams(
            dimension_semantics=("parallel", "parallel"),
            vmem_limit_bytes=64 * 1024 * 1024,
        ),
    )(xg, w4_bf16, bias_2d)
    return jnp.transpose(out, (0, 4, 1, 2, 3))                         # back to NCDHW


@jax.jit
def avgpool3d_2x(x_ncdhw):
    N, C, D, H, W = x_ncdhw.shape
    if D % 2 or H % 2 or W % 2:
        raise NotImplementedError("even spatial dims required")  # TODO(synk): odd sizes
    Do, Ho, Wo = D // 2, H // 2, W // 2
    HWC = Ho * Wo * C

    x = jnp.transpose(x_ncdhw, (0, 2, 3, 4, 1))                        # NDHWC
    xs = x.reshape(N, Do, 2, Ho, 2, Wo, 2, C)
    xs = xs.transpose(0, 2, 4, 6, 1, 3, 5, 7)                          # (n, pd, ph, pw, od, oh, ow, c)
    xs = xs.reshape(N, 8, Do, HWC)                                     # lane-dense last dim

    TD = _pick_td_pool(Do, HWC, x.dtype.itemsize)
    grid = (N, Do // TD)

    out = pl.pallas_call(
        _avgpool3d_kernel,
        out_shape=jax.ShapeDtypeStruct((N, Do, HWC), x.dtype),
        grid_spec=pltpu.PrefetchScalarGridSpec(
            num_scalar_prefetch=0,
            grid=grid,
            in_specs=[pl.BlockSpec((1, 8, TD, HWC), lambda n, d: (n, 0, d, 0))],
            out_specs=pl.BlockSpec((1, TD, HWC), lambda n, d: (n, d, 0)),
        ),
        compiler_params=pltpu.CompilerParams(
            dimension_semantics=("parallel", "parallel"),
            vmem_limit_bytes=64 * 1024 * 1024,
        ),
    )(xs)
    out = out.reshape(N, Do, Ho, Wo, C)
    return jnp.transpose(out, (0, 4, 1, 2, 3))                         # back to NCDHW


class Downsample:
    """JAX/Pallas port of the PyTorch Downsample module (forward pass)."""

    def __init__(self, channels, use_conv, key):
        self.channels = channels
        self.use_conv = use_conv
        if use_conv:
            k_w, k_b = jax.random.split(key)
            fan_in = channels * 27
            bound = 1.0 / float(np.sqrt(fan_in))
            # DHWIO layout (kd, kh, kw, Cin, Cout).  PyTorch (Cout, Cin, kd, kh, kw)
            # weights map via w.transpose(2, 3, 4, 1, 0).
            self.weight = jax.random.uniform(k_w, (3, 3, 3, channels, channels),
                                             jnp.float32, -bound, bound)
            self.bias = jax.random.uniform(k_b, (channels,), jnp.float32, -bound, bound)
            self.w4 = _fold_offset_weights(self.weight).astype(jnp.bfloat16)
            self.bias2d = self.bias.reshape(1, channels)

    def __call__(self, x):   # x: (N, C, D, H, W)
        if self.use_conv:
            return conv3d_stride2(x, self.w4, self.bias2d)
        return avgpool3d_2x(x)


# ------------------------------- references -------------------------------- #

def _conv_reference(x_ncdhw, w_dhwio, bias):
    x = jnp.transpose(x_ncdhw, (0, 2, 3, 4, 1))
    y = lax.conv_general_dilated(x, w_dhwio, window_strides=(2, 2, 2),
                                 padding=((1, 1), (1, 1), (1, 1)),
                                 dimension_numbers=('NDHWC', 'DHWIO', 'NDHWC'))
    y = y + bias
    return jnp.transpose(y, (0, 4, 1, 2, 3))


# --------------------------------- main ------------------------------------ #

if __name__ == "__main__":
    key = jax.random.PRNGKey(0)
    k_x, k_p = jax.random.split(key)
    N, C, D, H, W = 2, 4, 16, 16, 16
    x = jax.random.normal(k_x, (N, C, D, H, W), jnp.float32)

    # use_conv = True path (Conv3d k=3, s=2, p=1)
    conv_ds = Downsample(C, use_conv=True, key=k_p)
    y_conv = jax.block_until_ready(conv_ds(x))
    assert y_conv.shape == (N, C, D // 2, H // 2, W // 2)
    y_conv_ref = _conv_reference(x, conv_ds.weight, conv_ds.bias)
    # bf16 activations/weights with f32 accumulation -> loosened tolerance.
    np.testing.assert_allclose(np.asarray(y_conv), np.asarray(y_conv_ref),
                               rtol=2e-2, atol=2e-2)

    # use_conv = False path (AvgPool3d k=2, s=2)
    pool_ds = Downsample(C, use_conv=False, key=k_p)
    y_pool = jax.block_until_ready(pool_ds(x))
    assert y_pool.shape == (N, C, D // 2, H // 2, W // 2)
    y_pool_ref = x.reshape(N, C, D // 2, 2, H // 2, 2, W // 2, 2).mean(axis=(3, 5, 7))
    np.testing.assert_allclose(np.asarray(y_pool), np.asarray(y_pool_ref),
                               rtol=1e-5, atol=1e-5)

    print("KERNEL_OK")
</pallas_src>

<mosaic_0001>
module attributes {stable_mosaic.version = 11 : i64} {
  func.func @_conv3d_s2_kernel(%arg0: i32, %arg1: i32, %arg2: memref<1x8x9x9x48xbf16, #tpu.memory_space<vmem>>, %arg3: memref<4x48x4xbf16, #tpu.memory_space<vmem>>, %arg4: memref<1x4xf32, #tpu.memory_space<vmem>>, %arg5: memref<1x8x8x8x4xf32, #tpu.memory_space<vmem>>) attributes {dimension_semantics = [#tpu.dimension_semantics<parallel>, #tpu.dimension_semantics<parallel>], iteration_bounds = array<i64: 2, 1>, scalar_prefetch = 0 : i64, scratch_operands = 0 : i64, tpu.core_type = #tpu.core_type<tc>, window_params = [{transform_indices = @transform_0, window_bounds = array<i64: 1, 8, 9, 9, 48>}, {pipeline_mode = #tpu.pipeline_mode<synchronous>, transform_indices = @transform_1, window_bounds = array<i64: 4, 48, 4>}, {pipeline_mode = #tpu.pipeline_mode<synchronous>, transform_indices = @transform_2, window_bounds = array<i64: 1, 4>}, {transform_indices = @transform_3, window_bounds = array<i64: 1, 8, 8, 8, 4>}]} {
    %c0 = arith.constant 0 : index
    %c0_0 = arith.constant 0 : index
    %c0_1 = arith.constant 0 : index
    %c0_2 = arith.constant 0 : index
    %c0_3 = arith.constant 0 : index
    %0 = vector.load %arg2[%c0, %c0_0, %c0_1, %c0_2, %c0_3] : memref<1x8x9x9x48xbf16, #tpu.memory_space<vmem>>, vector<1x8x8x8x48xbf16>
    %1 = vector.shape_cast %0 : vector<1x8x8x8x48xbf16> to vector<8x8x8x48xbf16>
    %2 = vector.shape_cast %1 : vector<8x8x8x48xbf16> to vector<512x48xbf16>
    %c0_4 = arith.constant 0 : index
    %c0_5 = arith.constant 0 : index
    %c0_6 = arith.constant 0 : index
    %3 = vector.load %arg3[%c0_4, %c0_5, %c0_6] : memref<4x48x4xbf16, #tpu.memory_space<vmem>>, vector<1x48x4xbf16>
    %4 = vector.shape_cast %3 : vector<1x48x4xbf16> to vector<48x4xbf16>
    %cst = arith.constant dense<0.000000e+00> : vector<512x4xf32>
    %5 = tpu.matmul %2, %4, %cst {dimension_numbers = #tpu.dot_dimension_numbers<[1], [0], [0], [1], [0, 0, 1, 1], [], []>} : vector<512x48xbf16>, vector<48x4xbf16>, vector<512x4xf32> -> vector<512x4xf32>
    %c0_7 = arith.constant 0 : index
    %c0_8 = arith.constant 0 : index
    %c0_9 = arith.constant 0 : index
    %c1 = arith.constant 1 : index
    %c0_10 = arith.constant 0 : index
    %6 = vector.load %arg2[%c0_7, %c0_8, %c0_9, %c1, %c0_10] : memref<1x8x9x9x48xbf16, #tpu.memory_space<vmem>>, vector<1x8x8x8x48xbf16>
    %7 = vector.shape_cast %6 : vector<1x8x8x8x48xbf16> to vector<8x8x8x48xbf16>
    %8 = vector.shape_cast %7 : vector<8x8x8x48xbf16> to vector<512x48xbf16>
    %c1_11 = arith.constant 1 : index
    %c0_12 = arith.constant 0 : index
    %c0_13 = arith.constant 0 : index
    %9 = vector.load %arg3[%c1_11, %c0_12, %c0_13] : memref<4x48x4xbf16, #tpu.memory_space<vmem>>, vector<1x48x4xbf16>
    %10 = vector.shape_cast %9 : vector<1x48x4xbf16> to vector<48x4xbf16>
    %cst_14 = arith.constant dense<0.000000e+00> : vector<512x4xf32>
    %11 = tpu.matmul %8, %10, %cst_14 {dimension_numbers = #tpu.dot_dimension_numbers<[1], [0], [0], [1], [0, 0, 1, 1], [], []>} : vector<512x48xbf16>, vector<48x4xbf16>, vector<512x4xf32> -> vector<512x4xf32>
    %12 = arith.addf %5, %11 : vector<512x4xf32>
    %c0_15 = arith.constant 0 : index
    %c0_16 = arith.constant 0 : index
    %c1_17 = arith.constant 1 : index
    %c0_18 = arith.constant 0 : index
    %c0_19 = arith.constant 0 : index
    %13 = vector.load %arg2[%c0_15, %c0_16, %c1_17, %c0_18, %c0_19] : memref<1x8x9x9x48xbf16, #tpu.memory_space<vmem>>, vector<1x8x8x8x48xbf16>
    %14 = vector.shape_cast %13 : vector<1x8x8x8x48xbf16> to vector<8x8x8x48xbf16>
    %15 = vector.shape_cast %14 : vector<8x8x8x48xbf16> to vector<512x48xbf16>
    %c2 = arith.constant 2 : index
    %c0_20 = arith.constant 0 : index
    %c0_21 = arith.constant 0 : index
    %16 = vector.load %arg3[%c2, %c0_20, %c0_21] : memref<4x48x4xbf16, #tpu.memory_space<vmem>>, vector<1x48x4xbf16>
    %17 = vector.shape_cast %16 : vector<1x48x4xbf16> to vector<48x4xbf16>
    %cst_22 = arith.constant dense<0.000000e+00> : vector<512x4xf32>
    %18 = tpu.matmul %15, %17, %cst_22 {dimension_numbers = #tpu.dot_dimension_numbers<[1], [0], [0], [1], [0, 0, 1, 1], [], []>} : vector<512x48xbf16>, vector<48x4xbf16>, vector<512x4xf32> -> vector<512x4xf32>
    %19 = arith.addf %12, %18 : vector<512x4xf32>
    %c0_23 = arith.constant 0 : index
    %c0_24 = arith.constant 0 : index
    %c1_25 = arith.constant 1 : index
    %c1_26 = arith.constant 1 : index
    %c0_27 = arith.constant 0 : index
    %20 = vector.load %arg2[%c0_23, %c0_24, %c1_25, %c1_26, %c0_27] : memref<1x8x9x9x48xbf16, #tpu.memory_space<vmem>>, vector<1x8x8x8x48xbf16>
    %21 = vector.shape_cast %20 : vector<1x8x8x8x48xbf16> to vector<8x8x8x48xbf16>
    %22 = vector.shape_cast %21 : vector<8x8x8x48xbf16> to vector<512x48xbf16>
    %c3 = arith.constant 3 : index
    %c0_28 = arith.constant 0 : index
    %c0_29 = arith.constant 0 : index
    %23 = vector.load %arg3[%c3, %c0_28, %c0_29] : memref<4x48x4xbf16, #tpu.memory_space<vmem>>, vector<1x48x4xbf16>
    %24 = vector.shape_cast %23 : vector<1x48x4xbf16> to vector<48x4xbf16>
    %cst_30 = arith.constant dense<0.000000e+00> : vector<512x4xf32>
    %25 = tpu.matmul %22, %24, %cst_30 {dimension_numbers = #tpu.dot_dimension_numbers<[1], [0], [0], [1], [0, 0, 1, 1], [], []>} : vector<512x48xbf16>, vector<48x4xbf16>, vector<512x4xf32> -> vector<512x4xf32>
    %26 = arith.addf %19, %25 : vector<512x4xf32>
    %c0_31 = arith.constant 0 : index
    %c0_32 = arith.constant 0 : index
    %27 = vector.load %arg4[%c0_31, %c0_32] : memref<1x4xf32, #tpu.memory_space<vmem>>, vector<1x4xf32>
    %28 = vector.broadcast %27 : vector<1x4xf32> to vector<512x4xf32>
    %29 = arith.addf %26, %28 : vector<512x4xf32>
    %30 = vector.shape_cast %29 : vector<512x4xf32> to vector<1x8x8x8x4xf32>
    %c0_33 = arith.constant 0 : index
    %c0_34 = arith.constant 0 : index
    %c0_35 = arith.constant 0 : index
    %c0_36 = arith.constant 0 : index
    %c0_37 = arith.constant 0 : index
    %31 = vector.load %arg5[%c0_33, %c0_34, %c0_35, %c0_36, %c0_37] : memref<1x8x8x8x4xf32, #tpu.memory_space<vmem>>, vector<1x8x8x8x4xf32>
    tpu.vector_store %arg5[%c0_33, %c0_34, %c0_35, %c0_36, %c0_37], %30 {strides = array<i32>} : memref<1x8x8x8x4xf32, #tpu.memory_space<vmem>>, vector<1x8x8x8x4xf32>,
    return
  }
  func.func @transform_0(%arg0: i32, %arg1: i32) -> (i32, i32, i32, i32, i32) {
    %c0_i32 = arith.constant 0 : i32
    %c0_i32_0 = arith.constant 0 : i32
    %c0_i32_1 = arith.constant 0 : i32
    %c0_i32_2 = arith.constant 0 : i32
    return %arg0, %arg1, %c0_i32, %c0_i32_0, %c0_i32_1 : i32, i32, i32, i32, i32
  }
  func.func @transform_1(%arg0: i32, %arg1: i32) -> (i32, i32, i32) {
    %c0_i32 = arith.constant 0 : i32
    %c0_i32_0 = arith.constant 0 : i32
    %c0_i32_1 = arith.constant 0 : i32
    %c0_i32_2 = arith.constant 0 : i32
    return %c0_i32, %c0_i32_0, %c0_i32_1 : i32, i32, i32
  }
  func.func @transform_2(%arg0: i32, %arg1: i32) -> (i32, i32) {
    %c0_i32 = arith.constant 0 : i32
    %c0_i32_0 = arith.constant 0 : i32
    %c0_i32_1 = arith.constant 0 : i32
    return %c0_i32, %c0_i32_0 : i32, i32
  }
  func.func @transform_3(%arg0: i32, %arg1: i32) -> (i32, i32, i32, i32, i32) {
    %c0_i32 = arith.constant 0 : i32
    %c0_i32_0 = arith.constant 0 : i32
    %c0_i32_1 = arith.constant 0 : i32
    %c0_i32_2 = arith.constant 0 : i32
    return %arg0, %arg1, %c0_i32, %c0_i32_0, %c0_i32_1 : i32, i32, i32, i32, i32
  }
}

</mosaic_0001>

<bundles_post_ra>
// kernel: conv3d_stride2.1
= control target key start
LH: loop header
LB: loop body
LE: loop exit
PB: predicated region body
PF: predicated region fallthrough
CT: control target
= control target key end

     0   :  { %8 = vsyncpa [#allocation3], 0  ;;  %s7806_s0 = inlined_call_operand.hbm [shape: bf16[2,8,9,9,48], index: 0, kind: input, shape index: {}]   ;;  %s7807_s1 = inlined_call_operand.hbm [shape: bf16[4,48,4], index: 1, kind: input, shape index: {}]   ;;  %s7808_s2 = inlined_call_operand.hbm [shape: f32[1,4], index: 2, kind: input, shape index: {}]   ;;  %s7809_s3 = inlined_call_operand.hbm [shape: f32[2,8,8,8,4], index: 3, kind: output, shape index: {}]  }
   0x1   :  { %10 = vsyncpa [#allocation3 + $0x1], 0 }
   0x2   :  { %11 = vsyncpa [#allocation6], 0 }
   0x3   :  { %12 = vsyncpa [#allocation4], 0 }
   0x4   :  { %14 = vsyncpa [#allocation4 + $0x1], 0  ;;  %s6373_s12 = smov 0   ;;  %s6375_s13 = smov 0  }
   0x5   :  { %s6377_s14 = smov 0   ;;  %s6379_s15 = smov 0  }
   0x6   :  { %s6381_s16 = smov 0   ;;  %s6383_s17 = smov 0  }
   0x7 LB: > { %s4893_s18 = sadd.s32 4294967295, %s6343_s17   ;;  %s4894_s19 = sadd.s32 4294967294, %s6343_s17   ;;  %s6343_s17 = sphi %s6383_s17, %s20_s17   ;;  %s6339_s16 = sphi %s6381_s16, %s7880_s16   ;;  %s6335_s15 = sphi %s6379_s15, %s7879_s15   ;;  %s6331_s14 = sphi %s6377_s14, %s7878_s14   ;;  %s6327_s13 = sphi %s6375_s13, %s7877_s13   ;;  %s6323_s12 = sphi %s6373_s12, %s7876_s12  }
   0x8   : > { %p54_p0 = scmp.ne.s32.totalorder %s6327_s13, %s6323_s12  ;;  %p6407_p1 = scmp.eq.s32.totalorder %s4893_s18, 0 }
   0x9   : > { %p6411_p2 = scmp.eq.s32.totalorder %s4893_s18, 1  ;;  %p128_p3 = scmp.eq.s32.totalorder %s4894_s19, 1 }
   0xa   : > { %s7823_s20 = scalar_select %p6407_p1, 1, 0 }
   0xb   : > { %p6417_p4 = por %p6407_p1, %p54_p0  ;;  %p4895_p5 = scmp.ge.s32.totalorder %s6343_s17, 1 }
   0xc   : > { %p6422_p6 = por %p128_p3, %p54_p0  ;;  %p135_p7 = scmp.lt.s32.totalorder %s6343_s17, 3 }
   0xd   : > { %s7825_s22 = scalar_select %p6417_p4, 1, 0 }
   0xe   : > { %s7826_s23 = scalar_select %p6422_p6, 1, 0 }
   0xf   : > { %p6427_p8 = pnand %p4895_p5, %p135_p7  ;;  %s6345_s25 = smov [#allocation5]  }
  0x10   : > { %s147_s26 = sshll.u32 %s6345_s25, 4  ;;  %s6346_s28 = smov [#allocation7]   ;;  %s6431_s26 = int_to_ptr.vmem [resolvable:$true] %s147_s26 }
  0x11   : > { %p5998_p9 = pneg %p6427_p8  ;;  %s161_s29 = sshll.u32 %s6346_s28, 4  ;;  %s6442_s29 = int_to_ptr.vmem [resolvable:$true] %s161_s29 }
  0x12   : > { %s6171_s5 = scalar_lea.hbm %s7807_s1, 1536 }
  0x13   : > { %p6438_p11 = pnand %p5998_p9, %p6407_p1  ;;  %p6172_p12 = scmp.ne.s32.totalorder %s7807_s1, %s6171_s5 }
  0x14   : > { %p6178_p5 = scmp.lt.u32.totalorder %s6171_s5, %s7807_s1 }
  0x15   : > { %p6173_p13 = pneg %p6438_p11 }
  0x17   : > { %p6174_p0 = pnand %p6173_p13, %p6172_p12 }
  0x19   : > { %p6175_p3 = pneg %p6174_p0 }
  0x1b   : > { %p6180_p7 = pnand %p6178_p5, %p6175_p3 }
  0x1d   : > { %6183 = shalt.err (!%p6180_p7)
}
  0x1e   : > { %s6184_s10 = scalar_lea.vmem %s6431_s26, 1536  ;;  %p6192_p1 = scmp.lt.s32.totalorder %s6431_s26, %s6431_s26 }
  0x1f   : > { %p6185_p9 = scmp.ne.s32.totalorder %s6431_s26, %s6184_s10  ;;  %p6193_p12 = scmp.lt.s32.totalorder %s6184_s10, %s6184_s10 }
  0x21   : > { %p6187_p10 = pnand %p6185_p9, %p6173_p13  ;;  %p6194_p0 = por %p6193_p12, %p6192_p1 }
  0x23   : > { %p6188_p6 = pneg %p6187_p10 }
  0x25   : > { %p6195_p4 = pnand %p6194_p0, %p6188_p6 }
  0x27   : > { %6198 = shalt.err (!%p6195_p4)
}
  0x28   : > { %s6347_s11 = smov 64   ;;  %s6348_s18 = smov 4  }
  0x29   : > { %6001 = dma.hbm_to_vmem [thread:$0]  (!%p6438_p11), %s7807_s1, 1536, %s6431_s26, [#allocation6], %s6347_s11, %s6347_s11, %s6348_s18  }
  0x2a   : > { %s6199_s4 = scalar_lea.hbm %s7808_s2, 16 }
  0x2b   : > { %p6200_p1 = scmp.ne.s32.totalorder %s7808_s2, %s6199_s4  ;;  %p6206_p10 = scmp.lt.u32.totalorder %s6199_s4, %s7808_s2 }
  0x2d   : > { %p6202_p4 = pnand %p6200_p1, %p6173_p13 }
  0x2f   : > { %p6203_p6 = pneg %p6202_p4 }
  0x31   : > { %p6208_p3 = pnand %p6206_p10, %p6203_p6 }
  0x33   : > { %6211 = shalt.err (!%p6208_p3)
}
  0x34   : > { %s6212_s26 = scalar_lea.vmem %s6442_s29, 16  ;;  %s6219_s9 = scalar_lea.vmem %s6442_s29, 32 }
  0x35   : > { %p6213_p5 = scmp.ne.s32.totalorder %s6442_s29, %s6212_s26  ;;  %p6220_p12 = scmp.lt.s32.totalorder %s6442_s29, %s6442_s29 }
  0x36   : > { %p6221_p0 = scmp.lt.s32.totalorder %s6219_s9, %s6212_s26 }
  0x37   : > { %p6215_p7 = pnand %p6213_p5, %p6173_p13 }
  0x38   : > { %p6222_p1 = por %p6221_p0, %p6220_p12 }
  0x39   : > { %p6216_p9 = pneg %p6215_p7 }
  0x3b   : > { %p6223_p4 = pnand %p6222_p1, %p6216_p9 }
  0x3d   : > { %6226 = shalt.err (!%p6223_p4)
}
  0x3e   : > { %6004 = dma.hbm_to_vmem [thread:$0]  (!%p6438_p11), %s7808_s2, 16, %s6442_s29, [#allocation6]  }
  0x3f   : > { %s32_s25 = sadd.s32 1, %s6339_s16  ;;  %s41_s28 = sadd.s32 1, %s6331_s14 }
  0x40   : > { %p34_p13 = scmp.ge.s32.totalorder %s32_s25, 2  ;;  %p48_p6 = scmp.ne.s32.totalorder %s6331_s14, %s6327_s13 }
  0x41   : > { %p49_p10 = scmp.eq.s32.totalorder %s6343_s17, 0  ;;  %p6015_p3 = scmp.lt.s32.totalorder %s6343_s17, 2 }
  0x42   : > { %s7882_s25 = smov (%p34_p13, %s32_s25), 0  ;;  %p6510_p7 = por %p6411_p2, %p48_p6 }
  0x43   : > { %p50_p5 = por %p49_p10, %p48_p6  ;;  %s36_s30 = ssub.s32 %s6339_s16, %s7882_s25 }
  0x44   : > { %s7829_s27 = scalar_select %p6510_p7, 1, 0 }
  0x45   : > { %s172_s4 = sand.u32 1, %s6331_s14   ;;  %p39_p9 = scmp.eq.s32.totalorder %s36_s30, 0 }
  0x46   : > { %s5983_s29 = smul.u32 576, %s172_s4  ;;  %p6517_p11 = pnand %p6015_p3, %p50_p5 }
  0x47   : > { %s6522_s6 = scalar_select %p39_p9, %s6331_s14, %s41_s28  }
  0x48   : > { %s5984_s7 = smul.u32 9216, %s6339_s16  ;;  %s176_s8 = scalar_lea.vmem [#allocation2], %s5983_s29 }
  0x49   : > { %s186_s26 = sshll.u32 %s176_s8, 4  ;;  %s6532_s19 = scalar_lea.sflag [#allocation3], %s172_s4  ;;  %s6530_s26 = int_to_ptr.vmem [resolvable:$true] %s186_s26 }
  0x4a   : > { %s6528_s10 = scalar_lea.hbm %s7806_s0, %s5984_s7  ;;  %p6229_p12 = pneg %p6517_p11 }
  0x4b   : > { %s6227_s30 = scalar_lea.hbm %s6528_s10, 9216  ;;  %s6232_s7 = scalar_lea.hbm %s7806_s0, 18432 }
  0x4c   : > { %p6228_p2 = scmp.ne.s32.totalorder %s6528_s10, %s6227_s30  ;;  %p6233_p4 = scmp.lt.u32.totalorder %s6528_s10, %s7806_s0 }
  0x4d   : > { %p6234_p13 = scmp.lt.u32.totalorder %s6232_s7, %s6227_s30  ;;  %p6236_p10 = scmp.lt.u32.totalorder %s6227_s30, %s6528_s10 }
  0x4e   : > { %p6230_p0 = pnand %p6229_p12, %p6228_p2 }
  0x4f   : > { %p6235_p6 = por %p6234_p13, %p6233_p4 }
  0x50   : > { %p6231_p1 = pneg %p6230_p0 }
  0x51   : > { %p6237_p3 = por %p6236_p10, %p6235_p6 }
  0x53   : > { %p6238_p5 = pnand %p6237_p3, %p6231_p1 }
  0x55   : > { %6241 = shalt.err (!%p6238_p5)
}
  0x56   : > { %s6242_s4 = scalar_lea.vmem %s6530_s26, 9216  ;;  %s6349_s9 = smov [#allocation2]  }
  0x57   : > { %p6243_p9 = scmp.ne.s32.totalorder %s6530_s26, %s6242_s4  ;;  %s6247_s28 = sshll.u32 %s6349_s9, 4  ;;  %s6248_s28 = int_to_ptr.vmem [resolvable:$false] %s6247_s28 }
  0x58   : > { %s6249_s29 = scalar_lea.vmem %s6248_s28, 18432  ;;  %p6250_p7 = scmp.lt.s32.totalorder %s6530_s26, %s6248_s28 }
  0x59   : > { %p6245_p2 = pnand %p6243_p9, %p6229_p12  ;;  %p6251_p4 = scmp.lt.s32.totalorder %s6249_s29, %s6242_s4 }
  0x5b   : > { %p6246_p0 = pneg %p6245_p2  ;;  %p6252_p13 = por %p6251_p4, %p6250_p7 }
  0x5d   : > { %p6253_p6 = pnand %p6252_p13, %p6246_p0 }
  0x5f   : > { %6256 = shalt.err (!%p6253_p6)
}
  0x60   : > { %6008 = dma.hbm_to_vmem [thread:$0]  (!%p6517_p11), %s6528_s10, 9216, %s6530_s26, %s6532_s19, %s6347_s11, %s6347_s11, %s6348_s18  }
  0x61   : > { %198 = sbr.rel (%p6427_p8) target bundleno = 670 (0x29e), region = 32 }
  0x68   : > { %s6566_s30 = sand.u32 1, %s6327_s13   ;;  %p7831_p7 = scmp.ne.s32.totalorder %s7825_s22, 0 }
  0x69   : > { %s5985_s7 = smul.u32 576, %s6566_s30  ;;  %s201_s8 = scalar_lea.sflag [#allocation3], %s6566_s30 }
  0x6b   : > { %s6570_s21 = scalar_lea.vmem [#allocation2], %s5985_s7 }
  0x6c   : > { %6310 = dma.done.wait (%p7831_p7), %s201_s8, 9216  }
  0x6d   : > { %6312 = vsyncadd (%p7831_p7), %s201_s8, 4294958080  ;;  %p7832_p11 = scmp.ne.s32.totalorder %s7823_s20, 0 }
  0x6f   : > { %6314 = dma.done.wait (%p7832_p11), [#allocation6], 1552  }
  0x70   : > { %6316 = vsyncadd (%p7832_p11), [#allocation6], 4294965744  ;;  %v6073_v0 = vld [vmem:[#allocation5 + $0x18] sm:$0xff]   ;;  %v6074_v1 = vld [vmem:[#allocation5 + $0x30] sm:$0xff]   ;;  %vm372_vm0 = vsmask.f32 3328 }
  0x71   : > { %vm373_vm1 = vsmask.f32 7440  ;;  %5511 = vmatprep.subr.bf16.mxu1 %v6073_v0  ;;  %v6075_v2 = vld [vmem:[#allocation5 + $0x20] sm:$0xff]   ;;  %5651 = vmatprep.subr.bf16.mxu0 %v6074_v1  ;;  %v6076_v3 = vld [vmem:[#allocation5 + $0x38] sm:$0xff]   ;;  %v6077_v4 = vld [vmem:[#allocation5 + $0x28] sm:$0xff]   ;;  %vm1392_vm2 = vcmask 392192  }
  0x72   : > { %5512 = vmatpush3.bf16.msra.mxu1 %v6073_v0  ;;  %5652 = vmatpush3.bf16.msra.mxu0 %v6074_v1  ;;  %v6078_v5 = vld [vmem:[#allocation5 + $0x40] sm:$0xff]   ;;  %v6584_v7 = vld [vmem:[%s6570_s21 + $0x8] sm:$0xf]  ;;  %v309_v9 = vld [vmem:[%s6570_s21 + $0xc] sm:$0x1]  ;;  %s4903_s20 = sshll.u32 %s6566_s30, 9 }
  0x73   : > { %5513 = vmatprep.subr.bf16.mxu1 %v6075_v2  ;;  %5653 = vmatprep.subr.bf16.mxu0 %v6076_v3  ;;  %v6581_v6 = vld [vmem:[%s6570_s21] sm:$0xf]  ;;  %v308_v8 = vld [vmem:[%s6570_s21 + $0x4] sm:$0x1]  ;;  %v390_v13 = vshrl.u32 %v6584_v7, 16  ;;  %v393_v14 = vshll.u32 %v6584_v7, 16  ;;  %vm6606_vm3 = vmor %vm372_vm0, %vm373_vm1 }
  0x74   : > { %v376_v10 = vshrl.u32 %v6581_v6, 16  ;;  %v379_v11 = vshll.u32 %v6581_v6, 16  ;;  %v385_v12 = vshll.u32 %v308_v8, 16  ;;  %v399_v15 = vshll.u32 %v309_v9, 16  ;;  %v6079_v20 = vld [vmem:[%s6570_s21 + $0x8] ss:$8 sps:$4 sm:$0xff]  }
  0x75   : > { %v392_v19 = vrot.slane %v390_v13, 4  ;;  %v395_v21 = vrot.slane %v393_v14, 5  ;;  %v6594_v23 = vld [vmem:[%s6570_s21 + $0x10] sm:$0xf]  ;;  %v6597_v24 = vld [vmem:[%s6570_s21 + $0x18] sm:$0xf]  ;;  %5657 = vmatprep.mubr.msk.bf16.mxu0 %vm1392_vm2, %v6079_v20 }
  0x76   : > { %5514 = vmatpush3.bf16.msra.mxu1 %v6075_v2  ;;  %5654 = vmatpush3.bf16.msra.mxu0 %v6076_v3  ;;  %v378_v16 = vrot.slane %v376_v10, 4  ;;  %v381_v17 = vrot.slane %v379_v11, 5  ;;  %v387_v18 = vrot.slane %v385_v12, 5  ;;  %v401_v22 = vrot.slane %v399_v15, 5  ;;  %v310_v26 = vld [vmem:[%s6570_s21 + $0x14] sm:$0x1] }
  0x77   : > { %5515 = vmatprep.subr.bf16.mxu1 %v6077_v4  ;;  %5655 = vmatprep.subr.bf16.mxu0 %v6078_v5  ;;  %v311_v27 = vld [vmem:[%s6570_s21 + $0x1c] sm:$0x1]  ;;  %v404_v28 = vshrl.u32 %v6594_v23, 16  ;;  %v407_v29 = vshll.u32 %v6594_v23, 16  ;;  %v396_v31 = vor.u32 %v395_v21, %v392_v19  ;;  %v413_v32 = vshll.u32 %v310_v26, 16  ;;  %v6080_v35 = vld [vmem:[#allocation5] sm:$0xff]  }
  0x78   : > { %v382_v25 = vor.u32 %v381_v17, %v378_v16  ;;  %v418_v33 = vshrl.u32 %v6597_v24, 16  ;;  %v421_v34 = vshll.u32 %v6597_v24, 16  ;;  %v427_v39 = vshll.u32 %v311_v27, 16  ;;  %v6081_v47 = vld [vmem:[%s6570_s21 + $0x18] ss:$8 sps:$4 sm:$0xff]   ;;  %v6082_v48 = vld [vmem:[#allocation5 + $0x48] sm:$0xff]  }
  0x79   : > { %v406_v37 = vrot.slane %v404_v28, 4  ;;  %v409_v38 = vrot.slane %v407_v29, 5  ;;  %v397_v40 = vrot.slane %v396_v31, 4  ;;  %v415_v41 = vrot.slane %v413_v32, 5  ;;  %v6618_v51 = vld [vmem:[%s6570_s21 + $0x20] sm:$0xf] }
  0x7a   : > { %5516 = vmatpush3.bf16.msra.mxu1 %v6077_v4  ;;  %5656 = vmatpush3.bf16.msra.mxu0 %v6078_v5  ;;  %v383_v36 = vrot.slane %v382_v25, 4  ;;  %v420_v42 = vrot.slane %v418_v33, 4  ;;  %v423_v43 = vrot.slane %v421_v34, 5  ;;  %v429_v46 = vrot.slane %v427_v39, 5  ;;  %v6622_v54 = vld [vmem:[%s6570_s21 + $0x28] sm:$0xf] }
  0x7b   : > { %5581 = vmatprep.subr.bf16.mxu1 %v6080_v35  ;;  %v410_v45 = vor.u32 %v409_v38, %v406_v37  ;;  %v402_v49 = vsel %vm6606_vm3, %v397_v40, %v401_v22  ;;  %5721 = vmatprep.subr.bf16.mxu0 %v6082_v48  ;;  %v312_v55 = vld [vmem:[%s6570_s21 + $0x24] sm:$0x1]  ;;  %v432_v56 = vshrl.u32 %v6618_v51, 16  ;;  %v313_v58 = vld [vmem:[%s6570_s21 + $0x2c] sm:$0x1]  ;;  %v435_v59 = vshll.u32 %v6618_v51, 16 }
  0x7c   : > { %v388_v44 = vsel %vm6606_vm3, %v383_v36, %v387_v18  ;;  %v424_v50 = vor.u32 %v423_v43, %v420_v42  ;;  %v441_v60 = vshll.u32 %v312_v55, 16  ;;  %v446_v61 = vshrl.u32 %v6622_v54, 16  ;;  %v6093_v2 = vld [vmem:[#allocation5 + $0x8] sm:$0xff]   ;;  %v6094_v9 = vld [vmem:[#allocation5 + $0x50] sm:$0xff]   ;;  %v6640_v16 = vld [vmem:[%s6570_s21 + $0x38] sm:$0xf] }
  0x7d   : > { %v4904_v52 = vcombine.low %v388_v44, %v402_v49  ;;  %v411_v53 = vrot.slane %v410_v45, 4  ;;  %5658 = vmatmul.mubr.msk.bf16.vlgmr.msra.gmra.mrb[0].mxu0 %vm1392_vm2, %v6081_v47  ;;  %v434_v63 = vrot.slane %v432_v56, 4  ;;  %v449_v0 = vshll.u32 %v6622_v54, 16  ;;  %v6083_v13 = vld [vmem:[%s6570_s21 + $0x28] ss:$8 sps:$4 sm:$0xff]   ;;  %s7558_s22 = scalar_lea.vmem [#allocation8], %s4903_s20 }
  0x7e   : > { %v425_v57 = vrot.slane %v424_v50, 4  ;;  %5722 = vmatpush3.bf16.msra.mxu0 %v6082_v48  ;;  %v455_v1 = vshll.u32 %v313_v58, 16  ;;  %v437_v4 = vrot.slane %v435_v59, 5  ;;  %v443_v5 = vrot.slane %v441_v60, 5  ;;  %v6637_v14 = vld [vmem:[%s6570_s21 + $0x30] sm:$0xf]  ;;  %5661 = vmatprep.mubr.msk.bf16.mxu0 %vm1392_vm2, %v6083_v13 }
  0x7f   : > { %5517 = vmatprep.mubr.msk.bf16.mxu1 %vm1392_vm2, %v4904_v52  ;;  %v416_v62 = vsel %vm6606_vm3, %v411_v53, %v415_v41  ;;  %v448_v8 = vrot.slane %v446_v61, 4  ;;  %v451_v11 = vrot.slane %v449_v0, 5  ;;  %v314_v17 = vld [vmem:[%s6570_s21 + $0x34] sm:$0x1]  ;;  %v315_v18 = vld [vmem:[%s6570_s21 + $0x3c] sm:$0x1]  ;;  %5723 = vmatprep.subr.bf16.mxu0 %v6094_v9 }
  0x80   : > { %v430_v3 = vsel %vm6606_vm3, %v425_v57, %v429_v46  ;;  %v457_v12 = vrot.slane %v455_v1, 5  ;;  %v438_v15 = vor.u32 %v437_v4, %v434_v63  ;;  %v460_v20 = vshrl.u32 %v6637_v14, 16  ;;  %v6105_v25 = vld [vmem:[#allocation5 + $0x10] sm:$0xff]   ;;  %v6084_v36 = vld [vmem:[%s6570_s21 + $0x38] ss:$8 sps:$4 sm:$0xff]   ;;  %s5370_s24 = sshll.u32 %s6335_s15, 13 }
  0x81   : > { %v4905_v10 = vcombine.low %v416_v62, %v430_v3  ;;  %v452_v19 = vor.u32 %v451_v11, %v448_v8  ;;  %v463_v21 = vshll.u32 %v6637_v14, 16  ;;  %v469_v22 = vshll.u32 %v314_v17, 16  ;;  %v6654_v40 = vld [vmem:[%s6570_s21 + $0x48] sm:$0xf]  ;;  %v6106_v41 = vld [vmem:[#allocation5 + $0x58] sm:$0xff]   ;;  %s4787_s11 = sshll.u32 %s7558_s22, 4  ;;  %s7748_s26 = scalar_lea.hbm %s7809_s3, %s5370_s24  ;;  %s7750_s11 = int_to_ptr.vmem [resolvable:$true] %s4787_s11 }
  0x82   : > { %v439_v26 = vrot.slane %v438_v15, 4  ;;  %v474_v27 = vshrl.u32 %v6640_v16, 16  ;;  %v477_v28 = vshll.u32 %v6640_v16, 16  ;;  %v483_v29 = vshll.u32 %v315_v18, 16  ;;  %5724 = vmatpush3.bf16.msra.mxu0 %v6094_v9  ;;  %v6660_v44 = vld [vmem:[%s6570_s21 + $0x50] sm:$0xf] }
  0x83   : > { %5518 = vmatmul.mubr.msk.bf16.vlgmr.msra.gmra.mrb[0].mxu1 %vm1392_vm2, %v4905_v10  ;;  %v453_v31 = vrot.slane %v452_v19, 4  ;;  %v462_v32 = vrot.slane %v460_v20, 4  ;;  %v465_v33 = vrot.slane %v463_v21, 5  ;;  %v471_v34 = vrot.slane %v469_v22, 5  ;;  %v316_v45 = vld [vmem:[%s6570_s21 + $0x4c] sm:$0x1]  ;;  %5725 = vmatprep.subr.bf16.mxu0 %v6106_v41 }
  0x84   : > { %5582 = vmatpush3.bf16.msra.mxu1 %v6080_v35  ;;  %v444_v35 = vsel %vm6606_vm3, %v439_v26, %v443_v5  ;;  %v476_v37 = vrot.slane %v474_v27, 4  ;;  %v479_v38 = vrot.slane %v477_v28, 5  ;;  %v485_v39 = vrot.slane %v483_v29, 5  ;;  %v317_v46 = vld [vmem:[%s6570_s21 + $0x54] sm:$0x1]  ;;  %s4771_s15 = scalar_lea.sflag [#allocation4], %s6566_s30 }
  0x85   : > { %5583 = vmatprep.subr.bf16.mxu1 %v6093_v2  ;;  %v458_v42 = vsel %vm6606_vm3, %v453_v31, %v457_v12  ;;  %v466_v43 = vor.u32 %v465_v33, %v462_v32  ;;  %5662 = vmatmul.mubr.msk.bf16.gmra.mrb[4].mxu0 %vm1392_vm2, %v6084_v36  ;;  %v488_v49 = vshrl.u32 %v6654_v40, 16  ;;  %v491_v50 = vshll.u32 %v6654_v40, 16  ;;  %v6085_v57 = vld [vmem:[%s6570_s21 + $0x50] ss:$8 sps:$4 sm:$0xff]   ;;  %v6677_v3 = vld [vmem:[%s6570_s21 + $0x60] sm:$0xf] }
  0x86   : > { %v4906_v47 = vcombine.low %v444_v35, %v458_v42  ;;  %v480_v48 = vor.u32 %v479_v38, %v476_v37  ;;  %v497_v53 = vshll.u32 %v316_v45, 16  ;;  %v502_v55 = vshrl.u32 %v6660_v44, 16  ;;  %5726 = vmatpush3.bf16.msra.mxu0 %v6106_v41  ;;  %v6671_v62 = vld [vmem:[%s6570_s21 + $0x58] sm:$0xf]  ;;  %5665 = vmatprep.mubr.msk.bf16.mxu0 %vm1392_vm2, %v6085_v57  ;;  %7836 = vst [vmem:[#allocation13_spill] sm:$0xff] %v6677_v3  ;;  %s6257_s10 = scalar_lea.vmem %s7750_s11, 8192 }
  0x87   : > { %v467_v52 = vrot.slane %v466_v43, 4  ;;  %v505_v56 = vshll.u32 %v6660_v44, 16  ;;  %v490_v59 = vrot.slane %v488_v49, 4  ;;  %v493_v60 = vrot.slane %v491_v50, 5  ;;  %7835 = vst [vmem:[#allocation12_spill] sm:$0xff] %v6671_v62  ;;  %p6258_p8 = scmp.ne.s32.totalorder %s7750_s11, %s6257_s10  ;;  %p7873_p12 = scmp.ne.s32.totalorder %s7829_s27, 0 }
  0x88   : > { %5584 = vmatpush3.bf16.msra.mxu1 %v6093_v2  ;;  %5521 = vmatprep.mubr.msk.bf16.mxu1 %vm1392_vm2, %v4906_v47  ;;  %v481_v58 = vrot.slane %v480_v48, 4  ;;  %v511_v61 = vshll.u32 %v317_v46, 16  ;;  %v499_v0 = vrot.slane %v497_v53, 5  ;;  %v504_v1 = vrot.slane %v502_v55, 4  ;;  %v318_v9 = vld [vmem:[%s6570_s21 + $0x5c] sm:$0x1] }
  0x89   : > { %5585 = vmatprep.subr.bf16.mxu1 %v6105_v25  ;;  %v472_v63 = vsel %vm6606_vm3, %v467_v52, %v471_v34  ;;  %v507_v2 = vrot.slane %v505_v56, 5  ;;  %v494_v5 = vor.u32 %v493_v60, %v490_v59  ;;  %v319_v10 = vld [vmem:[%s6570_s21 + $0x64] sm:$0x1]  ;;  %v516_v11 = vshrl.u32 %v6671_v62, 16  ;;  %v6086_v22 = vld [vmem:[%s6570_s21 + $0x60] ss:$8 sps:$4 sm:$0xff]   ;;  %p6259_p1 = pnand %p6258_p8, %p7873_p12 }
  0x8a   : > { %v486_v4 = vsel %vm6606_vm3, %v481_v58, %v485_v39  ;;  %v513_v8 = vrot.slane %v511_v61, 5  ;;  %v519_v15 = vshll.u32 %v6671_v62, 16  ;;  %v525_v17 = vshll.u32 %v318_v9, 16  ;;  %v6690_v29 = vld [vmem:[%s6570_s21 + $0x68] sm:$0xf]  ;;  %s6350_s19 = smov [#allocation8]  }
  0x8b   : > { %v4907_v12 = vcombine.low %v472_v63, %v486_v4  ;;  %v508_v13 = vor.u32 %v507_v2, %v504_v1  ;;  %v495_v18 = vrot.slane %v494_v5, 4  ;;  %v518_v19 = vrot.slane %v516_v11, 4  ;;  %7837 = vst [vmem:[#allocation14_spill] sm:$0xff] %v6690_v29  ;;  %v6696_v34 = vld [vmem:[%s6570_s21 + $0x70] sm:$0xf]  ;;  %p6260_p10 = pneg %p6259_p1  ;;  %s6261_s4 = sshll.u32 %s6350_s19, 4  ;;  %s6262_s4 = int_to_ptr.vmem [resolvable:$false] %s6261_s4 }
  0x8c   : > { %5586 = vmatpush3.bf16.msra.mxu1 %v6105_v25  ;;  %v530_v20 = vshrl.u32 %v6677_v3, 16  ;;  %v533_v21 = vshll.u32 %v6677_v3, 16  ;;  %v521_v27 = vrot.slane %v519_v15, 5  ;;  %v527_v25 = vrot.slane %v525_v17, 5  ;;  %7838 = vst [vmem:[#allocation15_spill] sm:$0xff] %v6696_v34  ;;  %s6263_s9 = scalar_lea.vmem %s6262_s4, 16384  ;;  %p6264_p3 = scmp.lt.s32.totalorder %s7750_s11, %s6262_s4 }
  0x8d   : > { %5522 = vmatmul.mubr.msk.bf16.gmra.mrb[4].mxu1 %vm1392_vm2, %v4907_v12  ;;  %v509_v26 = vrot.slane %v508_v13, 4  ;;  %v539_v28 = vshll.u32 %v319_v10, 16  ;;  %v500_v31 = vsel %vm6606_vm3, %v495_v18, %v499_v0  ;;  %5666 = vmatmul.mubr.msk.bf16.gmra.mrb[8].mxu0 %vm1392_vm2, %v6086_v22  ;;  %v320_v36 = vld [vmem:[%s6570_s21 + $0x6c] sm:$0x1]  ;;  %v321_v39 = vld [vmem:[%s6570_s21 + $0x74] sm:$0x1]  ;;  %p6265_p5 = scmp.lt.s32.totalorder %s6263_s9, %s6257_s10 }
  0x8e   : > { %v532_v32 = vrot.slane %v530_v20, 4  ;;  %v535_v33 = vrot.slane %v533_v21, 5  ;;  %v522_v37 = vor.u32 %v521_v27, %v518_v19  ;;  %v544_v41 = vshrl.u32 %v6690_v29, 16  ;;  %v6087_v47 = vld [vmem:[%s6570_s21 + $0x70] ss:$8 sps:$4 sm:$0xff]  }
  0x8f   : > { %v514_v35 = vsel %vm6606_vm3, %v509_v26, %v513_v8  ;;  %v541_v38 = vrot.slane %v539_v28, 5  ;;  %v547_v45 = vshll.u32 %v6690_v29, 16  ;;  %v553_v46 = vshll.u32 %v320_v36, 16  ;;  %v6708_v53 = vld [vmem:[%s6570_s21 + $0x78] sm:$0xf]  ;;  %5669 = vmatprep.mubr.msk.bf16.mxu0 %vm1392_vm2, %v6087_v47  ;;  %p6266_p9 = por %p6265_p5, %p6264_p3 }
  0x90   : > { %v4908_v42 = vcombine.low %v500_v31, %v514_v35  ;;  %v536_v43 = vor.u32 %v535_v33, %v532_v32  ;;  %v523_v48 = vrot.slane %v522_v37, 4  ;;  %v546_v49 = vrot.slane %v544_v41, 4  ;;  %7839 = vst [vmem:[#allocation16_spill] sm:$0xff] %v6708_v53  ;;  %v6713_v59 = vld [vmem:[%s6570_s21 + $0x80] sm:$0xf] }
  0x91   : > { %v558_v50 = vshrl.u32 %v6696_v34, 16  ;;  %v561_v52 = vshll.u32 %v6696_v34, 16  ;;  %v549_v56 = vrot.slane %v547_v45, 5  ;;  %v555_v57 = vrot.slane %v553_v46, 5  ;;  %7840 = vst [vmem:[#allocation17_spill] sm:$0xff] %v6713_v59  ;;  %p6267_p2 = pnand %p6266_p9, %p6260_p10 }
  0x92   : > { %5525 = vmatprep.mubr.msk.bf16.mxu1 %vm1392_vm2, %v4908_v42  ;;  %v537_v55 = vrot.slane %v536_v43, 4  ;;  %v567_v58 = vshll.u32 %v321_v39, 16  ;;  %v528_v60 = vsel %vm6606_vm3, %v523_v48, %v527_v25  ;;  %v322_v0 = vld [vmem:[%s6570_s21 + $0x7c] sm:$0x1]  ;;  %v323_v1 = vld [vmem:[%s6570_s21 + $0x84] sm:$0x1] }
  0x93   : > { %v560_v61 = vrot.slane %v558_v50, 4  ;;  %v563_v63 = vrot.slane %v561_v52, 5  ;;  %v550_v4 = vor.u32 %v549_v56, %v546_v49  ;;  %v572_v8 = vshrl.u32 %v6708_v53, 16  ;;  %v6088_v13 = vld [vmem:[%s6570_s21 + $0x80] ss:$8 sps:$4 sm:$0xff]  }
  0x94   : > { %v542_v2 = vsel %vm6606_vm3, %v537_v55, %v541_v38  ;;  %v569_v5 = vrot.slane %v567_v58, 5  ;;  %v575_v11 = vshll.u32 %v6708_v53, 16  ;;  %v581_v12 = vshll.u32 %v322_v0, 16  ;;  %v6725_v15 = vld [vmem:[%s6570_s21 + $0x90] sm:$0xf] }
  0x95   : > { %v4909_v9 = vcombine.low %v528_v60, %v542_v2  ;;  %v564_v10 = vor.u32 %v563_v63, %v560_v61  ;;  %7841 = vst [vmem:[#allocation18_spill] sm:$0xff] %v6725_v15  ;;  %v551_v17 = vrot.slane %v550_v4, 4  ;;  %v574_v18 = vrot.slane %v572_v8, 4  ;;  %v6730_v21 = vld [vmem:[%s6570_s21 + $0x98] sm:$0xf]  ;;  %5670 = vmatmul.mubr.msk.bf16.gmra.mrb[12].mxu0 %vm1392_vm2, %v6088_v13 }
  0x96   : > { %v586_v19 = vshrl.u32 %v6713_v59, 16  ;;  %v589_v20 = vshll.u32 %v6713_v59, 16  ;;  %7842 = vst [vmem:[#allocation19_spill] sm:$0xff] %v6730_v21  ;;  %v577_v26 = vrot.slane %v575_v11, 5  ;;  %v583_v27 = vrot.slane %v581_v12, 5 }
  0x97   : > { %5526 = vmatmul.mubr.msk.bf16.gmra.mrb[8].mxu1 %vm1392_vm2, %v4909_v9  ;;  %v565_v22 = vrot.slane %v564_v10, 4  ;;  %v595_v25 = vshll.u32 %v323_v1, 16  ;;  %v324_v28 = vld [vmem:[%s6570_s21 + $0x94] sm:$0x1]  ;;  %v556_v31 = vsel %vm6606_vm3, %v551_v17, %v555_v57  ;;  %v325_v36 = vld [vmem:[%s6570_s21 + $0x9c] sm:$0x1] }
  0x98   : > { %v588_v32 = vrot.slane %v586_v19, 4  ;;  %v591_v33 = vrot.slane %v589_v20, 5  ;;  %v600_v35 = vshrl.u32 %v6725_v15, 16  ;;  %v578_v38 = vor.u32 %v577_v26, %v574_v18  ;;  %v6089_v47 = vld [vmem:[%s6570_s21 + $0x98] ss:$8 sps:$4 sm:$0xff]  }
  0x99   : > { %v570_v37 = vsel %vm6606_vm3, %v565_v22, %v569_v5  ;;  %v597_v39 = vrot.slane %v595_v25, 5  ;;  %v603_v41 = vshll.u32 %v6725_v15, 16  ;;  %v609_v46 = vshll.u32 %v324_v28, 16  ;;  %v6744_v48 = vld [vmem:[%s6570_s21 + $0xa0] sm:$0xf]  ;;  %5673 = vmatprep.mubr.msk.bf16.mxu0 %vm1392_vm2, %v6089_v47 }
  0x9a   : > { %v4910_v42 = vcombine.low %v556_v31, %v570_v37  ;;  %v592_v43 = vor.u32 %v591_v33, %v588_v32  ;;  %v602_v45 = vrot.slane %v600_v35, 4  ;;  %v579_v49 = vrot.slane %v578_v38, 4  ;;  %v6749_v56 = vld [vmem:[%s6570_s21 + $0xa8] sm:$0xf]  ;;  %v326_v61 = vld [vmem:[%s6570_s21 + $0xa4] sm:$0x1] }
  0x9b   : > { %v605_v50 = vrot.slane %v603_v41, 5  ;;  %v614_v52 = vshrl.u32 %v6730_v21, 16  ;;  %v617_v55 = vshll.u32 %v6730_v21, 16  ;;  %v611_v58 = vrot.slane %v609_v46, 5  ;;  %v327_v5 = vld [vmem:[%s6570_s21 + $0xac] sm:$0x1] }
  0x9c   : > { %5529 = vmatprep.mubr.msk.bf16.mxu1 %vm1392_vm2, %v4910_v42  ;;  %v593_v57 = vrot.slane %v592_v43, 4  ;;  %v623_v60 = vshll.u32 %v325_v36, 16  ;;  %v628_v63 = vshrl.u32 %v6744_v48, 16  ;;  %v584_v0 = vsel %vm6606_vm3, %v579_v49, %v583_v27  ;;  %v6090_v19 = vld [vmem:[%s6570_s21 + $0xa8] ss:$8 sps:$4 sm:$0xff]  }
  0x9d   : > { %v606_v1 = vor.u32 %v605_v50, %v602_v45  ;;  %v616_v2 = vrot.slane %v614_v52, 4  ;;  %v619_v4 = vrot.slane %v617_v55, 5  ;;  %v631_v11 = vshll.u32 %v6744_v48, 16  ;;  %v6763_v20 = vld [vmem:[%s6570_s21 + $0xb0] sm:$0xf]  ;;  %5674 = vmatmul.mubr.msk.bf16.gmra.mrb[16].mxu0 %vm1392_vm2, %v6090_v19 }
  0x9e   : > { %v598_v8 = vsel %vm6606_vm3, %v593_v57, %v597_v39  ;;  %v625_v9 = vrot.slane %v623_v60, 5  ;;  %v630_v10 = vrot.slane %v628_v63, 4  ;;  %v637_v18 = vshll.u32 %v326_v61, 16  ;;  %v6768_v28 = vld [vmem:[%s6570_s21 + $0xb8] sm:$0xf] }
  0x9f   : > { %v4911_v12 = vcombine.low %v584_v0, %v598_v8  ;;  %v607_v13 = vrot.slane %v606_v1, 4  ;;  %v620_v17 = vor.u32 %v619_v4, %v616_v2  ;;  %v633_v22 = vrot.slane %v631_v11, 5  ;;  %v328_v36 = vld [vmem:[%s6570_s21 + $0xb4] sm:$0x1]  ;;  %v329_v35 = vld [vmem:[%s6570_s21 + $0xbc] sm:$0x1] }
  0xa0   : > { %v642_v26 = vshrl.u32 %v6749_v56, 16  ;;  %v645_v27 = vshll.u32 %v6749_v56, 16  ;;  %v651_v25 = vshll.u32 %v327_v5, 16  ;;  %v639_v33 = vrot.slane %v637_v18, 5  ;;  %v6091_v57 = vld [vmem:[%s6570_s21 + $0xb8] ss:$8 sps:$4 sm:$0xff]  }
  0xa1   : > { %5530 = vmatmul.mubr.msk.bf16.gmra.mrb[12].mxu1 %vm1392_vm2, %v4911_v12  ;;  %v612_v31 = vsel %vm6606_vm3, %v607_v13, %v611_v58  ;;  %v621_v32 = vrot.slane %v620_v17, 4  ;;  %v634_v38 = vor.u32 %v633_v22, %v630_v10  ;;  %v656_v45 = vshrl.u32 %v6763_v20, 16  ;;  %v6785_v58 = vld [vmem:[%s6570_s21 + $0xc0] sm:$0xf]  ;;  %v6789_v1 = vld [vmem:[%s6570_s21 + $0xc8] sm:$0xf]  ;;  %5677 = vmatprep.mubr.msk.bf16.mxu0 %vm1392_vm2, %v6091_v57 }
  0xa2   : > { %v644_v39 = vrot.slane %v642_v26, 4  ;;  %v647_v41 = vrot.slane %v645_v27, 5  ;;  %v653_v42 = vrot.slane %v651_v25, 5  ;;  %v659_v46 = vshll.u32 %v6763_v20, 16  ;;  %v331_v12 = vld [vmem:[%s6570_s21 + $0xcc] sm:$0x1] }
  0xa3   : > { %v626_v43 = vsel %vm6606_vm3, %v621_v32, %v625_v9  ;;  %v665_v47 = vshll.u32 %v328_v36, 16  ;;  %v635_v50 = vrot.slane %v634_v38, 4  ;;  %v670_v55 = vshrl.u32 %v6768_v28, 16  ;;  %v330_v9 = vld [vmem:[%s6570_s21 + $0xc4] sm:$0x1] }
  0xa4   : > { %v4912_v49 = vcombine.low %v612_v31, %v626_v43  ;;  %v648_v52 = vor.u32 %v647_v41, %v644_v39  ;;  %v658_v60 = vrot.slane %v656_v45, 4  ;;  %v661_v61 = vrot.slane %v659_v46, 5  ;;  %v6101_v59 = vld [vmem:[%s6570_s21 + $0x148] ss:$8 sps:$4 sm:$0xff]   ;;  %v280_v34 = vld [vmem:[%s6570_s21 + $0x178] sm:$0xf] }
  0xa5   : > { %v667_v63 = vrot.slane %v665_v47, 5  ;;  %v673_v0 = vshll.u32 %v6768_v28, 16  ;;  %v640_v2 = vsel %vm6606_vm3, %v635_v50, %v639_v33  ;;  %v672_v5 = vrot.slane %v670_v55, 4  ;;  %v6092_v33 = vld [vmem:[%s6570_s21 + $0xc8] ss:$8 sps:$4 sm:$0xff]  }
  0xa6   : > { %5533 = vmatprep.mubr.msk.bf16.mxu1 %vm1392_vm2, %v4912_v49  ;;  %v649_v4 = vrot.slane %v648_v52, 4  ;;  %v679_v8 = vshll.u32 %v329_v35, 16  ;;  %v662_v10 = vor.u32 %v661_v61, %v658_v60  ;;  %v684_v13 = vshrl.u32 %v6785_v58, 16  ;;  %5678 = vmatmul.mubr.msk.bf16.gmra.mrb[20].mxu0 %vm1392_vm2, %v6092_v33  ;;  %v6811_v49 = vld [vmem:[%s6570_s21 + $0xd8] sm:$0xf] }
  0xa7   : > { %v675_v11 = vrot.slane %v673_v0, 5  ;;  %v687_v17 = vshll.u32 %v6785_v58, 16  ;;  %v693_v22 = vshll.u32 %v330_v9, 16  ;;  %v698_v26 = vshrl.u32 %v6789_v1, 16  ;;  %v6820_v60 = vld [vmem:[%s6570_s21 + $0xe0] sm:$0xf] }
  0xa8   : > { %v654_v18 = vsel %vm6606_vm3, %v649_v4, %v653_v42  ;;  %v681_v19 = vrot.slane %v679_v8, 5  ;;  %v663_v25 = vrot.slane %v662_v10, 4  ;;  %v686_v32 = vrot.slane %v684_v13, 4  ;;  %v332_v61 = vld [vmem:[%s6570_s21 + $0xdc] sm:$0x1] }
  0xa9   : > { %v4913_v27 = vcombine.low %v640_v2, %v654_v18  ;;  %v676_v31 = vor.u32 %v675_v11, %v672_v5  ;;  %v689_v36 = vrot.slane %v687_v17, 5  ;;  %v695_v35 = vrot.slane %v693_v22, 5  ;;  %v333_v8 = vld [vmem:[%s6570_s21 + $0xe4] sm:$0x1]  ;;  %v6100_v50 = vld [vmem:[%s6570_s21 + $0x138] ss:$8 sps:$4 sm:$0xff]  }
  0xaa   : > { %v700_v38 = vrot.slane %v698_v26, 4  ;;  %v701_v39 = vshll.u32 %v6789_v1, 16  ;;  %v668_v41 = vsel %vm6606_vm3, %v663_v25, %v667_v63  ;;  %v707_v43 = vshll.u32 %v331_v12, 16  ;;  %v6095_v26 = vld [vmem:[%s6570_s21 + $0xe0] ss:$8 sps:$4 sm:$0xff]  }
  0xab   : > { %5534 = vmatmul.mubr.msk.bf16.gmra.mrb[16].mxu1 %vm1392_vm2, %v4913_v27  ;;  %v677_v42 = vrot.slane %v676_v31, 4  ;;  %v690_v46 = vor.u32 %v689_v36, %v686_v32  ;;  %v712_v63 = vshrl.u32 %v6811_v49, 16  ;;  %v715_v9 = vshll.u32 %v6811_v49, 16  ;;  %v6835_v32 = vld [vmem:[%s6570_s21 + $0xe8] sm:$0xf]  ;;  %5681 = vmatprep.mubr.msk.bf16.mxu0 %vm1392_vm2, %v6095_v26 }
  0xac   : > { %v703_v47 = vrot.slane %v701_v39, 5  ;;  %v709_v57 = vrot.slane %v707_v43, 5  ;;  %v721_v11 = vshll.u32 %v332_v61, 16  ;;  %v726_v12 = vshrl.u32 %v6820_v60, 16  ;;  %v6841_v39 = vld [vmem:[%s6570_s21 + $0xf0] sm:$0xf] }
  0xad   : > { %v682_v55 = vsel %vm6606_vm3, %v677_v42, %v681_v19  ;;  %v691_v4 = vrot.slane %v690_v46, 4  ;;  %v714_v10 = vrot.slane %v712_v63, 4  ;;  %v729_v13 = vshll.u32 %v6820_v60, 16  ;;  %v335_v46 = vld [vmem:[%s6570_s21 + $0xf4] sm:$0x1] }
  0xae   : > { %v4914_v2 = vcombine.low %v668_v41, %v682_v55  ;;  %v704_v5 = vor.u32 %v703_v47, %v700_v38  ;;  %v717_v19 = vrot.slane %v715_v9, 5  ;;  %v735_v22 = vshll.u32 %v333_v8, 16  ;;  %v6104_v29 = vld [vmem:[%s6570_s21 + $0x180] ss:$8 sps:$4 sm:$0xff]  }
  0xaf   : > { %v696_v17 = vsel %vm6606_vm3, %v691_v4, %v695_v35  ;;  %v723_v27 = vrot.slane %v721_v11, 5  ;;  %v728_v25 = vrot.slane %v726_v12, 4  ;;  %v731_v31 = vrot.slane %v729_v13, 5  ;;  %v334_v35 = vld [vmem:[%s6570_s21 + $0xec] sm:$0x1] }
  0xb0   : > { %5537 = vmatprep.mubr.msk.bf16.mxu1 %vm1392_vm2, %v4914_v2  ;;  %v705_v18 = vrot.slane %v704_v5, 4  ;;  %v718_v36 = vor.u32 %v717_v19, %v714_v10  ;;  %v737_v38 = vrot.slane %v735_v22, 5  ;;  %v740_v41 = vshrl.u32 %v6835_v32, 16  ;;  %v6096_v10 = vld [vmem:[%s6570_s21 + $0xf0] ss:$8 sps:$4 sm:$0xff]  }
  0xb1   : > { %v732_v43 = vor.u32 %v731_v31, %v728_v25  ;;  %v743_v47 = vshll.u32 %v6835_v32, 16  ;;  %v749_v55 = vshll.u32 %v334_v35, 16  ;;  %v754_v63 = vshrl.u32 %v6841_v39, 16  ;;  %5682 = vmatmul.mubr.msk.bf16.gmra.mrb[24].mxu0 %vm1392_vm2, %v6096_v10  ;;  %v336_v31 = vld [vmem:[%s6570_s21 + $0xfc] sm:$0x1] }
  0xb2   : > { %v710_v33 = vsel %vm6606_vm3, %v705_v18, %v709_v57  ;;  %v719_v61 = vrot.slane %v718_v36, 4  ;;  %v742_v57 = vrot.slane %v740_v41, 4  ;;  %v757_v2 = vshll.u32 %v6841_v39, 16  ;;  %v6857_v18 = vld [vmem:[%s6570_s21 + $0x100] sm:$0xf] }
  0xb3   : > { %v4915_v42 = vcombine.low %v696_v17, %v710_v33  ;;  %v733_v4 = vrot.slane %v732_v43, 4  ;;  %v745_v5 = vrot.slane %v743_v47, 5  ;;  %v751_v8 = vrot.slane %v749_v55, 5  ;;  %v6854_v17 = vld [vmem:[%s6570_s21 + $0xf8] sm:$0xf] }
  0xb4   : > { %v763_v9 = vshll.u32 %v335_v46, 16  ;;  %v724_v11 = vsel %vm6606_vm3, %v719_v61, %v723_v27  ;;  %v756_v12 = vrot.slane %v754_v63, 4  ;;  %v759_v13 = vrot.slane %v757_v2, 5  ;;  %v337_v33 = vld [vmem:[%s6570_s21 + $0x104] sm:$0x1] }
  0xb5   : > { %5538 = vmatmul.mubr.msk.bf16.gmra.mrb[20].mxu1 %vm1392_vm2, %v4915_v42  ;;  %v738_v22 = vsel %vm6606_vm3, %v733_v4, %v737_v38  ;;  %v746_v26 = vor.u32 %v745_v5, %v742_v57  ;;  %v768_v27 = vshrl.u32 %v6854_v17, 16  ;;  %v771_v41 = vshll.u32 %v6854_v17, 16  ;;  %v6097_v55 = vld [vmem:[%s6570_s21 + $0x100] ss:$8 sps:$4 sm:$0xff]  }
  0xb6   : > { %v765_v25 = vrot.slane %v763_v9, 5  ;;  %v4916_v36 = vcombine.low %v724_v11, %v738_v22  ;;  %v760_v35 = vor.u32 %v759_v13, %v756_v12  ;;  %v777_v42 = vshll.u32 %v336_v31, 16  ;;  %v6873_v4 = vld [vmem:[%s6570_s21 + $0x108] sm:$0xf]  ;;  %5685 = vmatprep.mubr.msk.bf16.mxu0 %vm1392_vm2, %v6097_v55  ;;  %v6879_v11 = vld [vmem:[%s6570_s21 + $0x110] sm:$0xf] }
  0xb7   : > { %v747_v43 = vrot.slane %v746_v26, 4  ;;  %v770_v46 = vrot.slane %v768_v27, 4  ;;  %v782_v38 = vshrl.u32 %v6857_v18, 16  ;;  %v785_v47 = vshll.u32 %v6857_v18, 16  ;;  %v338_v12 = vld [vmem:[%s6570_s21 + $0x10c] sm:$0x1] }
  0xb8   : > { %5541 = vmatprep.mubr.msk.bf16.mxu1 %vm1392_vm2, %v4916_v36  ;;  %v761_v61 = vrot.slane %v760_v35, 4  ;;  %v773_v57 = vrot.slane %v771_v41, 5  ;;  %v779_v63 = vrot.slane %v777_v42, 5  ;;  %v791_v2 = vshll.u32 %v337_v33, 16  ;;  %v339_v33 = vld [vmem:[%s6570_s21 + $0x114] sm:$0x1] }
  0xb9   : > { %v752_v5 = vsel %vm6606_vm3, %v747_v43, %v751_v8  ;;  %v784_v9 = vrot.slane %v782_v38, 4  ;;  %v787_v10 = vrot.slane %v785_v47, 5  ;;  %v796_v8 = vshrl.u32 %v6873_v4, 16  ;;  %v6098_v42 = vld [vmem:[%s6570_s21 + $0x110] ss:$8 sps:$4 sm:$0xff]  }
  0xba   : > { %v766_v22 = vsel %vm6606_vm3, %v761_v61, %v765_v25  ;;  %v774_v26 = vor.u32 %v773_v57, %v770_v46  ;;  %v793_v31 = vrot.slane %v791_v2, 5  ;;  %v799_v35 = vshll.u32 %v6873_v4, 16  ;;  %v6893_v46 = vld [vmem:[%s6570_s21 + $0x120] sm:$0xf]  ;;  %5686 = vmatmul.mubr.msk.bf16.gmra.mrb[28].mxu0 %vm1392_vm2, %v6098_v42 }
  0xbb   : > { %v4917_v27 = vcombine.low %v752_v5, %v766_v22  ;;  %v788_v36 = vor.u32 %v787_v10, %v784_v9  ;;  %v805_v41 = vshll.u32 %v338_v12, 16  ;;  %v798_v38 = vrot.slane %v796_v8, 4  ;;  %v6898_v5 = vld [vmem:[%s6570_s21 + $0x128] sm:$0xf]  ;;  %v340_v22 = vld [vmem:[%s6570_s21 + $0x124] sm:$0x1] }
  0xbc   : > { %v775_v43 = vrot.slane %v774_v26, 4  ;;  %v810_v47 = vshrl.u32 %v6879_v11, 16  ;;  %v813_v25 = vshll.u32 %v6879_v11, 16  ;;  %v801_v61 = vrot.slane %v799_v35, 5  ;;  %v341_v26 = vld [vmem:[%s6570_s21 + $0x12c] sm:$0x1] }
  0xbd   : > { %5542 = vmatmul.mubr.msk.bf16.gmra.mrb[24].mxu1 %vm1392_vm2, %v4917_v27  ;;  %v789_v55 = vrot.slane %v788_v36, 4  ;;  %v807_v57 = vrot.slane %v805_v41, 5  ;;  %v819_v2 = vshll.u32 %v339_v33, 16  ;;  %v824_v35 = vshrl.u32 %v6893_v46, 16 }
  0xbe   : > { %v780_v9 = vsel %vm6606_vm3, %v775_v43, %v779_v63  ;;  %v812_v10 = vrot.slane %v810_v47, 4  ;;  %v815_v12 = vrot.slane %v813_v25, 5  ;;  %v802_v27 = vor.u32 %v801_v61, %v798_v38  ;;  %v6099_v47 = vld [vmem:[%s6570_s21 + $0x128] ss:$8 sps:$4 sm:$0xff]   ;;  %v6917_v38 = vld [vmem:[%s6570_s21 + $0x138] sm:$0xf] }
  0xbf   : > { %v794_v33 = vsel %vm6606_vm3, %v789_v55, %v793_v31  ;;  %v821_v36 = vrot.slane %v819_v2, 5  ;;  %v827_v63 = vshll.u32 %v6893_v46, 16  ;;  %v833_v43 = vshll.u32 %v340_v22, 16  ;;  %v6912_v25 = vld [vmem:[%s6570_s21 + $0x130] sm:$0xf]  ;;  %7843 = vst [vmem:[#allocation20_spill] sm:$0xff] %v6917_v38  ;;  %5689 = vmatprep.mubr.msk.bf16.mxu0 %vm1392_vm2, %v6099_v47 }
  0xc0   : > { %v4918_v41 = vcombine.low %v780_v9, %v794_v33  ;;  %v816_v42 = vor.u32 %v815_v12, %v812_v10  ;;  %v803_v13 = vrot.slane %v802_v27, 4  ;;  %v826_v19 = vrot.slane %v824_v35, 4  ;;  %v342_v10 = vld [vmem:[%s6570_s21 + $0x134] sm:$0x1]  ;;  %v343_v27 = vld [vmem:[%s6570_s21 + $0x13c] sm:$0x1] }
  0xc1   : > { %v838_v8 = vshrl.u32 %v6898_v5, 16  ;;  %v841_v31 = vshll.u32 %v6898_v5, 16  ;;  %v829_v61 = vrot.slane %v827_v63, 5  ;;  %v835_v2 = vrot.slane %v833_v43, 5 }
  0xc2   : > { %5545 = vmatprep.mubr.msk.bf16.mxu1 %vm1392_vm2, %v4918_v41  ;;  %v817_v55 = vrot.slane %v816_v42, 4  ;;  %v847_v9 = vshll.u32 %v341_v26, 16  ;;  %v808_v12 = vsel %vm6606_vm3, %v803_v13, %v807_v57  ;;  %v852_v35 = vshrl.u32 %v6912_v25, 16  ;;  %v6931_v13 = vld [vmem:[%s6570_s21 + $0x140] sm:$0xf]  ;;  %5690 = vmatmul.mubr.msk.bf16.gmra.mrb[32].mxu0 %vm1392_vm2, %v6100_v50 }
  0xc3   : > { %v840_v22 = vrot.slane %v838_v8, 4  ;;  %v843_v33 = vrot.slane %v841_v31, 5  ;;  %v830_v42 = vor.u32 %v829_v61, %v826_v19  ;;  %v855_v26 = vshll.u32 %v6912_v25, 16  ;;  %5693 = vmatprep.mubr.msk.bf16.mxu0 %vm1392_vm2, %v6101_v59 }
  0xc4   : > { %v822_v41 = vsel %vm6606_vm3, %v817_v55, %v821_v36  ;;  %v849_v63 = vrot.slane %v847_v9, 5  ;;  %v854_v0 = vrot.slane %v852_v35, 4  ;;  %v861_v52 = vshll.u32 %v342_v10, 16  ;;  %v6936_v36 = vld [vmem:[%s6570_s21 + $0x148] sm:$0xf] }
  0xc5   : > { %v4919_v43 = vcombine.low %v808_v12, %v822_v41  ;;  %v844_v47 = vor.u32 %v843_v33, %v840_v22  ;;  %v831_v57 = vrot.slane %v830_v42, 4  ;;  %v857_v8 = vrot.slane %v855_v26, 5  ;;  %v344_v9 = vld [vmem:[%s6570_s21 + $0x144] sm:$0x1]  ;;  %v345_v41 = vld [vmem:[%s6570_s21 + $0x14c] sm:$0x1] }
  0xc6   : > { %v866_v31 = vshrl.u32 %v6917_v38, 16  ;;  %v869_v45 = vshll.u32 %v6917_v38, 16  ;;  %v863_v55 = vrot.slane %v861_v52, 5  ;;  %v875_v61 = vshll.u32 %v343_v27, 16 }
  0xc7   : > { %5546 = vmatmul.mubr.msk.bf16.gmra.mrb[28].mxu1 %vm1392_vm2, %v4919_v43  ;;  %v845_v19 = vrot.slane %v844_v47, 4  ;;  %v880_v10 = vshrl.u32 %v6931_v13, 16  ;;  %v836_v12 = vsel %vm6606_vm3, %v831_v57, %v835_v2  ;;  %v858_v22 = vor.u32 %v857_v8, %v854_v0  ;;  %v6950_v2 = vld [vmem:[%s6570_s21 + $0x150] sm:$0xf] }
  0xc8   : > { %v868_v33 = vrot.slane %v866_v31, 4  ;;  %v871_v35 = vrot.slane %v869_v45, 5  ;;  %v877_v52 = vrot.slane %v875_v61, 5  ;;  %v883_v50 = vshll.u32 %v6931_v13, 16 }
  0xc9   : > { %v850_v42 = vsel %vm6606_vm3, %v845_v19, %v849_v63  ;;  %v882_v27 = vrot.slane %v880_v10, 4  ;;  %v859_v43 = vrot.slane %v858_v22, 4  ;;  %v889_v37 = vshll.u32 %v344_v9, 16  ;;  %v6955_v63 = vld [vmem:[%s6570_s21 + $0x158] sm:$0xf] }
  0xca   : > { %v4920_v26 = vcombine.low %v836_v12, %v850_v42  ;;  %v872_v47 = vor.u32 %v871_v35, %v868_v33  ;;  %v885_v0 = vrot.slane %v883_v50, 5  ;;  %v894_v45 = vshrl.u32 %v6936_v36, 16  ;;  %v346_v9 = vld [vmem:[%s6570_s21 + $0x154] sm:$0x1]  ;;  %v347_v10 = vld [vmem:[%s6570_s21 + $0x15c] sm:$0x1] }
  0xcb   : > { %v897_v57 = vshll.u32 %v6936_v36, 16  ;;  %v903_v8 = vshll.u32 %v345_v41, 16  ;;  %v864_v31 = vsel %vm6606_vm3, %v859_v43, %v863_v55  ;;  %v891_v61 = vrot.slane %v889_v37, 5  ;;  %v6102_v12 = vld [vmem:[%s6570_s21 + $0x158] ss:$8 sps:$4 sm:$0xff]  }
  0xcc   : > { %5549 = vmatprep.mubr.msk.bf16.mxu1 %vm1392_vm2, %v4920_v26  ;;  %v873_v19 = vrot.slane %v872_v47, 4  ;;  %v886_v22 = vor.u32 %v885_v0, %v882_v27  ;;  %v896_v33 = vrot.slane %v894_v45, 4  ;;  %v908_v55 = vshrl.u32 %v6950_v2, 16  ;;  %v6972_v27 = vld [vmem:[%s6570_s21 + $0x168] sm:$0xf]  ;;  %5694 = vmatmul.mubr.msk.bf16.gmra.mrb[36].mxu0 %vm1392_vm2, %v6102_v12 }
  0xcd   : > { %v899_v35 = vrot.slane %v897_v57, 5  ;;  %v905_v41 = vrot.slane %v903_v8, 5  ;;  %v911_v37 = vshll.u32 %v6950_v2, 16  ;;  %v917_v59 = vshll.u32 %v346_v9, 16  ;;  %v6976_v8 = vld [vmem:[%s6570_s21 + $0x170] sm:$0xf] }
  0xce   : > { %v878_v42 = vsel %vm6606_vm3, %v873_v19, %v877_v52  ;;  %v887_v26 = vrot.slane %v886_v22, 4  ;;  %v922_v47 = vshrl.u32 %v6955_v63, 16  ;;  %v910_v0 = vrot.slane %v908_v55, 4  ;;  %v349_v55 = vld [vmem:[%s6570_s21 + $0x174] sm:$0x1] }
  0xcf   : > { %v4921_v50 = vcombine.low %v864_v31, %v878_v42  ;;  %v900_v43 = vor.u32 %v899_v35, %v896_v33  ;;  %v913_v45 = vrot.slane %v911_v37, 5  ;;  %v919_v57 = vrot.slane %v917_v59, 5  ;;  %v348_v33 = vld [vmem:[%s6570_s21 + $0x16c] sm:$0x1] }
  0xd0   : > { %v925_v52 = vshll.u32 %v6955_v63, 16  ;;  %v892_v31 = vsel %vm6606_vm3, %v887_v26, %v891_v61  ;;  %v924_v9 = vrot.slane %v922_v47, 4  ;;  %v931_v22 = vshll.u32 %v347_v10, 16 }
  0xd1   : > { %5550 = vmatmul.mubr.msk.bf16.gmra.mrb[32].mxu1 %vm1392_vm2, %v4921_v50  ;;  %v901_v19 = vrot.slane %v900_v43, 4  ;;  %v914_v35 = vor.u32 %v913_v45, %v910_v0  ;;  %v936_v37 = vshrl.u32 %v6972_v27, 16  ;;  %v939_v59 = vshll.u32 %v6972_v27, 16  ;;  %v6103_v0 = vld [vmem:[%s6570_s21 + $0x170] ss:$8 sps:$4 sm:$0xff]  }
  0xd2   : > { %v927_v42 = vrot.slane %v925_v52, 5  ;;  %v933_v21 = vrot.slane %v931_v22, 5  ;;  %v945_v61 = vshll.u32 %v348_v33, 16  ;;  %v950_v26 = vshrl.u32 %v6976_v8, 16  ;;  %5697 = vmatprep.mubr.msk.bf16.mxu0 %vm1392_vm2, %v6103_v0  ;;  %v293_v33 = vld [vmem:[%s6570_s21 + $0x1e8] sm:$0xf] }
  0xd3   : > { %v906_v50 = vsel %vm6606_vm3, %v901_v19, %v905_v41  ;;  %v915_v12 = vrot.slane %v914_v35, 4  ;;  %v938_v47 = vrot.slane %v936_v37, 4  ;;  %v941_v45 = vrot.slane %v939_v59, 5  ;;  %v351_v37 = vld [vmem:[%s6570_s21 + $0x184] sm:$0x1] }
  0xd4   : > { %v4922_v10 = vcombine.low %v892_v31, %v906_v50  ;;  %v928_v43 = vor.u32 %v927_v42, %v924_v9  ;;  %v947_v52 = vrot.slane %v945_v61, 5  ;;  %v952_v15 = vrot.slane %v950_v26, 4  ;;  %v281_v31 = vld [vmem:[%s6570_s21 + $0x180] sm:$0xf]  ;;  %v350_v9 = vld [vmem:[%s6570_s21 + $0x17c] sm:$0x1]  ;;  %5698 = vmatmul.mubr.msk.bf16.gmra.mrb[40].mxu0 %vm1392_vm2, %v6104_v29 }
  0xd5   : > { %v953_v53 = vshll.u32 %v6976_v8, 16  ;;  %v920_v41 = vsel %vm6606_vm3, %v915_v12, %v919_v57  ;;  %v959_v22 = vshll.u32 %v349_v55, 16  ;;  %v942_v35 = vor.u32 %v941_v45, %v938_v47 }
  0xd6   : > { %5553 = vmatprep.mubr.msk.bf16.mxu1 %vm1392_vm2, %v4922_v10  ;;  %v929_v19 = vrot.slane %v928_v43, 4  ;;  %v964_v59 = vshrl.u32 %v280_v34, 16  ;;  %v967_v50 = vshll.u32 %v280_v34, 16  ;;  %v973_v57 = vshll.u32 %v350_v9, 16  ;;  %v6109_v9 = vld [vmem:[%s6570_s21 + $0x1b8] ss:$8 sps:$4 sm:$0xff]  }
  0xd7   : > { %v955_v42 = vrot.slane %v953_v53, 5  ;;  %v961_v26 = vrot.slane %v959_v22, 5  ;;  %v978_v10 = vshrl.u32 %v281_v31, 16  ;;  %v943_v12 = vrot.slane %v942_v35, 4  ;;  %v282_v22 = vld [vmem:[%s6570_s21 + $0x188] sm:$0xf] }
  0xd8   : > { %v934_v61 = vsel %vm6606_vm3, %v929_v19, %v933_v21  ;;  %v966_v0 = vrot.slane %v964_v59, 4  ;;  %v969_v3 = vrot.slane %v967_v50, 5  ;;  %v975_v62 = vrot.slane %v973_v57, 5  ;;  %v353_v57 = vld [vmem:[%s6570_s21 + $0x194] sm:$0x1] }
  0xd9   : > { %v4923_v55 = vcombine.low %v920_v41, %v934_v61  ;;  %v956_v43 = vor.u32 %v955_v42, %v952_v15  ;;  %v980_v47 = vrot.slane %v978_v10, 4  ;;  %v981_v53 = vshll.u32 %v281_v31, 16  ;;  %v283_v42 = vld [vmem:[%s6570_s21 + $0x190] sm:$0xf] }
  0xda   : > { %v948_v34 = vsel %vm6606_vm3, %v943_v12, %v947_v52  ;;  %v987_v45 = vshll.u32 %v351_v37, 16  ;;  %v970_v41 = vor.u32 %v969_v3, %v966_v0  ;;  %v352_v37 = vld [vmem:[%s6570_s21 + $0x18c] sm:$0x1]  ;;  %v992_v29 = vshrl.u32 %v282_v22, 16 }
  0xdb   : > { %5554 = vmatmul.mubr.msk.bf16.gmra.mrb[36].mxu1 %vm1392_vm2, %v4923_v55  ;;  %v957_v21 = vrot.slane %v956_v43, 4  ;;  %v983_v19 = vrot.slane %v981_v53, 5  ;;  %v995_v10 = vshll.u32 %v282_v22, 16  ;;  %v1001_v12 = vshll.u32 %v352_v37, 16  ;;  %v284_v22 = vld [vmem:[%s6570_s21 + $0x198] sm:$0xf] }
  0xdc   : > { %v989_v35 = vrot.slane %v987_v45, 5  ;;  %v971_v50 = vrot.slane %v970_v41, 4  ;;  %v994_v55 = vrot.slane %v992_v29, 4  ;;  %v1006_v43 = vshrl.u32 %v283_v42, 16 }
  0xdd   : > { %v962_v52 = vsel %vm6606_vm3, %v957_v21, %v961_v26  ;;  %v984_v61 = vor.u32 %v983_v19, %v980_v47  ;;  %v1009_v0 = vshll.u32 %v283_v42, 16  ;;  %v997_v21 = vrot.slane %v995_v10, 5  ;;  %v355_v10 = vld [vmem:[%s6570_s21 + $0x1a4] sm:$0x1] }
  0xde   : > { %v4924_v3 = vcombine.low %v948_v34, %v962_v52  ;;  %v976_v26 = vsel %vm6606_vm3, %v971_v50, %v975_v62  ;;  %v1015_v45 = vshll.u32 %v353_v57, 16  ;;  %v6107_v34 = vld [vmem:[%s6570_s21 + $0x190] ss:$8 sps:$4 sm:$0xff]   ;;  %v1003_v47 = vrot.slane %v1001_v12, 5  ;;  %v285_v62 = vld [vmem:[%s6570_s21 + $0x1a0] sm:$0xf] }
  0xdf   : > { %v985_v53 = vrot.slane %v984_v61, 4  ;;  %v1008_v41 = vrot.slane %v1006_v43, 4  ;;  %v1011_v19 = vrot.slane %v1009_v0, 5  ;;  %v998_v37 = vor.u32 %v997_v21, %v994_v55  ;;  %5701 = vmatprep.mubr.msk.bf16.mxu0 %vm1392_vm2, %v6107_v34 }
  0xe0   : > { %5557 = vmatprep.mubr.msk.bf16.mxu1 %vm1392_vm2, %v4924_v3  ;;  %v1017_v29 = vrot.slane %v1015_v45, 5  ;;  %v354_v3 = vld [vmem:[%s6570_s21 + $0x19c] sm:$0x1]  ;;  %v1020_v50 = vshrl.u32 %v284_v22, 16  ;;  %v1023_v12 = vshll.u32 %v284_v22, 16  ;;  %v1034_v59 = vshrl.u32 %v285_v62, 16 }
  0xe1   : > { %v990_v42 = vsel %vm6606_vm3, %v985_v53, %v989_v35  ;;  %v1012_v57 = vor.u32 %v1011_v19, %v1008_v41  ;;  %v1029_v43 = vshll.u32 %v354_v3, 16  ;;  %v999_v0 = vrot.slane %v998_v37, 4  ;;  %v6108_v45 = vld [vmem:[%s6570_s21 + $0x1a0] ss:$8 sps:$4 sm:$0xff]   ;;  %v286_v19 = vld [vmem:[%s6570_s21 + $0x1b0] sm:$0xf] }
  0xe2   : > { %v4925_v61 = vcombine.low %v976_v26, %v990_v42  ;;  %v1022_v52 = vrot.slane %v1020_v50, 4  ;;  %v1037_v31 = vshll.u32 %v285_v62, 16  ;;  %v1025_v55 = vrot.slane %v1023_v12, 5  ;;  %v287_v22 = vld [vmem:[%s6570_s21 + $0x1b8] sm:$0xf]  ;;  %5702 = vmatmul.mubr.msk.bf16.gmra.mrb[44].mxu0 %vm1392_vm2, %v6108_v45 }
  0xe3   : > { %v1013_v35 = vrot.slane %v1012_v57, 4  ;;  %v1031_v53 = vrot.slane %v1029_v43, 5  ;;  %v1043_v21 = vshll.u32 %v355_v10, 16  ;;  %v1004_v26 = vsel %vm6606_vm3, %v999_v0, %v1003_v47  ;;  %v356_v50 = vld [vmem:[%s6570_s21 + $0x1b4] sm:$0x1]  ;;  %5705 = vmatprep.mubr.msk.bf16.mxu0 %vm1392_vm2, %v6109_v9 }
  0xe4   : > { %5558 = vmatmul.mubr.msk.bf16.gmra.mrb[40].mxu1 %vm1392_vm2, %v4925_v61  ;;  %v1036_v34 = vrot.slane %v1034_v59, 4  ;;  %v1039_v41 = vrot.slane %v1037_v31, 5  ;;  %v1026_v62 = vor.u32 %v1025_v55, %v1022_v52  ;;  %v357_v61 = vld [vmem:[%s6570_s21 + $0x1bc] sm:$0x1]  ;;  %v1048_v57 = vshrl.u32 %v286_v19, 16 }
  0xe5   : > { %v1018_v37 = vsel %vm6606_vm3, %v1013_v35, %v1017_v29  ;;  %v1045_v3 = vrot.slane %v1043_v21, 5  ;;  %v1051_v31 = vshll.u32 %v286_v19, 16  ;;  %v1057_v10 = vshll.u32 %v356_v50, 16  ;;  %v288_v21 = vld [vmem:[%s6570_s21 + $0x1c0] sm:$0xf] }
  0xe6   : > { %v4926_v47 = vcombine.low %v1004_v26, %v1018_v37  ;;  %v1040_v59 = vor.u32 %v1039_v41, %v1036_v34  ;;  %v1027_v12 = vrot.slane %v1026_v62, 4  ;;  %v1050_v43 = vrot.slane %v1048_v57, 4  ;;  %v289_v41 = vld [vmem:[%s6570_s21 + $0x1c8] sm:$0xf]  ;;  %v358_v19 = vld [vmem:[%s6570_s21 + $0x1c4] sm:$0x1] }
  0xe7   : > { %v1062_v0 = vshrl.u32 %v287_v22, 16  ;;  %v1065_v42 = vshll.u32 %v287_v22, 16  ;;  %v1053_v29 = vrot.slane %v1051_v31, 5  ;;  %v1059_v35 = vrot.slane %v1057_v10, 5  ;;  %v6110_v31 = vld [vmem:[%s6570_s21 + $0x1c8] ss:$8 sps:$4 sm:$0xff]  }
  0xe8   : > { %5561 = vmatprep.mubr.msk.bf16.mxu1 %vm1392_vm2, %v4926_v47  ;;  %v1041_v52 = vrot.slane %v1040_v59, 4  ;;  %v1071_v55 = vshll.u32 %v357_v61, 16  ;;  %v1032_v45 = vsel %vm6606_vm3, %v1027_v12, %v1031_v53  ;;  %v359_v61 = vld [vmem:[%s6570_s21 + $0x1cc] sm:$0x1]  ;;  %v1076_v57 = vshrl.u32 %v288_v21, 16 }
  0xe9   : > { %v1064_v26 = vrot.slane %v1062_v0, 4  ;;  %v1067_v34 = vrot.slane %v1065_v42, 5  ;;  %v1054_v62 = vor.u32 %v1053_v29, %v1050_v43  ;;  %v1079_v59 = vshll.u32 %v288_v21, 16  ;;  %v290_v22 = vld [vmem:[%s6570_s21 + $0x1d0] sm:$0xf] }
  0xea   : > { %v1046_v37 = vsel %vm6606_vm3, %v1041_v52, %v1045_v3  ;;  %v1073_v50 = vrot.slane %v1071_v55, 5  ;;  %v1085_v42 = vshll.u32 %v358_v19, 16  ;;  %v1078_v10 = vrot.slane %v1076_v57, 4  ;;  %5706 = vmatmul.mubr.msk.bf16.gmra.mrb[48].mxu0 %vm1392_vm2, %v6110_v31  ;;  %v291_v55 = vld [vmem:[%s6570_s21 + $0x1d8] sm:$0xf] }
  0xeb   : > { %v4927_v47 = vcombine.low %v1032_v45, %v1046_v37  ;;  %v1068_v53 = vor.u32 %v1067_v34, %v1064_v26  ;;  %v1055_v9 = vrot.slane %v1054_v62, 4  ;;  %v1090_v12 = vshrl.u32 %v289_v41, 16  ;;  %v360_v34 = vld [vmem:[%s6570_s21 + $0x1d4] sm:$0x1]  ;;  %v361_v19 = vld [vmem:[%s6570_s21 + $0x1dc] sm:$0x1] }
  0xec   : > { %v1093_v0 = vshll.u32 %v289_v41, 16  ;;  %v1081_v43 = vrot.slane %v1079_v59, 5  ;;  %v1087_v52 = vrot.slane %v1085_v42, 5  ;;  %v1099_v29 = vshll.u32 %v359_v61, 16  ;;  %v292_v31 = vld [vmem:[%s6570_s21 + $0x1e0] sm:$0xf] }
  0xed   : > { %5562 = vmatmul.mubr.msk.bf16.gmra.mrb[44].mxu1 %vm1392_vm2, %v4927_v47  ;;  %v1069_v3 = vrot.slane %v1068_v53, 4  ;;  %v1060_v21 = vsel %vm6606_vm3, %v1055_v9, %v1059_v35  ;;  %v1092_v45 = vrot.slane %v1090_v12, 4  ;;  %v1104_v57 = vshrl.u32 %v290_v22, 16  ;;  %v6111_v35 = vld [vmem:[%s6570_s21 + $0x1d8] ss:$8 sps:$4 sm:$0xff]  }
  0xee   : > { %v1095_v26 = vrot.slane %v1093_v0, 5  ;;  %v1082_v62 = vor.u32 %v1081_v43, %v1078_v10  ;;  %v1101_v61 = vrot.slane %v1099_v29, 5  ;;  %v1107_v59 = vshll.u32 %v290_v22, 16  ;;  %5709 = vmatprep.mubr.msk.bf16.mxu0 %vm1392_vm2, %v6111_v35  ;;  %v362_v22 = vld [vmem:[%s6570_s21 + $0x1e4] sm:$0x1] }
  0xef   : > { %v1074_v37 = vsel %vm6606_vm3, %v1069_v3, %v1073_v50  ;;  %v1113_v42 = vshll.u32 %v360_v34, 16  ;;  %v1106_v12 = vrot.slane %v1104_v57, 4  ;;  %v1118_v0 = vshrl.u32 %v291_v55, 16 }
  0xf0   : > { %v4928_v47 = vcombine.low %v1060_v21, %v1074_v37  ;;  %v1096_v53 = vor.u32 %v1095_v26, %v1092_v45  ;;  %v1083_v9 = vrot.slane %v1082_v62, 4  ;;  %v1121_v15 = vshll.u32 %v291_v55, 16  ;;  %v363_v45 = vld [vmem:[%s6570_s21 + $0x1ec] sm:$0x1] }
  0xf1   : > { %v1109_v50 = vrot.slane %v1107_v59, 5  ;;  %v1115_v10 = vrot.slane %v1113_v42, 5  ;;  %v1127_v3 = vshll.u32 %v361_v19, 16  ;;  %v1120_v29 = vrot.slane %v1118_v0, 4  ;;  %v6112_v59 = vld [vmem:[%s6570_s21 + $0x1e8] ss:$8 sps:$4 sm:$0xff]  }
  0xf2   : > { %5565 = vmatprep.mubr.msk.bf16.mxu1 %vm1392_vm2, %v4928_v47  ;;  %v1097_v41 = vrot.slane %v1096_v53, 4  ;;  %v1088_v43 = vsel %vm6606_vm3, %v1083_v9, %v1087_v52  ;;  %v1123_v21 = vrot.slane %v1121_v15, 5  ;;  %v1132_v55 = vshrl.u32 %v292_v31, 16  ;;  %v294_v42 = vld [vmem:[%s6570_s21 + $0x1f8] sm:$0xf]  ;;  %5710 = vmatmul.mubr.msk.bf16.gmra.mrb[52].mxu0 %vm1392_vm2, %v6112_v59 }
  0xf3   : > { %v1110_v34 = vor.u32 %v1109_v50, %v1106_v12  ;;  %v1129_v37 = vrot.slane %v1127_v3, 5  ;;  %v1135_v62 = vshll.u32 %v292_v31, 16  ;;  %v1141_v53 = vshll.u32 %v362_v22, 16  ;;  %v295_v0 = vld [vmem:[%s6570_s21 + $0x200] sm:$0xf] }
  0xf4   : > { %v1102_v26 = vsel %vm6606_vm3, %v1097_v41, %v1101_v61  ;;  %v1124_v57 = vor.u32 %v1123_v21, %v1120_v29  ;;  %v1134_v47 = vrot.slane %v1132_v55, 4  ;;  %v1146_v15 = vshrl.u32 %v293_v33, 16  ;;  %v364_v31 = vld [vmem:[%s6570_s21 + $0x1fc] sm:$0x1] }
  0xf5   : > { %v4929_v19 = vcombine.low %v1088_v43, %v1102_v26  ;;  %v1111_v35 = vrot.slane %v1110_v34, 4  ;;  %v1137_v52 = vrot.slane %v1135_v62, 5  ;;  %v1149_v9 = vshll.u32 %v293_v33, 16  ;;  %v365_v33 = vld [vmem:[%s6570_s21 + $0x204] sm:$0x1] }
  0xf6   : > { %v1125_v38 = vrot.slane %v1124_v57, 4  ;;  %v1143_v41 = vrot.slane %v1141_v53, 5  ;;  %v1155_v61 = vshll.u32 %v363_v45, 16  ;;  %v1160_v12 = vshrl.u32 %v294_v42, 16  ;;  %v6113_v57 = vld [vmem:[%s6570_s21 + $0x200] ss:$8 sps:$4 sm:$0xff]  }
  0xf7   : > { %5566 = vmatmul.mubr.msk.bf16.gmra.mrb[48].mxu1 %vm1392_vm2, %v4929_v19  ;;  %v1116_v50 = vsel %vm6606_vm3, %v1111_v35, %v1115_v10  ;;  %v1138_v3 = vor.u32 %v1137_v52, %v1134_v47  ;;  %v1148_v22 = vrot.slane %v1146_v15, 4  ;;  %v1151_v43 = vrot.slane %v1149_v9, 5  ;;  %v296_v53 = vld [vmem:[%s6570_s21 + $0x208] sm:$0xf]  ;;  %v297_v52 = vld [vmem:[%s6570_s21 + $0x210] sm:$0xf]  ;;  %5713 = vmatprep.mubr.msk.bf16.mxu0 %vm1392_vm2, %v6113_v57 }
  0xf8   : > { %v1130_v29 = vsel %vm6606_vm3, %v1125_v38, %v1129_v37  ;;  %v1157_v21 = vrot.slane %v1155_v61, 5  ;;  %v1162_v55 = vrot.slane %v1160_v12, 4  ;;  %v1163_v45 = vshll.u32 %v294_v42, 16  ;;  %v366_v15 = vld [vmem:[%s6570_s21 + $0x20c] sm:$0x1] }
  0xf9   : > { %v4930_v26 = vcombine.low %v1116_v50, %v1130_v29  ;;  %v1139_v34 = vrot.slane %v1138_v3, 4  ;;  %v1152_v62 = vor.u32 %v1151_v43, %v1148_v22  ;;  %v1169_v19 = vshll.u32 %v364_v31, 16  ;;  %v367_v9 = vld [vmem:[%s6570_s21 + $0x214] sm:$0x1] }
  0xfa   : > { %v1165_v10 = vrot.slane %v1163_v45, 5  ;;  %v1174_v47 = vshrl.u32 %v295_v0, 16  ;;  %v1177_v59 = vshll.u32 %v295_v0, 16  ;;  %v1183_v35 = vshll.u32 %v365_v33, 16 }
  0xfb   : > { %5569 = vmatprep.mubr.msk.bf16.mxu1 %vm1392_vm2, %v4930_v26  ;;  %v1144_v38 = vsel %vm6606_vm3, %v1139_v34, %v1143_v41  ;;  %v1153_v37 = vrot.slane %v1152_v62, 4  ;;  %v1171_v42 = vrot.slane %v1169_v19, 5  ;;  %v4989_v61 = vcombine.low %v6931_v13, %v6936_v36  ;;  %v6114_v34 = vld [vmem:[%s6570_s21 + $0x210] ss:$8 sps:$4 sm:$0xff]  }
  0xfc   : > { %v1166_v31 = vor.u32 %v1165_v10, %v1162_v55  ;;  %v1176_v0 = vrot.slane %v1174_v47, 4  ;;  %v1179_v12 = vrot.slane %v1177_v59, 5  ;;  %v1185_v50 = vrot.slane %v1183_v35, 5  ;;  %v298_v62 = vld [vmem:[%s6570_s21 + $0x218] sm:$0xf]  ;;  %5714 = vmatmul.mubr.msk.bf16.gmra.mrb[56].mxu0 %vm1392_vm2, %v6114_v34 }
  0xfd   : > { %v1158_v3 = vsel %vm6606_vm3, %v1153_v37, %v1157_v21  ;;  %v1188_v41 = vshrl.u32 %v296_v53, 16  ;;  %v1191_v22 = vshll.u32 %v296_v53, 16  ;;  %v1197_v43 = vshll.u32 %v366_v15, 16  ;;  %v299_v47 = vld [vmem:[%s6570_s21 + $0x220] sm:$0xf] }
  0xfe   : > { %v4931_v33 = vcombine.low %v1144_v38, %v1158_v3  ;;  %v1167_v29 = vrot.slane %v1166_v31, 4  ;;  %v1180_v45 = vor.u32 %v1179_v12, %v1176_v0  ;;  %v1202_v26 = vshrl.u32 %v297_v52, 16  ;;  %v368_v38 = vld [vmem:[%s6570_s21 + $0x21c] sm:$0x1]  ;;  %v369_v31 = vld [vmem:[%s6570_s21 + $0x224] sm:$0x1] }
  0xff   : > { %v1190_v19 = vrot.slane %v1188_v41, 4  ;;  %v1193_v55 = vrot.slane %v1191_v22, 5  ;;  %v1199_v57 = vrot.slane %v1197_v43, 5  ;;  %v1205_v10 = vshll.u32 %v297_v52, 16 }
 0x100   : > { %5570 = vmatmul.mubr.msk.bf16.gmra.mrb[52].mxu1 %vm1392_vm2, %v4931_v33  ;;  %v1172_v21 = vsel %vm6606_vm3, %v1167_v29, %v1171_v42  ;;  %v1181_v53 = vrot.slane %v1180_v45, 4  ;;  %v1204_v59 = vrot.slane %v1202_v26, 4  ;;  %v1211_v35 = vshll.u32 %v367_v9, 16  ;;  %v6115_v29 = vld [vmem:[%s6570_s21 + $0x220] ss:$8 sps:$4 sm:$0xff]  }
 0x101   : > { %v1194_v37 = vor.u32 %v1193_v55, %v1190_v19  ;;  %v1207_v15 = vrot.slane %v1205_v10, 5  ;;  %v1216_v0 = vshrl.u32 %v298_v62, 16  ;;  %v1219_v12 = vshll.u32 %v298_v62, 16  ;;  %v300_v55 = vld [vmem:[%s6570_s21 + $0x228] sm:$0xf]  ;;  %5717 = vmatprep.mubr.msk.bf16.mxu0 %vm1392_vm2, %v6115_v29 }
 0x102   : > { %v1186_v52 = vsel %vm6606_vm3, %v1181_v53, %v1185_v50  ;;  %v1213_v3 = vrot.slane %v1211_v35, 5  ;;  %v1225_v41 = vshll.u32 %v368_v38, 16  ;;  %v1230_v22 = vshrl.u32 %v299_v47, 16  ;;  %v370_v53 = vld [vmem:[%s6570_s21 + $0x22c] sm:$0x1] }
 0x103   : > { %v4932_v42 = vcombine.low %v1172_v21, %v1186_v52  ;;  %v1195_v9 = vrot.slane %v1194_v37, 4  ;;  %v1208_v43 = vor.u32 %v1207_v15, %v1204_v59  ;;  %v1218_v33 = vrot.slane %v1216_v0, 4  ;;  %v301_v21 = vld [vmem:[%s6570_s21 + $0x230] sm:$0xf]  ;;  %v371_v37 = vld [vmem:[%s6570_s21 + $0x234] sm:$0x1] }
 0x104   : > { %v1221_v45 = vrot.slane %v1219_v12, 5  ;;  %v1227_v26 = vrot.slane %v1225_v41, 5  ;;  %v1232_v34 = vrot.slane %v1230_v22, 4  ;;  %v1233_v19 = vshll.u32 %v299_v47, 16  ;;  %v5175_v59 = vld [vmem:[%s6570_s21 + $0x20] sm:$0xf] }
 0x105   : > { %5573 = vmatprep.mubr.msk.bf16.mxu1 %vm1392_vm2, %v4932_v42  ;;  %v1200_v50 = vsel %vm6606_vm3, %v1195_v9, %v1199_v57  ;;  %v1209_v62 = vrot.slane %v1208_v43, 4  ;;  %v1239_v10 = vshll.u32 %v369_v31, 16  ;;  %v1244_v47 = vshrl.u32 %v300_v55, 16  ;;  %v6116_v9 = vld [vmem:[%s6570_s21 + $0x230] ss:$8 sps:$4 sm:$0xff]  }
 0x106   : > { %v1222_v35 = vor.u32 %v1221_v45, %v1218_v33  ;;  %v1235_v38 = vrot.slane %v1233_v19, 5  ;;  %v1247_v15 = vshll.u32 %v300_v55, 16  ;;  %v1253_v12 = vshll.u32 %v370_v53, 16  ;;  %v5169_v19 = vld [vmem:[%s6570_s21 + $0x8] sm:$0xf]  ;;  %5718 = vmatmul.mubr.msk.bf16.gmra.mrb[60].mxu0 %vm1392_vm2, %v6116_v9 }
 0x107   : > { %v1214_v0 = vsel %vm6606_vm3, %v1209_v62, %v1213_v3  ;;  %v1241_v57 = vrot.slane %v1239_v10, 5  ;;  %v1258_v31 = vshrl.u32 %v301_v21, 16  ;;  %v1246_v42 = vrot.slane %v1244_v47, 4  ;;  %v5174_v9 = vld [vmem:[%s6570_s21 + $0x1c] sm:$0x1] }
 0x108   : > { %v4933_v52 = vcombine.low %v1200_v50, %v1214_v0  ;;  %v1223_v41 = vrot.slane %v1222_v35, 4  ;;  %v1236_v22 = vor.u32 %v1235_v38, %v1232_v34  ;;  %v1249_v43 = vrot.slane %v1247_v15, 5  ;;  %v5170_v50 = vld [vmem:[%s6570_s21 + $0xc] sm:$0x1]  ;;  %v5171_v34 = vld [vmem:[%s6570_s21 + $0x10] sm:$0xf] }
 0x109   : > { %v1255_v33 = vrot.slane %v1253_v12, 5  ;;  %v1260_v29 = vrot.slane %v1258_v31, 4  ;;  %v1261_v45 = vshll.u32 %v301_v21, 16  ;;  %v1267_v62 = vshll.u32 %v371_v37, 16  ;;  %v5172_v21 = vld [vmem:[%s6570_s21 + $0x14] sm:$0x1] }
 0x10a   : > { %5574 = vmatmul.mubr.msk.bf16.gmra.mrb[56].mxu1 %vm1392_vm2, %v4933_v52  ;;  %v1228_v3 = vsel %vm6606_vm3, %v1223_v41, %v1227_v26  ;;  %v1237_v55 = vrot.slane %v1236_v22, 4  ;;  %v1250_v53 = vor.u32 %v1249_v43, %v1246_v42  ;;  %v3169_v38 = vshrl.u32 %v5169_v19, 16  ;;  %v5173_v12 = vld [vmem:[%s6570_s21 + $0x18] sm:$0xf] }
 0x10b   : > { %v1263_v35 = vrot.slane %v1261_v45, 5  ;;  %v3172_v47 = vshll.u32 %v5169_v19, 16  ;;  %v1269_v15 = vrot.slane %v1267_v62, 5  ;;  %v3178_v0 = vshll.u32 %v5170_v50, 16 }
 0x10c   : > { %v1242_v26 = vsel %vm6606_vm3, %v1237_v55, %v1241_v57  ;;  %v3183_v37 = vshrl.u32 %v5171_v34, 16  ;;  %v1251_v52 = vrot.slane %v1250_v53, 4  ;;  %v3171_v22 = vrot.slane %v3169_v38, 4 }
 0x10d   : > { %v4934_v31 = vcombine.low %v1228_v3, %v1242_v26  ;;  %v1264_v41 = vor.u32 %v1263_v35, %v1260_v29  ;;  %v3174_v10 = vrot.slane %v3172_v47, 5  ;;  %v3180_v42 = vrot.slane %v3178_v0, 5  ;;  %v5176_v29 = vld [vmem:[%s6570_s21 + $0x24] sm:$0x1]  ;;  %v5177_v0 = vld [vmem:[%s6570_s21 + $0x28] sm:$0xf] }
 0x10e   : > { %v3185_v43 = vrot.slane %v3183_v37, 4  ;;  %v3186_v45 = vshll.u32 %v5171_v34, 16  ;;  %v1256_v57 = vsel %vm6606_vm3, %v1251_v52, %v1255_v33  ;;  %v3192_v55 = vshll.u32 %v5172_v21, 16  ;;  %v5178_v52 = vld [vmem:[%s6570_s21 + $0x2c] sm:$0x1] }
 0x10f   : > { %5577 = vmatprep.mubr.msk.bf16.mxu1 %vm1392_vm2, %v4934_v31  ;;  %v1265_v19 = vrot.slane %v1264_v41, 4  ;;  %v3197_v3 = vshrl.u32 %v5173_v12, 16  ;;  %v3175_v62 = vor.u32 %v3174_v10, %v3171_v22  ;;  %v3200_v53 = vshll.u32 %v5173_v12, 16  ;;  %v5179_v12 = vld [vmem:[%s6570_s21 + $0x30] sm:$0xf] }
 0x110   : > { %v3188_v50 = vrot.slane %v3186_v45, 5  ;;  %v3206_v35 = vshll.u32 %v5174_v9, 16  ;;  %v3194_v38 = vrot.slane %v3192_v55, 5  ;;  %v3211_v26 = vshrl.u32 %v5175_v59, 16 }
 0x111   : > { %v1270_v34 = vsel %vm6606_vm3, %v1265_v19, %v1269_v15  ;;  %v3199_v47 = vrot.slane %v3197_v3, 4  ;;  %v3176_v31 = vrot.slane %v3175_v62, 4  ;;  %v3202_v21 = vrot.slane %v3200_v53, 5  ;;  %v5180_v3 = vld [vmem:[%s6570_s21 + $0x34] sm:$0x1] }
 0x112   : > { %v4935_v37 = vcombine.low %v1256_v57, %v1270_v34  ;;  %v3189_v33 = vor.u32 %v3188_v50, %v3185_v43  ;;  %v3208_v41 = vrot.slane %v3206_v35, 5  ;;  %v3213_v10 = vrot.slane %v3211_v26, 4  ;;  %v5181_v34 = vld [vmem:[%s6570_s21 + $0x38] sm:$0xf] }
 0x113   : > { %v3214_v22 = vshll.u32 %v5175_v59, 16  ;;  %v3220_v45 = vshll.u32 %v5176_v29, 16  ;;  %v3181_v15 = vsel %vm6606_vm3, %v3176_v31, %v3180_v42  ;;  %v3203_v19 = vor.u32 %v3202_v21, %v3199_v47  ;;  %v5183_v31 = vld [vmem:[%s6570_s21 + $0x40] sm:$0xf] }
 0x114   : > { %5578 = vmatmul.mubr.msk.bf16.gmra.mrb[60].mxu1 %vm1392_vm2, %v4935_v37  ;;  %v3190_v9 = vrot.slane %v3189_v33, 4  ;;  %v3225_v55 = vshrl.u32 %v5177_v0, 16  ;;  %v7844_v43 = vcombine.low %v6581_v6, %v6584_v7  ;;  %v3228_v62 = vshll.u32 %v5177_v0, 16  ;;  %v5182_v37 = vld [vmem:[%s6570_s21 + $0x3c] sm:$0x1] }
 0x115   : > { %v3216_v57 = vrot.slane %v3214_v22, 5  ;;  %v3222_v59 = vrot.slane %v3220_v45, 5  ;;  %v3234_v50 = vshll.u32 %v5178_v52, 16  ;;  %v3204_v53 = vrot.slane %v3203_v19, 4  ;;  %v5184_v45 = vld [vmem:[%s6570_s21 + $0x44] sm:$0x1] }
 0x116   : > { %5587 = vmatprep.mubr.msk.bf16.mxu1 %vm1392_vm2, %v7844_v43  ;;  %v3195_v29 = vsel %vm6606_vm3, %v3190_v9, %v3194_v38  ;;  %v3227_v42 = vrot.slane %v3225_v55, 4  ;;  %v3239_v35 = vshrl.u32 %v5179_v12, 16  ;;  %v3230_v6 = vrot.slane %v3228_v62, 5 }
 0x117   : > { %v5297_v47 = vcombine.low %v3181_v15, %v3195_v29  ;;  %v3217_v26 = vor.u32 %v3216_v57, %v3213_v10  ;;  %v3236_v7 = vrot.slane %v3234_v50, 5  ;;  %v3209_v33 = vsel %vm6606_vm3, %v3204_v53, %v3208_v41  ;;  %v5185_v57 = vld [vmem:[%s6570_s21 + $0x50] sm:$0xf]  ;;  %v5186_v50 = vld [vmem:[%s6570_s21 + $0x54] sm:$0x1] }
 0x118   : > { %v3241_v0 = vrot.slane %v3239_v35, 4  ;;  %v3242_v21 = vshll.u32 %v5179_v12, 16  ;;  %v3248_v52 = vshll.u32 %v5180_v3, 16  ;;  %v3231_v22 = vor.u32 %v3230_v6, %v3227_v42 }
 0x119   : > { %5727 = vmatprep.mubr.msk.bf16.mxu0 %vm1392_vm2, %v5297_v47  ;;  %v3218_v38 = vrot.slane %v3217_v26, 4  ;;  %v3253_v9 = vshrl.u32 %v5181_v34, 16  ;;  %v3256_v15 = vshll.u32 %v5181_v34, 16  ;;  %v3262_v55 = vshll.u32 %v5182_v37, 16  ;;  %v5187_v47 = vld [vmem:[%s6570_s21 + $0x58] sm:$0xf] }
 0x11a   : > { %v3244_v10 = vrot.slane %v3242_v21, 5  ;;  %v3250_v19 = vrot.slane %v3248_v52, 5  ;;  %v3267_v43 = vshrl.u32 %v5183_v31, 16  ;;  %v3232_v12 = vrot.slane %v3231_v22, 4 }
 0x11b   : > { %v3223_v41 = vsel %vm6606_vm3, %v3218_v38, %v3222_v59  ;;  %v3255_v3 = vrot.slane %v3253_v9, 4  ;;  %v3258_v62 = vrot.slane %v3256_v15, 5  ;;  %v7845_v29 = vcombine.low %v6594_v23, %v6597_v24  ;;  %v5188_v24 = vld [vmem:[%s6570_s21 + $0x5c] sm:$0x1]  ;;  %v5189_v38 = vld [vmem:[%s6570_s21 + $0x60] sm:$0xf] }
 0x11c   : > { %v5298_v53 = vcombine.low %v3209_v33, %v3223_v41  ;;  %v3245_v42 = vor.u32 %v3244_v10, %v3241_v0  ;;  %v3264_v35 = vrot.slane %v3262_v55, 5  ;;  %v3269_v34 = vrot.slane %v3267_v43, 4  ;;  %v5190_v15 = vld [vmem:[%s6570_s21 + $0x64] sm:$0x1]  ;;  %v5191_v55 = vld [vmem:[%s6570_s21 + $0x68] sm:$0xf] }
 0x11d   : > { %5588 = vmatmul.mubr.msk.bf16.vlgmr.msra.gmra.mrb[0].mxu1 %vm1392_vm2, %v7845_v29  ;;  %v7846_v26 = vcombine.low %v6618_v51, %v6622_v54  ;;  %v3237_v59 = vsel %vm6606_vm3, %v3232_v12, %v3236_v7  ;;  %v3259_v6 = vor.u32 %v3258_v62, %v3255_v3  ;;  %v3270_v37 = vshll.u32 %v5183_v31, 16  ;;  %v5192_v29 = vld [vmem:[%s6570_s21 + $0x6c] sm:$0x1] }
 0x11e   : > { %v3276_v23 = vshll.u32 %v5184_v45, 16  ;;  %5728 = vmatmul.mubr.msk.bf16.vlgmr.msra.gmra.mrb[0].mxu0 %vm1392_vm2, %v5298_v53  ;;  %v3246_v33 = vrot.slane %v3245_v42, 4  ;;  %v3281_v0 = vshrl.u32 %v5185_v57, 16  ;;  %v3284_v21 = vshll.u32 %v5185_v57, 16 }
 0x11f   : > { %5591 = vmatprep.mubr.msk.bf16.mxu1 %vm1392_vm2, %v7846_v26  ;;  %v3290_v52 = vshll.u32 %v5186_v50, 16  ;;  %v3260_v22 = vrot.slane %v3259_v6, 4  ;;  %v3272_v51 = vrot.slane %v3270_v37, 5  ;;  %v3295_v9 = vshrl.u32 %v5187_v47, 16  ;;  %v5193_v37 = vld [vmem:[%s6570_s21 + $0x70] sm:$0xf] }
 0x120   : > { %v3278_v54 = vrot.slane %v3276_v23, 5  ;;  %v3251_v7 = vsel %vm6606_vm3, %v3246_v33, %v3250_v19  ;;  %v3283_v31 = vrot.slane %v3281_v0, 4  ;;  %v3286_v45 = vrot.slane %v3284_v21, 5 }
 0x121   : > { %v3292_v10 = vrot.slane %v3290_v52, 5  ;;  %v5299_v43 = vcombine.low %v3237_v59, %v3251_v7  ;;  %v3265_v57 = vsel %vm6606_vm3, %v3260_v22, %v3264_v35  ;;  %v3273_v41 = vor.u32 %v3272_v51, %v3269_v34 }
 0x122   : > { %v3297_v12 = vrot.slane %v3295_v9, 4  ;;  %v3287_v3 = vor.u32 %v3286_v45, %v3283_v31  ;;  %v3298_v62 = vshll.u32 %v5187_v47, 16  ;;  %v3304_v50 = vshll.u32 %v5188_v24, 16  ;;  %v5194_v24 = vld [vmem:[%s6570_s21 + $0x74] sm:$0x1] }
 0x123   : > { %v3309_v53 = vshrl.u32 %v5189_v38, 16  ;;  %5731 = vmatprep.mubr.msk.bf16.mxu0 %vm1392_vm2, %v5299_v43  ;;  %v3274_v19 = vrot.slane %v3273_v41, 4  ;;  %v3312_v42 = vshll.u32 %v5189_v38, 16  ;;  %v3318_v26 = vshll.u32 %v5190_v15, 16  ;;  %v5196_v45 = vld [vmem:[%s6570_s21 + $0x7c] sm:$0x1] }
 0x124   : > { %v3323_v6 = vshrl.u32 %v5191_v55, 16  ;;  %v7847_v59 = vcombine.low %v6637_v14, %v6640_v16  ;;  %v3288_v35 = vrot.slane %v3287_v3, 4  ;;  %v3300_v34 = vrot.slane %v3298_v62, 5  ;;  %v5195_v14 = vld [vmem:[%s6570_s21 + $0x78] sm:$0xf] }
 0x125   : > { %v3306_v23 = vrot.slane %v3304_v50, 5  ;;  %v3311_v47 = vrot.slane %v3309_v53, 4  ;;  %v3279_v33 = vsel %vm6606_vm3, %v3274_v19, %v3278_v54  ;;  %v7848_v0 = vcombine.low %v6654_v40, %v6660_v44  ;;  %v5198_v19 = vld [vmem:[%s6570_s21 + $0x84] sm:$0x1] }
 0x126   : > { %5592 = vmatmul.mubr.msk.bf16.gmra.mrb[4].mxu1 %vm1392_vm2, %v7847_v59  ;;  %v3314_v21 = vrot.slane %v3312_v42, 5  ;;  %v3320_v52 = vrot.slane %v3318_v26, 5  ;;  %v3325_v38 = vrot.slane %v3323_v6, 4  ;;  %v5300_v16 = vcombine.low %v3265_v57, %v3279_v33  ;;  %v5199_v42 = vld [vmem:[%s6570_s21 + $0x88] sm:$0xf] }
 0x127   : > { %5595 = vmatprep.mubr.msk.bf16.mxu1 %vm1392_vm2, %v7848_v0  ;;  %v3293_v22 = vsel %vm6606_vm3, %v3288_v35, %v3292_v10  ;;  %v3301_v51 = vor.u32 %v3300_v34, %v3297_v12  ;;  %v3326_v9 = vshll.u32 %v5191_v55, 16  ;;  %v3332_v7 = vshll.u32 %v5192_v29, 16  ;;  %v5197_v12 = vld [vmem:[%s6570_s21 + $0x80] sm:$0xf]  ;;  %v7850_v34 = vld [vmem:[#allocation13_spill] sm:$0xff] }
 0x128   : > { %v3315_v15 = vor.u32 %v3314_v21, %v3311_v47  ;;  %v3337_v54 = vshrl.u32 %v5193_v37, 16  ;;  %v3340_v31 = vshll.u32 %v5193_v37, 16  ;;  %5732 = vmatmul.mubr.msk.bf16.gmra.mrb[4].mxu0 %vm1392_vm2, %v5300_v16  ;;  %v3346_v43 = vshll.u32 %v5194_v24, 16  ;;  %v7849_v35 = vld [vmem:[#allocation12_spill] sm:$0xff]  ;;  %v5200_v33 = vld [vmem:[%s6570_s21 + $0x8c] sm:$0x1] }
 0x129   : > { %v3302_v40 = vrot.slane %v3301_v51, 4  ;;  %v3328_v44 = vrot.slane %v3326_v9, 5  ;;  %v3351_v41 = vshrl.u32 %v5195_v14, 16  ;;  %v3334_v3 = vrot.slane %v3332_v7, 5  ;;  %v7853_v16 = vld [vmem:[#allocation15_spill] sm:$0xff] }
 0x12a   : > { %v3316_v57 = vrot.slane %v3315_v15, 4  ;;  %v3339_v62 = vrot.slane %v3337_v54, 4  ;;  %v3342_v10 = vrot.slane %v3340_v31, 5  ;;  %v3348_v29 = vrot.slane %v3346_v43, 5  ;;  %v5201_v15 = vld [vmem:[%s6570_s21 + $0x98] sm:$0xf] }
 0x12b   : > { %v3307_v55 = vsel %vm6606_vm3, %v3302_v40, %v3306_v23  ;;  %v3329_v50 = vor.u32 %v3328_v44, %v3325_v38  ;;  %v3353_v53 = vrot.slane %v3351_v41, 4  ;;  %v3354_v59 = vshll.u32 %v5195_v14, 16  ;;  %v7852_v38 = vld [vmem:[#allocation14_spill] sm:$0xff]  ;;  %v5202_v44 = vld [vmem:[%s6570_s21 + $0x9c] sm:$0x1] }
 0x12c   : > { %v5301_v26 = vcombine.low %v3293_v22, %v3307_v55  ;;  %v3321_v6 = vsel %vm6606_vm3, %v3316_v57, %v3320_v52  ;;  %v3343_v37 = vor.u32 %v3342_v10, %v3339_v62  ;;  %v7851_v47 = vcombine.low %v7849_v35, %v7850_v34  ;;  %v5203_v62 = vld [vmem:[%s6570_s21 + $0xa0] sm:$0xf] }
 0x12d   : > { %v3330_v24 = vrot.slane %v3329_v50, 4  ;;  %v3360_v23 = vshll.u32 %v5196_v45, 16  ;;  %v3365_v0 = vshrl.u32 %v5197_v12, 16  ;;  %v3368_v21 = vshll.u32 %v5197_v12, 16 }
 0x12e   : > { %5596 = vmatmul.mubr.msk.bf16.gmra.mrb[8].mxu1 %vm1392_vm2, %v7851_v47  ;;  %5735 = vmatprep.mubr.msk.bf16.mxu0 %vm1392_vm2, %v5301_v26  ;;  %v7854_v22 = vcombine.low %v7852_v38, %v7853_v16  ;;  %v3344_v52 = vrot.slane %v3343_v37, 4  ;;  %v3356_v14 = vrot.slane %v3354_v59, 5  ;;  %v3374_v51 = vshll.u32 %v5198_v19, 16  ;;  %v5204_v19 = vld [vmem:[%s6570_s21 + $0xa4] sm:$0x1]  ;;  %v7856_v16 = vld [vmem:[#allocation17_spill] sm:$0xff] }
 0x12f   : > { %v3379_v9 = vshrl.u32 %v5199_v42, 16  ;;  %v3335_v7 = vsel %vm6606_vm3, %v3330_v24, %v3334_v3  ;;  %v3362_v54 = vrot.slane %v3360_v23, 5  ;;  %v3367_v31 = vrot.slane %v3365_v0, 4  ;;  %v5206_v47 = vld [vmem:[%s6570_s21 + $0xac] sm:$0x1]  ;;  %v7855_v38 = vld [vmem:[#allocation16_spill] sm:$0xff] }
 0x130   : > { %5599 = vmatprep.mubr.msk.bf16.mxu1 %vm1392_vm2, %v7854_v22  ;;  %v3370_v40 = vrot.slane %v3368_v21, 5  ;;  %v5302_v45 = vcombine.low %v3321_v6, %v3335_v7  ;;  %v3349_v43 = vsel %vm6606_vm3, %v3344_v52, %v3348_v29  ;;  %v3357_v41 = vor.u32 %v3356_v14, %v3353_v53  ;;  %v5205_v6 = vld [vmem:[%s6570_s21 + $0xa8] sm:$0xf]  ;;  %v5207_v0 = vld [vmem:[%s6570_s21 + $0xb0] sm:$0xf] }
 0x131   : > { %v3376_v57 = vrot.slane %v3374_v51, 5  ;;  %v3381_v12 = vrot.slane %v3379_v9, 4  ;;  %v3382_v55 = vshll.u32 %v5199_v42, 16  ;;  %v3388_v50 = vshll.u32 %v5200_v33, 16  ;;  %v7858_v9 = vld [vmem:[#allocation18_spill] sm:$0xff] }
 0x132   : > { %v3371_v10 = vor.u32 %v3370_v40, %v3367_v31  ;;  %5736 = vmatmul.mubr.msk.bf16.gmra.mrb[8].mxu0 %vm1392_vm2, %v5302_v45  ;;  %v3358_v3 = vrot.slane %v3357_v41, 4  ;;  %v3393_v26 = vshrl.u32 %v5201_v15, 16  ;;  %v3396_v37 = vshll.u32 %v5201_v15, 16  ;;  %v7859_v15 = vld [vmem:[#allocation19_spill] sm:$0xff] }
 0x133   : > { %v3402_v59 = vshll.u32 %v5202_v44, 16  ;;  %v3384_v34 = vrot.slane %v3382_v55, 5  ;;  %v3390_v29 = vrot.slane %v3388_v50, 5  ;;  %v3407_v53 = vshrl.u32 %v5203_v62, 16  ;;  %v5208_v44 = vld [vmem:[%s6570_s21 + $0xb4] sm:$0x1] }
 0x134   : > { %v3372_v35 = vrot.slane %v3371_v10, 4  ;;  %v3363_v24 = vsel %vm6606_vm3, %v3358_v3, %v3362_v54  ;;  %v3395_v42 = vrot.slane %v3393_v26, 4  ;;  %v3398_v23 = vrot.slane %v3396_v37, 5  ;;  %v5210_v37 = vld [vmem:[%s6570_s21 + $0xbc] sm:$0x1] }
 0x135   : > { %v3404_v33 = vrot.slane %v3402_v59, 5  ;;  %v5303_v21 = vcombine.low %v3349_v43, %v3363_v24  ;;  %v7857_v22 = vcombine.low %v7855_v38, %v7856_v16  ;;  %v3385_v14 = vor.u32 %v3384_v34, %v3381_v12  ;;  %v5209_v12 = vld [vmem:[%s6570_s21 + $0xb8] sm:$0xf]  ;;  %v5211_v34 = vld [vmem:[%s6570_s21 + $0xc0] sm:$0xf] }
 0x136   : > { %v3377_v52 = vsel %vm6606_vm3, %v3372_v35, %v3376_v57  ;;  %v3409_v51 = vrot.slane %v3407_v53, 4  ;;  %v7860_v7 = vcombine.low %v7858_v9, %v7859_v15  ;;  %v3399_v54 = vor.u32 %v3398_v23, %v3395_v42 }
 0x137   : > { %5600 = vmatmul.mubr.msk.bf16.gmra.mrb[12].mxu1 %vm1392_vm2, %v7857_v22  ;;  %v3410_v31 = vshll.u32 %v5203_v62, 16  ;;  %v3416_v40 = vshll.u32 %v5204_v19, 16  ;;  %v3421_v45 = vshrl.u32 %v5205_v6, 16  ;;  %5739 = vmatprep.mubr.msk.bf16.mxu0 %vm1392_vm2, %v5303_v21  ;;  %v3386_v43 = vrot.slane %v3385_v14, 4  ;;  %v5212_v22 = vld [vmem:[%s6570_s21 + $0xc4] sm:$0x1] }
 0x138   : > { %5603 = vmatprep.mubr.msk.bf16.mxu1 %vm1392_vm2, %v7860_v7  ;;  %v3424_v41 = vshll.u32 %v5205_v6, 16  ;;  %v3430_v10 = vshll.u32 %v5206_v47, 16  ;;  %v3435_v57 = vshrl.u32 %v5207_v0, 16  ;;  %v3400_v55 = vrot.slane %v3399_v54, 4  ;;  %v5213_v7 = vld [vmem:[%s6570_s21 + $0xc8] sm:$0xf] }
 0x139   : > { %v3412_v50 = vrot.slane %v3410_v31, 5  ;;  %v3418_v3 = vrot.slane %v3416_v40, 5  ;;  %v3423_v26 = vrot.slane %v3421_v45, 4  ;;  %v3391_v59 = vsel %vm6606_vm3, %v3386_v43, %v3390_v29 }
 0x13a   : > { %v3426_v62 = vrot.slane %v3424_v41, 5  ;;  %v3432_v19 = vrot.slane %v3430_v10, 5  ;;  %v3437_v35 = vrot.slane %v3435_v57, 4  ;;  %v5304_v53 = vcombine.low %v3377_v52, %v3391_v59 }
 0x13b   : > { %v3405_v6 = vsel %vm6606_vm3, %v3400_v55, %v3404_v33  ;;  %v3413_v47 = vor.u32 %v3412_v50, %v3409_v51  ;;  %v3438_v24 = vshll.u32 %v5207_v0, 16  ;;  %v3444_v23 = vshll.u32 %v5208_v44, 16  ;;  %v5216_v50 = vld [vmem:[%s6570_s21 + $0xd4] sm:$0x1] }
 0x13c   : > { %v3427_v42 = vor.u32 %v3426_v62, %v3423_v26  ;;  %v3449_v21 = vshrl.u32 %v5209_v12, 16  ;;  %v3452_v38 = vshll.u32 %v5209_v12, 16  ;;  %5740 = vmatmul.mubr.msk.bf16.gmra.mrb[12].mxu0 %vm1392_vm2, %v5304_v53  ;;  %v3458_v14 = vshll.u32 %v5210_v37, 16  ;;  %v5217_v62 = vld [vmem:[%s6570_s21 + $0xe0] sm:$0xf] }
 0x13d   : > { %v3414_v16 = vrot.slane %v3413_v47, 4  ;;  %v3440_v29 = vrot.slane %v3438_v24, 5  ;;  %v3463_v9 = vshrl.u32 %v5211_v34, 16  ;;  %v7861_v52 = vcombine.low %v6744_v48, %v6749_v56  ;;  %v5214_v48 = vld [vmem:[%s6570_s21 + $0xcc] sm:$0x1] }
 0x13e   : > { %v3428_v33 = vrot.slane %v3427_v42, 4  ;;  %v3446_v0 = vrot.slane %v3444_v23, 5  ;;  %v3451_v51 = vrot.slane %v3449_v21, 4  ;;  %v3454_v15 = vrot.slane %v3452_v38, 5  ;;  %v5215_v56 = vld [vmem:[%s6570_s21 + $0xd0] sm:$0xf] }
 0x13f   : > { %5604 = vmatmul.mubr.msk.bf16.gmra.mrb[16].mxu1 %vm1392_vm2, %v7861_v52  ;;  %v3419_v54 = vsel %vm6606_vm3, %v3414_v16, %v3418_v3  ;;  %v3441_v31 = vor.u32 %v3440_v29, %v3437_v35  ;;  %v7862_v40 = vcombine.low %v6763_v20, %v6768_v28  ;;  %v3460_v44 = vrot.slane %v3458_v14, 5  ;;  %v5219_v21 = vld [vmem:[%s6570_s21 + $0xe8] sm:$0xf]  ;;  %v5220_v14 = vld [vmem:[%s6570_s21 + $0xec] sm:$0x1] }
 0x140   : > { %v3465_v45 = vrot.slane %v3463_v9, 4  ;;  %v5305_v43 = vcombine.low %v3405_v6, %v3419_v54  ;;  %v3433_v41 = vsel %vm6606_vm3, %v3428_v33, %v3432_v19  ;;  %v3455_v10 = vor.u32 %v3454_v15, %v3451_v51  ;;  %v5218_v6 = vld [vmem:[%s6570_s21 + $0xe4] sm:$0x1]  ;;  %v5221_v15 = vld [vmem:[%s6570_s21 + $0xf0] sm:$0xf] }
 0x141   : > { %5607 = vmatprep.mubr.msk.bf16.mxu1 %vm1392_vm2, %v7862_v40  ;;  %v3466_v57 = vshll.u32 %v5211_v34, 16  ;;  %v3442_v12 = vrot.slane %v3441_v31, 4  ;;  %v3472_v55 = vshll.u32 %v5212_v22, 16  ;;  %v3477_v3 = vshrl.u32 %v5213_v7, 16 }
 0x142   : > { %v3480_v26 = vshll.u32 %v5213_v7, 16  ;;  %5743 = vmatprep.mubr.msk.bf16.mxu0 %vm1392_vm2, %v5305_v43  ;;  %v3456_v20 = vrot.slane %v3455_v10, 4  ;;  %v3486_v37 = vshll.u32 %v5214_v48, 16  ;;  %v3491_v59 = vshrl.u32 %v5215_v56, 16  ;;  %v5223_v43 = vld [vmem:[%s6570_s21 + $0xf8] sm:$0xf] }
 0x143   : > { %v3468_v28 = vrot.slane %v3466_v57, 5  ;;  %v3447_v19 = vsel %vm6606_vm3, %v3442_v12, %v3446_v0  ;;  %v3474_v35 = vrot.slane %v3472_v55, 5  ;;  %v3479_v34 = vrot.slane %v3477_v3, 4 }
 0x144   : > { %v3482_v53 = vrot.slane %v3480_v26, 5  ;;  %v5306_v47 = vcombine.low %v3433_v41, %v3447_v19  ;;  %v3461_v24 = vsel %vm6606_vm3, %v3456_v20, %v3460_v44  ;;  %v3488_v23 = vrot.slane %v3486_v37, 5 }
 0x145   : > { %v3469_v42 = vor.u32 %v3468_v28, %v3465_v45  ;;  %v3493_v16 = vrot.slane %v3491_v59, 4  ;;  %v3494_v29 = vshll.u32 %v5215_v56, 16  ;;  %v3500_v22 = vshll.u32 %v5216_v50, 16  ;;  %v5222_v45 = vld [vmem:[%s6570_s21 + $0xf4] sm:$0x1] }
 0x146   : > { %v3483_v38 = vor.u32 %v3482_v53, %v3479_v34  ;;  %5744 = vmatmul.mubr.msk.bf16.gmra.mrb[16].mxu0 %vm1392_vm2, %v5306_v47  ;;  %v7863_v52 = vcombine.low %v6785_v58, %v6789_v1  ;;  %v3505_v33 = vshrl.u32 %v5217_v62, 16  ;;  %v3508_v0 = vshll.u32 %v5217_v62, 16  ;;  %v5224_v50 = vld [vmem:[%s6570_s21 + $0xfc] sm:$0x1]  ;;  %v5225_v59 = vld [vmem:[%s6570_s21 + $0x100] sm:$0xf] }
 0x147   : > { %v3470_v9 = vrot.slane %v3469_v42, 4  ;;  %v3514_v51 = vshll.u32 %v5218_v6, 16  ;;  %v3496_v54 = vrot.slane %v3494_v29, 5  ;;  %v3502_v31 = vrot.slane %v3500_v22, 5  ;;  %v5226_v53 = vld [vmem:[%s6570_s21 + $0x104] sm:$0x1] }
 0x148   : > { %5608 = vmatmul.mubr.msk.bf16.gmra.mrb[20].mxu1 %vm1392_vm2, %v7863_v52  ;;  %v3484_v7 = vrot.slane %v3483_v38, 4  ;;  %v7864_v40 = vcombine.low %v6811_v49, %v6820_v60  ;;  %v3519_v44 = vshrl.u32 %v5219_v21, 16  ;;  %v3507_v1 = vrot.slane %v3505_v33, 4 }
 0x149   : > { %v3475_v58 = vsel %vm6606_vm3, %v3470_v9, %v3474_v35  ;;  %v3510_v48 = vrot.slane %v3508_v0, 5  ;;  %v3516_v56 = vrot.slane %v3514_v51, 5  ;;  %v3497_v57 = vor.u32 %v3496_v54, %v3493_v16 }
 0x14a   : > { %5611 = vmatprep.mubr.msk.bf16.mxu1 %vm1392_vm2, %v7864_v40  ;;  %v5307_v41 = vcombine.low %v3461_v24, %v3475_v58  ;;  %v3489_v10 = vsel %vm6606_vm3, %v3484_v7, %v3488_v23  ;;  %v3521_v12 = vrot.slane %v3519_v44, 4  ;;  %v3522_v60 = vshll.u32 %v5219_v21, 16  ;;  %v5227_v23 = vld [vmem:[%s6570_s21 + $0x108] sm:$0xf] }
 0x14b   : > { %v3511_v49 = vor.u32 %v3510_v48, %v3507_v1  ;;  %v3528_v55 = vshll.u32 %v5220_v14, 16  ;;  %v3533_v3 = vshrl.u32 %v5221_v15, 16  ;;  %v3498_v26 = vrot.slane %v3497_v57, 4  ;;  %v5230_v48 = vld [vmem:[%s6570_s21 + $0x114] sm:$0x1] }
 0x14c   : > { %5747 = vmatprep.mubr.msk.bf16.mxu0 %vm1392_vm2, %v5307_v41  ;;  %v3536_v20 = vshll.u32 %v5221_v15, 16  ;;  %v3542_v28 = vshll.u32 %v5222_v45, 16  ;;  %v3547_v37 = vshrl.u32 %v5223_v43, 16  ;;  %v3524_v19 = vrot.slane %v3522_v60, 5  ;;  %v5229_v45 = vld [vmem:[%s6570_s21 + $0x110] sm:$0xf] }
 0x14d   : > { %v3512_v62 = vrot.slane %v3511_v49, 4  ;;  %v3530_v35 = vrot.slane %v3528_v55, 5  ;;  %v3535_v34 = vrot.slane %v3533_v3, 4  ;;  %v3503_v6 = vsel %vm6606_vm3, %v3498_v26, %v3502_v31  ;;  %v5232_v26 = vld [vmem:[%s6570_s21 + $0x11c] sm:$0x1] }
 0x14e   : > { %v3538_v47 = vrot.slane %v3536_v20, 5  ;;  %v3544_v24 = vrot.slane %v3542_v28, 5  ;;  %v3549_v42 = vrot.slane %v3547_v37, 4  ;;  %v5308_v21 = vcombine.low %v3489_v10, %v3503_v6 }
 0x14f   : > { %v3517_v38 = vsel %vm6606_vm3, %v3512_v62, %v3516_v56  ;;  %v3525_v16 = vor.u32 %v3524_v19, %v3521_v12  ;;  %v7865_v29 = vcombine.low %v6835_v32, %v6841_v39  ;;  %v3550_v22 = vshll.u32 %v5223_v43, 16  ;;  %v5228_v32 = vld [vmem:[%s6570_s21 + $0x10c] sm:$0x1]  ;;  %v5231_v56 = vld [vmem:[%s6570_s21 + $0x118] sm:$0xf] }
 0x150   : > { %v3539_v14 = vor.u32 %v3538_v47, %v3535_v34  ;;  %v3556_v9 = vshll.u32 %v5224_v50, 16  ;;  %v7866_v52 = vcombine.low %v6854_v17, %v6857_v18  ;;  %v3561_v33 = vshrl.u32 %v5225_v59, 16  ;;  %5748 = vmatmul.mubr.msk.bf16.gmra.mrb[20].mxu0 %vm1392_vm2, %v5308_v21 }
 0x151   : > { %5612 = vmatmul.mubr.msk.bf16.gmra.mrb[24].mxu1 %vm1392_vm2, %v7865_v29  ;;  %v3564_v0 = vshll.u32 %v5225_v59, 16  ;;  %v3526_v51 = vrot.slane %v3525_v16, 4  ;;  %v3552_v15 = vrot.slane %v3550_v22, 5  ;;  %v3570_v39 = vshll.u32 %v5226_v53, 16  ;;  %v5236_v16 = vld [vmem:[%s6570_s21 + $0x134] sm:$0x1] }
 0x152   : > { %5615 = vmatprep.mubr.msk.bf16.mxu1 %vm1392_vm2, %v7866_v52  ;;  %v3575_v7 = vshrl.u32 %v5227_v23, 16  ;;  %v3540_v54 = vrot.slane %v3539_v14, 4  ;;  %v3558_v31 = vrot.slane %v3556_v9, 5  ;;  %v3563_v40 = vrot.slane %v3561_v33, 4 }
 0x153   : > { %v3566_v44 = vrot.slane %v3564_v0, 5  ;;  %v3531_v17 = vsel %vm6606_vm3, %v3526_v51, %v3530_v35  ;;  %v3553_v18 = vor.u32 %v3552_v15, %v3549_v42  ;;  %v3572_v58 = vrot.slane %v3570_v39, 5  ;;  %v5233_v35 = vld [vmem:[%s6570_s21 + $0x128] sm:$0xf]  ;;  %v5234_v42 = vld [vmem:[%s6570_s21 + $0x12c] sm:$0x1] }
 0x154   : > { %v3577_v1 = vrot.slane %v3575_v7, 4  ;;  %v5309_v43 = vcombine.low %v3517_v38, %v3531_v17  ;;  %v3545_v41 = vsel %vm6606_vm3, %v3540_v54, %v3544_v24  ;;  %v3578_v57 = vshll.u32 %v5227_v23, 16  ;;  %v5235_v23 = vld [vmem:[%s6570_s21 + $0x130] sm:$0xf]  ;;  %v5238_v51 = vld [vmem:[%s6570_s21 + $0x13c] sm:$0x1] }
 0x155   : > { %v3567_v10 = vor.u32 %v3566_v44, %v3563_v40  ;;  %v3554_v12 = vrot.slane %v3553_v18, 4  ;;  %v3584_v49 = vshll.u32 %v5228_v32, 16  ;;  %v3589_v60 = vshrl.u32 %v5229_v45, 16  ;;  %v5239_v54 = vld [vmem:[%s6570_s21 + $0x140] sm:$0xf] }
 0x156   : > { %v3592_v55 = vshll.u32 %v5229_v45, 16  ;;  %5751 = vmatprep.mubr.msk.bf16.mxu0 %vm1392_vm2, %v5309_v43  ;;  %v3580_v3 = vrot.slane %v3578_v57, 5  ;;  %v3598_v20 = vshll.u32 %v5230_v48, 16  ;;  %v3603_v28 = vshrl.u32 %v5231_v56, 16 }
 0x157   : > { %v3568_v50 = vrot.slane %v3567_v10, 4  ;;  %v3559_v37 = vsel %vm6606_vm3, %v3554_v12, %v3558_v31  ;;  %v7867_v59 = vcombine.low %v6873_v4, %v6879_v11  ;;  %v3591_v62 = vrot.slane %v3589_v60, 4 }
 0x158   : > { %v3594_v19 = vrot.slane %v3592_v55, 5  ;;  %v5310_v34 = vcombine.low %v3545_v41, %v3559_v37  ;;  %v3581_v53 = vor.u32 %v3580_v3, %v3577_v1  ;;  %v3586_v6 = vrot.slane %v3584_v49, 5  ;;  %v5240_v41 = vld [vmem:[%s6570_s21 + $0x144] sm:$0x1]  ;;  %v5241_v3 = vld [vmem:[%s6570_s21 + $0x148] sm:$0xf] }
 0x159   : > { %5616 = vmatmul.mubr.msk.bf16.gmra.mrb[28].mxu1 %vm1392_vm2, %v7867_v59  ;;  %v3600_v47 = vrot.slane %v3598_v20, 5  ;;  %v7868_v24 = vcombine.low %v6893_v46, %v6898_v5  ;;  %v3605_v11 = vrot.slane %v3603_v28, 4  ;;  %v3606_v21 = vshll.u32 %v5231_v56, 16  ;;  %v5237_v46 = vld [vmem:[%s6570_s21 + $0x138] sm:$0xf]  ;;  %v7869_v56 = vld [vmem:[#allocation20_spill] sm:$0xff] }
 0x15a   : > { %v3595_v4 = vor.u32 %v3594_v19, %v3591_v62  ;;  %v3612_v38 = vshll.u32 %v5232_v26, 16  ;;  %5752 = vmatmul.mubr.msk.bf16.gmra.mrb[24].mxu0 %vm1392_vm2, %v5310_v34  ;;  %v3573_v29 = vsel %vm6606_vm3, %v3568_v50, %v3572_v58  ;;  %v3582_v22 = vrot.slane %v3581_v53, 4  ;;  %v5243_v37 = vld [vmem:[%s6570_s21 + $0x150] sm:$0xf]  ;;  %v5242_v34 = vld [vmem:[%s6570_s21 + $0x14c] sm:$0x1] }
 0x15b   : > { %5619 = vmatprep.mubr.msk.bf16.mxu1 %vm1392_vm2, %v7868_v24  ;;  %v3617_v14 = vshrl.u32 %v5233_v35, 16  ;;  %v3620_v9 = vshll.u32 %v5233_v35, 16  ;;  %v3608_v52 = vrot.slane %v3606_v21, 5  ;;  %v3626_v33 = vshll.u32 %v5234_v42, 16  ;;  %v5244_v42 = vld [vmem:[%s6570_s21 + $0x154] sm:$0x1] }
 0x15c   : > { %v3596_v5 = vrot.slane %v3595_v4, 4  ;;  %v3631_v0 = vshrl.u32 %v5235_v23, 16  ;;  %v3587_v15 = vsel %vm6606_vm3, %v3582_v22, %v3586_v6  ;;  %v3614_v32 = vrot.slane %v3612_v38, 5 }
 0x15d   : > { %v3619_v39 = vrot.slane %v3617_v14, 4  ;;  %v3622_v7 = vrot.slane %v3620_v9, 5  ;;  %v5311_v31 = vcombine.low %v3573_v29, %v3587_v15  ;;  %v3609_v44 = vor.u32 %v3608_v52, %v3605_v11  ;;  %v5246_v15 = vld [vmem:[%s6570_s21 + $0x15c] sm:$0x1] }
 0x15e   : > { %v3601_v40 = vsel %vm6606_vm3, %v3596_v5, %v3600_v47  ;;  %v3633_v45 = vrot.slane %v3631_v0, 4  ;;  %v3634_v18 = vshll.u32 %v5235_v23, 16  ;;  %v3640_v58 = vshll.u32 %v5236_v16, 16  ;;  %v5245_v16 = vld [vmem:[%s6570_s21 + $0x158] sm:$0xf] }
 0x15f   : > { %v3623_v17 = vor.u32 %v3622_v7, %v3619_v39  ;;  %v3645_v1 = vshrl.u32 %v5237_v46, 16  ;;  %5755 = vmatprep.mubr.msk.bf16.mxu0 %vm1392_vm2, %v5311_v31  ;;  %v3610_v48 = vrot.slane %v3609_v44, 4  ;;  %v7870_v43 = vcombine.low %v6912_v25, %v7869_v56 }
 0x160   : > { %v3648_v10 = vshll.u32 %v5237_v46, 16  ;;  %v3654_v57 = vshll.u32 %v5238_v51, 16  ;;  %v3659_v12 = vshrl.u32 %v5239_v54, 16  ;;  %v3628_v60 = vrot.slane %v3626_v33, 5  ;;  %v5247_v46 = vld [vmem:[%s6570_s21 + $0x160] sm:$0xf] }
 0x161   : > { %5620 = vmatmul.mubr.msk.bf16.gmra.mrb[32].mxu1 %vm1392_vm2, %v7870_v43  ;;  %v3624_v49 = vrot.slane %v3623_v17, 4  ;;  %v3636_v55 = vrot.slane %v3634_v18, 5  ;;  %v3647_v50 = vrot.slane %v3645_v1, 4  ;;  %v3615_v25 = vsel %vm6606_vm3, %v3610_v48, %v3614_v32  ;;  %v5249_v48 = vld [vmem:[%s6570_s21 + $0x170] sm:$0xf] }
 0x162   : > { %5623 = vmatprep.mubr.msk.bf16.mxu1 %vm1392_vm2, %v4989_v61  ;;  %v3642_v26 = vrot.slane %v3640_v58, 5  ;;  %v3650_v20 = vrot.slane %v3648_v10, 5  ;;  %v3656_v28 = vrot.slane %v3654_v57, 5  ;;  %v5312_v59 = vcombine.low %v3601_v40, %v3615_v25  ;;  %v5251_v43 = vld [vmem:[%s6570_s21 + $0x178] sm:$0xf] }
 0x163   : > { %v3637_v62 = vor.u32 %v3636_v55, %v3633_v45  ;;  %v3661_v19 = vrot.slane %v3659_v12, 4  ;;  %v3662_v35 = vshll.u32 %v5239_v54, 16  ;;  %v3668_v6 = vshll.u32 %v5240_v41, 16 }
 0x164   : > { %v3651_v53 = vor.u32 %v3650_v20, %v3647_v50  ;;  %v3673_v13 = vshrl.u32 %v5241_v3, 16  ;;  %v3676_v36 = vshll.u32 %v5241_v3, 16  ;;  %5756 = vmatmul.mubr.msk.bf16.gmra.mrb[28].mxu0 %vm1392_vm2, %v5312_v59  ;;  %v3629_v61 = vsel %vm6606_vm3, %v3624_v49, %v3628_v60  ;;  %v5250_v49 = vld [vmem:[%s6570_s21 + $0x174] sm:$0x1] }
 0x165   : > { %v3638_v47 = vrot.slane %v3637_v62, 4  ;;  %v3664_v24 = vrot.slane %v3662_v35, 5  ;;  %v3687_v23 = vshrl.u32 %v5243_v37, 16  ;;  %v3682_v38 = vshll.u32 %v5242_v34, 16  ;;  %v5253_v34 = vld [vmem:[%s6570_s21 + $0x180] sm:$0xf] }
 0x166   : > { %v3652_v4 = vrot.slane %v3651_v53, 4  ;;  %v3675_v11 = vrot.slane %v3673_v13, 4  ;;  %v3678_v21 = vrot.slane %v3676_v36, 5  ;;  %v3670_v14 = vrot.slane %v3668_v6, 5 }
 0x167   : > { %v3643_v29 = vsel %vm6606_vm3, %v3638_v47, %v3642_v26  ;;  %v3665_v22 = vor.u32 %v3664_v24, %v3661_v19  ;;  %v3689_v9 = vrot.slane %v3687_v23, 4  ;;  %v3690_v0 = vshll.u32 %v5243_v37, 16  ;;  %v6149_v23 = vld [vmem:[%s6570_s21 + $0x178] sm:$0xf] }
 0x168   : > { %v5313_v5 = vcombine.low %v3629_v61, %v3643_v29  ;;  %v3657_v52 = vsel %vm6606_vm3, %v3652_v4, %v3656_v28  ;;  %v3679_v33 = vor.u32 %v3678_v21, %v3675_v11  ;;  %v7871_v51 = vcombine.low %v6950_v2, %v6955_v63  ;;  %v5248_v2 = vld [vmem:[%s6570_s21 + $0x164] sm:$0x1]  ;;  %v5252_v28 = vld [vmem:[%s6570_s21 + $0x17c] sm:$0x1]  ;;  %v5255_v61 = vld [vmem:[%s6570_s21 + $0x188] sm:$0xf] }
 0x169   : > { %v3666_v32 = vrot.slane %v3665_v22, 4  ;;  %v3696_v39 = vshll.u32 %v5244_v42, 16  ;;  %v3701_v7 = vshrl.u32 %v5245_v16, 16  ;;  %v3704_v54 = vshll.u32 %v5245_v16, 16  ;;  %v6150_v4 = vld [vmem:[%s6570_s21 + $0x180] sm:$0xf] }
 0x16a   : > { %5624 = vmatmul.mubr.msk.bf16.gmra.mrb[36].mxu1 %vm1392_vm2, %v7871_v51  ;;  %v7872_v31 = vcombine.low %v6972_v27, %v6976_v8  ;;  %5759 = vmatprep.mubr.msk.bf16.mxu0 %vm1392_vm2, %v5313_v5  ;;  %v3680_v40 = vrot.slane %v3679_v33, 4  ;;  %v3684_v44 = vrot.slane %v3682_v38, 5  ;;  %v3692_v45 = vrot.slane %v3690_v0, 5  ;;  %v5254_v21 = vld [vmem:[%s6570_s21 + $0x184] sm:$0x1] }
 0x16b   : > { %v3715_v63 = vshrl.u32 %v5247_v46, 16  ;;  %v3671_v17 = vsel %vm6606_vm3, %v3666_v32, %v3670_v14  ;;  %v3703_v18 = vrot.slane %v3701_v7, 4  ;;  %v3706_v58 = vrot.slane %v3704_v54, 5  ;;  %v5256_v5 = vld [vmem:[%s6570_s21 + $0x18c] sm:$0x1] }
 0x16c   : > { %5627 = vmatprep.mubr.msk.bf16.mxu1 %vm1392_vm2, %v7872_v31  ;;  %v3710_v1 = vshll.u32 %v5246_v15, 16  ;;  %v5314_v56 = vcombine.low %v3657_v52, %v3671_v17  ;;  %v3693_v27 = vor.u32 %v3692_v45, %v3689_v9  ;;  %v3698_v8 = vrot.slane %v3696_v39, 5  ;;  %v5257_v32 = vld [vmem:[%s6570_s21 + $0x190] sm:$0xf] }
 0x16d   : > { %v3707_v41 = vor.u32 %v3706_v58, %v3703_v18  ;;  %v3717_v10 = vrot.slane %v3715_v63, 4  ;;  %v3718_v57 = vshll.u32 %v5247_v46, 16  ;;  %v3724_v12 = vshll.u32 %v5248_v2, 16  ;;  %v6151_v63 = vld [vmem:[%s6570_s21 + $0x188] sm:$0xf] }
 0x16e   : > { %5760 = vmatmul.mubr.msk.bf16.gmra.mrb[32].mxu0 %vm1392_vm2, %v5314_v56  ;;  %v3685_v60 = vsel %vm6606_vm3, %v3680_v40, %v3684_v44  ;;  %v3694_v55 = vrot.slane %v3693_v27, 4  ;;  %v3729_v50 = vshrl.u32 %v5249_v48, 16  ;;  %v3732_v3 = vshll.u32 %v5249_v48, 16  ;;  %v5259_v40 = vld [vmem:[%s6570_s21 + $0x198] sm:$0xf] }
 0x16f   : > { %v3708_v25 = vrot.slane %v3707_v41, 4  ;;  %v3712_v26 = vrot.slane %v3710_v1, 5  ;;  %v3720_v20 = vrot.slane %v3718_v57, 5  ;;  %v3743_v37 = vshrl.u32 %v5251_v43, 16  ;;  %v6152_v17 = vld [vmem:[%s6570_s21 + $0x190] sm:$0xf] }
 0x170   : > { %v3699_v59 = vsel %vm6606_vm3, %v3694_v55, %v3698_v8  ;;  %v3731_v62 = vrot.slane %v3729_v50, 4  ;;  %v3734_v19 = vrot.slane %v3732_v3, 5  ;;  %v3738_v35 = vshll.u32 %v5250_v49, 16  ;;  %v5258_v58 = vld [vmem:[%s6570_s21 + $0x194] sm:$0x1] }
 0x171   : > { %v5315_v53 = vcombine.low %v3685_v60, %v3699_v59  ;;  %v3721_v6 = vor.u32 %v3720_v20, %v3717_v10  ;;  %v3726_v13 = vrot.slane %v3724_v12, 5  ;;  %v3745_v36 = vrot.slane %v3743_v37, 4  ;;  %v5260_v10 = vld [vmem:[%s6570_s21 + $0x19c] sm:$0x1]  ;;  %v5261_v50 = vld [vmem:[%s6570_s21 + $0x1a0] sm:$0xf] }
 0x172   : > { %v3735_v47 = vor.u32 %v3734_v19, %v3731_v62  ;;  %v3746_v24 = vshll.u32 %v5251_v43, 16  ;;  %v3752_v42 = vshll.u32 %v5252_v28, 16  ;;  %v4992_v11 = vcombine.low %v6149_v23, %v6150_v4  ;;  %v5263_v28 = vld [vmem:[%s6570_s21 + $0x1a8] sm:$0xf]  ;;  %v6153_v19 = vld [vmem:[%s6570_s21 + $0x198] sm:$0xf] }
 0x173   : > { %5763 = vmatprep.mubr.msk.bf16.mxu0 %vm1392_vm2, %v5315_v53  ;;  %v3713_v38 = vsel %vm6606_vm3, %v3708_v25, %v3712_v26  ;;  %v3722_v16 = vrot.slane %v3721_v6, 4  ;;  %v3757_v29 = vshrl.u32 %v5253_v34, 16  ;;  %v3760_v22 = vshll.u32 %v5253_v34, 16  ;;  %v5262_v53 = vld [vmem:[%s6570_s21 + $0x1a4] sm:$0x1] }
 0x174   : > { %v3736_v14 = vrot.slane %v3735_v47, 4  ;;  %v3740_v9 = vrot.slane %v3738_v35, 5  ;;  %v3748_v46 = vrot.slane %v3746_v24, 5  ;;  %5628 = vmatmul.mubr.msk.bf16.gmra.mrb[40].mxu1 %vm1392_vm2, %v4992_v11  ;;  %v3771_v52 = vshrl.u32 %v5255_v61, 16  ;;  %v6154_v35 = vld [vmem:[%s6570_s21 + $0x1a0] sm:$0xf] }
 0x175   : > { %v3727_v33 = vsel %vm6606_vm3, %v3722_v16, %v3726_v13  ;;  %v3759_v0 = vrot.slane %v3757_v29, 4  ;;  %v3762_v51 = vrot.slane %v3760_v22, 5  ;;  %v3766_v15 = vshll.u32 %v5254_v21, 16  ;;  %v5264_v23 = vld [vmem:[%s6570_s21 + $0x1ac] sm:$0x1] }
 0x176   : > { %v5316_v39 = vcombine.low %v3713_v38, %v3727_v33  ;;  %v3749_v7 = vor.u32 %v3748_v46, %v3745_v36  ;;  %v3754_v54 = vrot.slane %v3752_v42, 5  ;;  %v3773_v31 = vrot.slane %v3771_v52, 4  ;;  %v5265_v29 = vld [vmem:[%s6570_s21 + $0x1b8] sm:$0xf] }
 0x177   : > { %v3763_v44 = vor.u32 %v3762_v51, %v3759_v0  ;;  %v3774_v45 = vshll.u32 %v5255_v61, 16  ;;  %v3780_v2 = vshll.u32 %v5256_v5, 16  ;;  %v4993_v18 = vcombine.low %v6151_v63, %v6152_v17  ;;  %v5267_v5 = vld [vmem:[%s6570_s21 + $0x1c0] sm:$0xf]  ;;  %v6155_v51 = vld [vmem:[%s6570_s21 + $0x1b0] sm:$0xf] }
 0x178   : > { %5764 = vmatmul.mubr.msk.bf16.gmra.mrb[36].mxu0 %vm1392_vm2, %v5316_v39  ;;  %v3741_v1 = vsel %vm6606_vm3, %v3736_v14, %v3740_v9  ;;  %v3750_v48 = vrot.slane %v3749_v7, 4  ;;  %v3785_v56 = vshrl.u32 %v5257_v32, 16  ;;  %v3788_v27 = vshll.u32 %v5257_v32, 16  ;;  %v5266_v39 = vld [vmem:[%s6570_s21 + $0x1bc] sm:$0x1] }
 0x179   : > { %v3764_v8 = vrot.slane %v3763_v44, 4  ;;  %v3768_v43 = vrot.slane %v3766_v15, 5  ;;  %v3776_v41 = vrot.slane %v3774_v45, 5  ;;  %5631 = vmatprep.mubr.msk.bf16.mxu1 %vm1392_vm2, %v4993_v18  ;;  %v3799_v57 = vshrl.u32 %v5259_v40, 16  ;;  %v6156_v15 = vld [vmem:[%s6570_s21 + $0x1b8] sm:$0xf] }
 0x17a   : > { %v3755_v12 = vsel %vm6606_vm3, %v3750_v48, %v3754_v54  ;;  %v3787_v49 = vrot.slane %v3785_v56, 4  ;;  %v3790_v60 = vrot.slane %v3788_v27, 5  ;;  %v3794_v55 = vshll.u32 %v5258_v58, 16  ;;  %v5268_v63 = vld [vmem:[%s6570_s21 + $0x1c4] sm:$0x1] }
 0x17b   : > { %v5317_v3 = vcombine.low %v3741_v1, %v3755_v12  ;;  %v3777_v25 = vor.u32 %v3776_v41, %v3773_v31  ;;  %v3782_v26 = vrot.slane %v3780_v2, 5  ;;  %v3801_v20 = vrot.slane %v3799_v57, 4  ;;  %v5269_v56 = vld [vmem:[%s6570_s21 + $0x1c8] sm:$0xf] }
 0x17c   : > { %v3791_v37 = vor.u32 %v3790_v60, %v3787_v49  ;;  %v3802_v59 = vshll.u32 %v5259_v40, 16  ;;  %v3808_v62 = vshll.u32 %v5260_v10, 16  ;;  %v4994_v34 = vcombine.low %v6153_v19, %v6154_v35  ;;  %v5271_v10 = vld [vmem:[%s6570_s21 + $0x1d0] sm:$0xf]  ;;  %v6157_v60 = vld [vmem:[%s6570_s21 + $0x1c0] sm:$0xf] }
 0x17d   : > { %5767 = vmatprep.mubr.msk.bf16.mxu0 %vm1392_vm2, %v5317_v3  ;;  %v3769_v6 = vsel %vm6606_vm3, %v3764_v8, %v3768_v43  ;;  %v3778_v13 = vrot.slane %v3777_v25, 4  ;;  %v3813_v36 = vshrl.u32 %v5261_v50, 16  ;;  %v3816_v61 = vshll.u32 %v5261_v50, 16  ;;  %v5270_v3 = vld [vmem:[%s6570_s21 + $0x1cc] sm:$0x1] }
 0x17e   : > { %v3792_v47 = vrot.slane %v3791_v37, 4  ;;  %v3796_v24 = vrot.slane %v3794_v55, 5  ;;  %v3804_v42 = vrot.slane %v3802_v59, 5  ;;  %5632 = vmatmul.mubr.msk.bf16.gmra.mrb[44].mxu1 %vm1392_vm2, %v4994_v34  ;;  %v3827_v4 = vshrl.u32 %v5263_v28, 16  ;;  %v6158_v55 = vld [vmem:[%s6570_s21 + $0x1c8] sm:$0xf] }
 0x17f   : > { %v3783_v11 = vsel %vm6606_vm3, %v3778_v13, %v3782_v26  ;;  %v3815_v21 = vrot.slane %v3813_v36, 4  ;;  %v3818_v38 = vrot.slane %v3816_v61, 5  ;;  %v3822_v16 = vshll.u32 %v5262_v53, 16  ;;  %v5272_v19 = vld [vmem:[%s6570_s21 + $0x1d4] sm:$0x1] }
 0x180   : > { %v5318_v22 = vcombine.low %v3769_v6, %v3783_v11  ;;  %v3805_v14 = vor.u32 %v3804_v42, %v3801_v20  ;;  %v3810_v9 = vrot.slane %v3808_v62, 5  ;;  %v3829_v46 = vrot.slane %v3827_v4, 4  ;;  %v5273_v36 = vld [vmem:[%s6570_s21 + $0x1d8] sm:$0xf] }
 0x181   : > { %v3819_v52 = vor.u32 %v3818_v38, %v3815_v21  ;;  %v3830_v33 = vshll.u32 %v5263_v28, 16  ;;  %v3836_v0 = vshll.u32 %v5264_v23, 16  ;;  %v4995_v32 = vcombine.low %v6155_v51, %v6156_v15  ;;  %v5275_v23 = vld [vmem:[%s6570_s21 + $0x1e0] sm:$0xf]  ;;  %v6159_v38 = vld [vmem:[%s6570_s21 + $0x1d0] sm:$0xf] }
 0x182   : > { %5768 = vmatmul.mubr.msk.bf16.gmra.mrb[40].mxu0 %vm1392_vm2, %v5318_v22  ;;  %v3797_v7 = vsel %vm6606_vm3, %v3792_v47, %v3796_v24  ;;  %v3806_v54 = vrot.slane %v3805_v14, 4  ;;  %v3841_v31 = vshrl.u32 %v5265_v29, 16  ;;  %v3844_v40 = vshll.u32 %v5265_v29, 16  ;;  %v5274_v22 = vld [vmem:[%s6570_s21 + $0x1dc] sm:$0x1] }
 0x183   : > { %v3820_v44 = vrot.slane %v3819_v52, 4  ;;  %v3824_v45 = vrot.slane %v3822_v16, 5  ;;  %v3832_v2 = vrot.slane %v3830_v33, 5  ;;  %5635 = vmatprep.mubr.msk.bf16.mxu1 %vm1392_vm2, %v4995_v32  ;;  %v3855_v17 = vshrl.u32 %v5267_v5, 16  ;;  %v6160_v16 = vld [vmem:[%s6570_s21 + $0x1d8] sm:$0xf] }
 0x184   : > { %v3811_v18 = vsel %vm6606_vm3, %v3806_v54, %v3810_v9  ;;  %v3843_v58 = vrot.slane %v3841_v31, 4  ;;  %v3846_v1 = vrot.slane %v3844_v40, 5  ;;  %v3850_v48 = vshll.u32 %v5266_v39, 16  ;;  %v5276_v51 = vld [vmem:[%s6570_s21 + $0x1e4] sm:$0x1] }
 0x185   : > { %v5319_v27 = vcombine.low %v3797_v7, %v3811_v18  ;;  %v3833_v8 = vor.u32 %v3832_v2, %v3829_v46  ;;  %v3838_v43 = vrot.slane %v3836_v0, 5  ;;  %v3857_v41 = vrot.slane %v3855_v17, 4  ;;  %v5277_v31 = vld [vmem:[%s6570_s21 + $0x1e8] sm:$0xf] }
 0x186   : > { %v3847_v57 = vor.u32 %v3846_v1, %v3843_v58  ;;  %v3858_v12 = vshll.u32 %v5267_v5, 16  ;;  %v3864_v49 = vshll.u32 %v5268_v63, 16  ;;  %v4996_v50 = vcombine.low %v6157_v60, %v6158_v55  ;;  %v5279_v63 = vld [vmem:[%s6570_s21 + $0x1f0] sm:$0xf]  ;;  %v6161_v1 = vld [vmem:[%s6570_s21 + $0x1e0] sm:$0xf] }
 0x187   : > { %5771 = vmatprep.mubr.msk.bf16.mxu0 %vm1392_vm2, %v5319_v27  ;;  %v3825_v25 = vsel %vm6606_vm3, %v3820_v44, %v3824_v45  ;;  %v3834_v26 = vrot.slane %v3833_v8, 4  ;;  %v3869_v20 = vshrl.u32 %v5269_v56, 16  ;;  %v3872_v28 = vshll.u32 %v5269_v56, 16  ;;  %v5278_v27 = vld [vmem:[%s6570_s21 + $0x1ec] sm:$0x1] }
 0x188   : > { %v3848_v37 = vrot.slane %v3847_v57, 4  ;;  %v3852_v59 = vrot.slane %v3850_v48, 5  ;;  %v3860_v62 = vrot.slane %v3858_v12, 5  ;;  %5636 = vmatmul.mubr.msk.bf16.gmra.mrb[48].mxu1 %vm1392_vm2, %v4996_v50  ;;  %v3883_v35 = vshrl.u32 %v5271_v10, 16  ;;  %v6162_v48 = vld [vmem:[%s6570_s21 + $0x1e8] sm:$0xf] }
 0x189   : > { %v3839_v34 = vsel %vm6606_vm3, %v3834_v26, %v3838_v43  ;;  %v3871_v53 = vrot.slane %v3869_v20, 4  ;;  %v3874_v6 = vrot.slane %v3872_v28, 5  ;;  %v3878_v13 = vshll.u32 %v5270_v3, 16  ;;  %v5280_v60 = vld [vmem:[%s6570_s21 + $0x1f4] sm:$0x1] }
 0x18a   : > { %v5320_v61 = vcombine.low %v3825_v25, %v3839_v34  ;;  %v3861_v47 = vor.u32 %v3860_v62, %v3857_v41  ;;  %v3866_v24 = vrot.slane %v3864_v49, 5  ;;  %v3885_v42 = vrot.slane %v3883_v35, 4  ;;  %v5281_v20 = vld [vmem:[%s6570_s21 + $0x200] sm:$0xf] }
 0x18b   : > { %v3875_v4 = vor.u32 %v3874_v6, %v3871_v53  ;;  %v3886_v11 = vshll.u32 %v5271_v10, 16  ;;  %v3892_v21 = vshll.u32 %v5272_v19, 16  ;;  %v4997_v29 = vcombine.low %v6159_v38, %v6160_v16  ;;  %v5283_v19 = vld [vmem:[%s6570_s21 + $0x208] sm:$0xf]  ;;  %v6163_v6 = vld [vmem:[%s6570_s21 + $0x1f8] sm:$0xf] }
 0x18c   : > { %5772 = vmatmul.mubr.msk.bf16.gmra.mrb[44].mxu0 %vm1392_vm2, %v5320_v61  ;;  %v3853_v14 = vsel %vm6606_vm3, %v3848_v37, %v3852_v59  ;;  %v3862_v9 = vrot.slane %v3861_v47, 4  ;;  %v3897_v46 = vshrl.u32 %v5273_v36, 16  ;;  %v3900_v5 = vshll.u32 %v5273_v36, 16  ;;  %v5282_v61 = vld [vmem:[%s6570_s21 + $0x204] sm:$0x1] }
 0x18d   : > { %v3876_v52 = vrot.slane %v3875_v4, 4  ;;  %v3880_v33 = vrot.slane %v3878_v13, 5  ;;  %v3888_v0 = vrot.slane %v3886_v11, 5  ;;  %5639 = vmatprep.mubr.msk.bf16.mxu1 %vm1392_vm2, %v4997_v29  ;;  %v3911_v15 = vshrl.u32 %v5275_v23, 16  ;;  %v6164_v13 = vld [vmem:[%s6570_s21 + $0x200] sm:$0xf] }
 0x18e   : > { %v3867_v32 = vsel %vm6606_vm3, %v3862_v9, %v3866_v24  ;;  %v3899_v39 = vrot.slane %v3897_v46, 4  ;;  %v3902_v7 = vrot.slane %v3900_v5, 5  ;;  %v3906_v54 = vshll.u32 %v5274_v22, 16  ;;  %v5284_v38 = vld [vmem:[%s6570_s21 + $0x20c] sm:$0x1] }
 0x18f   : > { %v5321_v40 = vcombine.low %v3853_v14, %v3867_v32  ;;  %v3889_v44 = vor.u32 %v3888_v0, %v3885_v42  ;;  %v3894_v45 = vrot.slane %v3892_v21, 5  ;;  %v3913_v2 = vrot.slane %v3911_v15, 4  ;;  %v5285_v46 = vld [vmem:[%s6570_s21 + $0x210] sm:$0xf] }
 0x190   : > { %v3903_v17 = vor.u32 %v3902_v7, %v3899_v39  ;;  %v3914_v18 = vshll.u32 %v5275_v23, 16  ;;  %v3920_v58 = vshll.u32 %v5276_v51, 16  ;;  %v4998_v56 = vcombine.low %v6161_v1, %v6162_v48  ;;  %v5287_v51 = vld [vmem:[%s6570_s21 + $0x218] sm:$0xf]  ;;  %v6165_v7 = vld [vmem:[%s6570_s21 + $0x208] sm:$0xf] }
 0x191   : > { %5775 = vmatprep.mubr.msk.bf16.mxu0 %vm1392_vm2, %v5321_v40  ;;  %v3881_v8 = vsel %vm6606_vm3, %v3876_v52, %v3880_v33  ;;  %v3890_v43 = vrot.slane %v3889_v44, 4  ;;  %v3925_v41 = vshrl.u32 %v5277_v31, 16  ;;  %v3928_v10 = vshll.u32 %v5277_v31, 16  ;;  %v5286_v40 = vld [vmem:[%s6570_s21 + $0x214] sm:$0x1] }
 0x192   : > { %v3904_v57 = vrot.slane %v3903_v17, 4  ;;  %v3908_v12 = vrot.slane %v3906_v54, 5  ;;  %v3916_v49 = vrot.slane %v3914_v18, 5  ;;  %5640 = vmatmul.mubr.msk.bf16.gmra.mrb[52].mxu1 %vm1392_vm2, %v4998_v56  ;;  %v3939_v55 = vshrl.u32 %v5279_v63, 16  ;;  %v6166_v54 = vld [vmem:[%s6570_s21 + $0x210] sm:$0xf] }
 0x193   : > { %v3895_v50 = vsel %vm6606_vm3, %v3890_v43, %v3894_v45  ;;  %v3927_v3 = vrot.slane %v3925_v41, 4  ;;  %v3930_v25 = vrot.slane %v3928_v10, 5  ;;  %v3934_v26 = vshll.u32 %v5278_v27, 16  ;;  %v5288_v1 = vld [vmem:[%s6570_s21 + $0x21c] sm:$0x1] }
 0x194   : > { %v5322_v28 = vcombine.low %v3881_v8, %v3895_v50  ;;  %v3917_v37 = vor.u32 %v3916_v49, %v3913_v2  ;;  %v3922_v59 = vrot.slane %v3920_v58, 5  ;;  %v3941_v62 = vrot.slane %v3939_v55, 4  ;;  %v5289_v41 = vld [vmem:[%s6570_s21 + $0x220] sm:$0xf] }
 0x195   : > { %v3931_v35 = vor.u32 %v3930_v25, %v3927_v3  ;;  %v3942_v34 = vshll.u32 %v5279_v63, 16  ;;  %v3948_v53 = vshll.u32 %v5280_v60, 16  ;;  %v4999_v36 = vcombine.low %v6163_v6, %v6164_v13  ;;  %v5291_v60 = vld [vmem:[%s6570_s21 + $0x228] sm:$0xf]  ;;  %v6167_v25 = vld [vmem:[%s6570_s21 + $0x218] sm:$0xf] }
 0x196   : > { %5776 = vmatmul.mubr.msk.bf16.gmra.mrb[48].mxu0 %vm1392_vm2, %v5322_v28  ;;  %v3909_v47 = vsel %vm6606_vm3, %v3904_v57, %v3908_v12  ;;  %v3918_v24 = vrot.slane %v3917_v37, 4  ;;  %v3953_v42 = vshrl.u32 %v5281_v20, 16  ;;  %v3956_v23 = vshll.u32 %v5281_v20, 16  ;;  %v5290_v28 = vld [vmem:[%s6570_s21 + $0x224] sm:$0x1] }
 0x197   : > { %v3932_v4 = vrot.slane %v3931_v35, 4  ;;  %v3936_v11 = vrot.slane %v3934_v26, 5  ;;  %v3944_v21 = vrot.slane %v3942_v34, 5  ;;  %5643 = vmatprep.mubr.msk.bf16.mxu1 %vm1392_vm2, %v4999_v36  ;;  %v3967_v16 = vshrl.u32 %v5283_v19, 16  ;;  %v6168_v26 = vld [vmem:[%s6570_s21 + $0x220] sm:$0xf] }
 0x198   : > { %v3923_v29 = vsel %vm6606_vm3, %v3918_v24, %v3922_v59  ;;  %v3955_v22 = vrot.slane %v3953_v42, 4  ;;  %v3958_v14 = vrot.slane %v3956_v23, 5  ;;  %v3962_v9 = vshll.u32 %v5282_v61, 16  ;;  %v5292_v6 = vld [vmem:[%s6570_s21 + $0x22c] sm:$0x1] }
 0x199   : > { %v5323_v5 = vcombine.low %v3909_v47, %v3923_v29  ;;  %v3945_v52 = vor.u32 %v3944_v21, %v3941_v62  ;;  %v3950_v33 = vrot.slane %v3948_v53, 5  ;;  %v3969_v0 = vrot.slane %v3967_v16, 4  ;;  %v5293_v42 = vld [vmem:[%s6570_s21 + $0x230] sm:$0xf] }
 0x19a   : > { %v3959_v15 = vor.u32 %v3958_v14, %v3955_v22  ;;  %v3970_v32 = vshll.u32 %v5283_v19, 16  ;;  %v3976_v39 = vshll.u32 %v5284_v38, 16  ;;  %v5000_v31 = vcombine.low %v6165_v7, %v6166_v54  ;;  %v5295_v38 = vld [vmem:[%s6570_s21 + $0x238] sm:$0xf]  ;;  %v6169_v14 = vld [vmem:[%s6570_s21 + $0x228] sm:$0xf] }
 0x19b   : > { %5779 = vmatprep.mubr.msk.bf16.mxu0 %vm1392_vm2, %v5323_v5  ;;  %v3937_v44 = vsel %vm6606_vm3, %v3932_v4, %v3936_v11  ;;  %v3946_v45 = vrot.slane %v3945_v52, 4  ;;  %v3981_v2 = vshrl.u32 %v5285_v46, 16  ;;  %v3984_v63 = vshll.u32 %v5285_v46, 16  ;;  %v5294_v5 = vld [vmem:[%s6570_s21 + $0x234] sm:$0x1] }
 0x19c   : > { %v3960_v17 = vrot.slane %v3959_v15, 4  ;;  %v3964_v18 = vrot.slane %v3962_v9, 5  ;;  %v3972_v58 = vrot.slane %v3970_v32, 5  ;;  %5644 = vmatmul.mubr.msk.bf16.gmra.mrb[56].mxu1 %vm1392_vm2, %v5000_v31  ;;  %v3995_v48 = vshrl.u32 %v5287_v51, 16  ;;  %v6170_v9 = vld [vmem:[%s6570_s21 + $0x230] sm:$0xf] }
 0x19d   : > { %v3951_v56 = vsel %vm6606_vm3, %v3946_v45, %v3950_v33  ;;  %v3983_v27 = vrot.slane %v3981_v2, 4  ;;  %v3986_v8 = vrot.slane %v3984_v63, 5  ;;  %v3990_v43 = vshll.u32 %v5286_v40, 16  ;;  %v5296_v7 = vld [vmem:[%s6570_s21 + $0x23c] sm:$0x1] }
 0x19e   : > { %v5324_v10 = vcombine.low %v3937_v44, %v3951_v56  ;;  %v3973_v57 = vor.u32 %v3972_v58, %v3969_v0  ;;  %v3978_v12 = vrot.slane %v3976_v39, 5  ;;  %v3997_v49 = vrot.slane %v3995_v48, 4 }
 0x19f   : > { %v3987_v55 = vor.u32 %v3986_v8, %v3983_v27  ;;  %v3998_v50 = vshll.u32 %v5287_v51, 16  ;;  %v4004_v3 = vshll.u32 %v5288_v1, 16  ;;  %v5001_v20 = vcombine.low %v6167_v25, %v6168_v26 }
 0x1a0   : > { %5780 = vmatmul.mubr.msk.bf16.gmra.mrb[52].mxu0 %vm1392_vm2, %v5324_v10  ;;  %v3965_v37 = vsel %vm6606_vm3, %v3960_v17, %v3964_v18  ;;  %v3974_v59 = vrot.slane %v3973_v57, 4  ;;  %v4009_v62 = vshrl.u32 %v5289_v41, 16  ;;  %v4012_v19 = vshll.u32 %v5289_v41, 16 }
 0x1a1   : > { %v3988_v35 = vrot.slane %v3987_v55, 4  ;;  %v3992_v34 = vrot.slane %v3990_v43, 5  ;;  %v4000_v53 = vrot.slane %v3998_v50, 5  ;;  %5647 = vmatprep.mubr.msk.bf16.mxu1 %vm1392_vm2, %v5001_v20  ;;  %v4023_v13 = vshrl.u32 %v5291_v60, 16 }
 0x1a2   : > { %v3979_v36 = vsel %vm6606_vm3, %v3974_v59, %v3978_v12  ;;  %v4011_v61 = vrot.slane %v4009_v62, 4  ;;  %v4014_v47 = vrot.slane %v4012_v19, 5  ;;  %v4018_v24 = vshll.u32 %v5290_v28, 16  ;;  %v7554_v28 = vld [vmem:[#allocation7] ss:$0 sm:$0xff] }
 0x1a3   : > { %v5325_v23 = vcombine.low %v3965_v37, %v3979_v36  ;;  %v4001_v4 = vor.u32 %v4000_v53, %v3997_v49  ;;  %v4006_v11 = vrot.slane %v4004_v3, 5  ;;  %v4025_v21 = vrot.slane %v4023_v13, 4 }
 0x1a4   : > { %v4015_v16 = vor.u32 %v4014_v47, %v4011_v61  ;;  %v4026_v29 = vshll.u32 %v5291_v60, 16  ;;  %v4032_v22 = vshll.u32 %v5292_v6, 16  ;;  %v5002_v46 = vcombine.low %v6169_v14, %v6170_v9 }
 0x1a5   : > { %5783 = vmatprep.mubr.msk.bf16.mxu0 %vm1392_vm2, %v5325_v23  ;;  %v3993_v52 = vsel %vm6606_vm3, %v3988_v35, %v3992_v34  ;;  %v4002_v33 = vrot.slane %v4001_v4, 4  ;;  %v4037_v0 = vshrl.u32 %v5293_v42, 16  ;;  %v4040_v51 = vshll.u32 %v5293_v42, 16 }
 0x1a6   : > { %v4016_v15 = vrot.slane %v4015_v16, 4  ;;  %v4020_v32 = vrot.slane %v4018_v24, 5  ;;  %v4028_v39 = vrot.slane %v4026_v29, 5  ;;  %5648 = vmatmul.mubr.msk.bf16.gmra.mrb[60].mxu1 %vm1392_vm2, %v5002_v46  ;;  %v4051_v54 = vshrl.u32 %v5295_v38, 16 }
 0x1a7   : > { %v4007_v31 = vsel %vm6606_vm3, %v4002_v33, %v4006_v11  ;;  %v4039_v40 = vrot.slane %v4037_v0, 4  ;;  %v4042_v44 = vrot.slane %v4040_v51, 5  ;;  %v4046_v45 = vshll.u32 %v5294_v5, 16 }
 0x1a8   : > { %v5326_v2 = vcombine.low %v3993_v52, %v4007_v31  ;;  %v4029_v63 = vor.u32 %v4028_v39, %v4025_v21  ;;  %v4034_v17 = vrot.slane %v4032_v22, 5  ;;  %v4053_v58 = vrot.slane %v4051_v54, 4 }
 0x1a9   : > { %v4043_v18 = vor.u32 %v4042_v44, %v4039_v40  ;;  %v4054_v1 = vshll.u32 %v5295_v38, 16  ;;  %v4060_v48 = vshll.u32 %v5296_v7, 16  ;;  %v4021_v56 = vsel %vm6606_vm3, %v4016_v15, %v4020_v32 }
 0x1aa   : > { %5784 = vmatmul.mubr.msk.bf16.gmra.mrb[56].mxu0 %vm1392_vm2, %v5326_v2  ;;  %v4030_v27 = vrot.slane %v4029_v63, 4  ;;  %v4048_v43 = vrot.slane %v4046_v45, 5  ;;  %vm4705_vm4 = vcmask 31744  }
 0x1ab   : > { %v4044_v8 = vrot.slane %v4043_v18, 4  ;;  %v4056_v41 = vrot.slane %v4054_v1, 5  ;;  %v4062_v49 = vrot.slane %v4060_v48, 5 }
 0x1ac   : > { %v4035_v10 = vsel %vm6606_vm3, %v4030_v27, %v4034_v17 }
 0x1ad   : > { %v5327_v57 = vcombine.low %v4021_v56, %v4035_v10  ;;  %v4057_v12 = vor.u32 %v4056_v41, %v4053_v58  ;;  %v4049_v60 = vsel %vm6606_vm3, %v4044_v8, %v4048_v43 }
 0x1af   : > { %5787 = vmatprep.mubr.msk.bf16.mxu0 %vm1392_vm2, %v5327_v57  ;;  %v4058_v55 = vrot.slane %v4057_v12, 4 }
 0x1b1   : > { %v4063_v50 = vsel %vm6606_vm3, %v4058_v55, %v4062_v49 }
 0x1b2   : > { %v5328_v3 = vcombine.low %v4049_v60, %v4063_v50 }
 0x1b4   : > { %5788 = vmatmul.mubr.msk.bf16.gmra.mrb[60].mxu0 %vm1392_vm2, %v5328_v3 }
 0x1f0   : > { %v5589_v25 = vpop.f32.mrb[0].mxu1 }
 0x1f1   : > { %v2086_v26 = vpop.f32.mrb[1].mxu1  ;;  %v5729_v20 = vpop.f32.mrb[0].mxu0 }
 0x1f2   : > { %v5590_v37 = vpop.f32.mrb[2].mxu1  ;;  %v5791_v59 = vadd.f32 %v5729_v20, %v5589_v25  ;;  %v4315_v62 = vpop.f32.mrb[1].mxu0 }
 0x1f3   : > { %v2089_v19 = vpop.f32.mrb[3].mxu1  ;;  %v5792_v35 = vadd.f32 %v4315_v62, %v2086_v26  ;;  %v5730_v34 = vpop.f32.mrb[2].mxu0 }
 0x1f4   : > { %v4643_v53 = vadd.f32 %v5791_v59, %v7554_v28  ;;  %v5793_v30 = vadd.f32 %v5730_v34, %v5590_v37  ;;  %v4318_v6 = vpop.f32.mrb[3].mxu0 }
 0x1f5   : > { %v4641_v13 = vadd.f32 %v5792_v35, %v7554_v28  ;;  %v5794_v36 = vadd.f32 %v4318_v6, %v2089_v19 }
 0x1f6   : > { %4708 = vst.msk [vmem:[%s7558_s22 + $0x10] sm:$0xff] %vm4705_vm4, %v4643_v53  ;;  %v4644_v61 = vadd.f32 %v5793_v30, %v7554_v28 }
 0x1f7   : > { %4706 = vst.msk [vmem:[%s7558_s22] sm:$0xff] %vm4705_vm4, %v4641_v13  ;;  %v4642_v47 = vadd.f32 %v5794_v36, %v7554_v28 }
 0x1f8   : > { %4709 = vst.msk [vmem:[%s7558_s22 + $0x18] sm:$0xff] %vm4705_vm4, %v4644_v61 }
 0x1f9   : > { %v5593_v24 = vpop.f32.mrb[4].mxu1  ;;  %4707 = vst.msk [vmem:[%s7558_s22 + $0x8] sm:$0xff] %vm4705_vm4, %v4642_v47 }
 0x1fa   : > { %v2102_v42 = vpop.f32.mrb[5].mxu1 }
 0x1fb   : > { %v5594_v23 = vpop.f32.mrb[6].mxu1  ;;  %v5733_v11 = vpop.f32.mrb[4].mxu0 }
 0x1fc   : > { %v2105_v4 = vpop.f32.mrb[7].mxu1  ;;  %v5795_v21 = vadd.f32 %v5733_v11, %v5593_v24  ;;  %v4331_v38 = vpop.f32.mrb[5].mxu0 }
 0x1fd   : > { %v5796_v16 = vadd.f32 %v4331_v38, %v2102_v42  ;;  %v5734_v29 = vpop.f32.mrb[6].mxu0 }
 0x1fe   : > { %v4647_v22 = vadd.f32 %v5795_v21, %v7554_v28  ;;  %v5797_v14 = vadd.f32 %v5734_v29, %v5594_v23  ;;  %v4334_v9 = vpop.f32.mrb[7].mxu0 }
 0x1ff   : > { %v4645_v46 = vadd.f32 %v5796_v16, %v7554_v28  ;;  %v5798_v5 = vadd.f32 %v4334_v9, %v2105_v4 }
 0x200   : > { %4712 = vst.msk [vmem:[%s7558_s22 + $0x30] sm:$0xff] %vm4705_vm4, %v4647_v22  ;;  %v4648_v33 = vadd.f32 %v5797_v14, %v7554_v28 }
 0x201   : > { %v5597_v52 = vpop.f32.mrb[8].mxu1  ;;  %4710 = vst.msk [vmem:[%s7558_s22 + $0x20] sm:$0xff] %vm4705_vm4, %v4645_v46  ;;  %v4646_v51 = vadd.f32 %v5798_v5, %v7554_v28 }
 0x202   : > { %v2118_v0 = vpop.f32.mrb[9].mxu1  ;;  %4713 = vst.msk [vmem:[%s7558_s22 + $0x38] sm:$0xff] %vm4705_vm4, %v4648_v33 }
 0x203   : > { %v5598_v15 = vpop.f32.mrb[10].mxu1  ;;  %4711 = vst.msk [vmem:[%s7558_s22 + $0x28] sm:$0xff] %vm4705_vm4, %v4646_v51 }
 0x204   : > { %v2121_v32 = vpop.f32.mrb[11].mxu1 }
 0x205   : > { %v5737_v39 = vpop.f32.mrb[8].mxu0 }
 0x206   : > { %v5799_v7 = vadd.f32 %v5737_v39, %v5597_v52  ;;  %v4347_v54 = vpop.f32.mrb[9].mxu0 }
 0x207   : > { %v5800_v31 = vadd.f32 %v4347_v54, %v2118_v0  ;;  %v5738_v40 = vpop.f32.mrb[10].mxu0 }
 0x208   : > { %v4651_v44 = vadd.f32 %v5799_v7, %v7554_v28  ;;  %v5801_v45 = vadd.f32 %v5738_v40, %v5598_v15  ;;  %v4350_v2 = vpop.f32.mrb[11].mxu0 }
 0x209   : > { %v4649_v17 = vadd.f32 %v5800_v31, %v7554_v28  ;;  %v5802_v18 = vadd.f32 %v4350_v2, %v2121_v32 }
 0x20a   : > { %v5601_v63 = vpop.f32.mrb[12].mxu1  ;;  %4716 = vst.msk [vmem:[%s7558_s22 + $0x50] sm:$0xff] %vm4705_vm4, %v4651_v44  ;;  %v4652_v1 = vadd.f32 %v5801_v45, %v7554_v28 }
 0x20b   : > { %v2134_v58 = vpop.f32.mrb[13].mxu1  ;;  %4714 = vst.msk [vmem:[%s7558_s22 + $0x40] sm:$0xff] %vm4705_vm4, %v4649_v17  ;;  %v4650_v56 = vadd.f32 %v5802_v18, %v7554_v28 }
 0x20c   : > { %v5602_v48 = vpop.f32.mrb[14].mxu1  ;;  %4717 = vst.msk [vmem:[%s7558_s22 + $0x58] sm:$0xff] %vm4705_vm4, %v4652_v1 }
 0x20d   : > { %v2137_v27 = vpop.f32.mrb[15].mxu1  ;;  %4715 = vst.msk [vmem:[%s7558_s22 + $0x48] sm:$0xff] %vm4705_vm4, %v4650_v56 }
 0x20f   : > { %v5741_v8 = vpop.f32.mrb[12].mxu0 }
 0x210   : > { %v5803_v43 = vadd.f32 %v5741_v8, %v5601_v63  ;;  %v4363_v41 = vpop.f32.mrb[13].mxu0 }
 0x211   : > { %v5804_v57 = vadd.f32 %v4363_v41, %v2134_v58  ;;  %v5742_v12 = vpop.f32.mrb[14].mxu0 }
 0x212   : > { %v5605_v10 = vpop.f32.mrb[16].mxu1  ;;  %v4655_v60 = vadd.f32 %v5803_v43, %v7554_v28  ;;  %v5805_v55 = vadd.f32 %v5742_v12, %v5602_v48  ;;  %v4366_v50 = vpop.f32.mrb[15].mxu0 }
 0x213   : > { %v2150_v49 = vpop.f32.mrb[17].mxu1  ;;  %v4653_v25 = vadd.f32 %v5804_v57, %v7554_v28  ;;  %v5806_v26 = vadd.f32 %v4366_v50, %v2137_v27 }
 0x214   : > { %v5606_v3 = vpop.f32.mrb[18].mxu1  ;;  %4720 = vst.msk [vmem:[%s7558_s22 + $0x70] sm:$0xff] %vm4705_vm4, %v4655_v60  ;;  %v4656_v37 = vadd.f32 %v5805_v55, %v7554_v28 }
 0x215   : > { %v2153_v20 = vpop.f32.mrb[19].mxu1  ;;  %4718 = vst.msk [vmem:[%s7558_s22 + $0x60] sm:$0xff] %vm4705_vm4, %v4653_v25  ;;  %v4654_v59 = vadd.f32 %v5806_v26, %v7554_v28 }
 0x216   : > { %4721 = vst.msk [vmem:[%s7558_s22 + $0x78] sm:$0xff] %vm4705_vm4, %v4656_v37 }
 0x217   : > { %4719 = vst.msk [vmem:[%s7558_s22 + $0x68] sm:$0xff] %vm4705_vm4, %v4654_v59 }
 0x219   : > { %v5745_v62 = vpop.f32.mrb[16].mxu0 }
 0x21a   : > { %v5807_v35 = vadd.f32 %v5745_v62, %v5605_v10  ;;  %v4379_v34 = vpop.f32.mrb[17].mxu0 }
 0x21b   : > { %v5609_v19 = vpop.f32.mrb[20].mxu1  ;;  %v5808_v30 = vadd.f32 %v4379_v34, %v2150_v49  ;;  %v5746_v6 = vpop.f32.mrb[18].mxu0 }
 0x21c   : > { %v2166_v53 = vpop.f32.mrb[21].mxu1  ;;  %v4659_v36 = vadd.f32 %v5807_v35, %v7554_v28  ;;  %v5809_v61 = vadd.f32 %v5746_v6, %v5606_v3  ;;  %v4382_v47 = vpop.f32.mrb[19].mxu0 }
 0x21d   : > { %v5610_v13 = vpop.f32.mrb[22].mxu1  ;;  %v4657_v42 = vadd.f32 %v5808_v30, %v7554_v28  ;;  %v5810_v23 = vadd.f32 %v4382_v47, %v2153_v20 }
 0x21e   : > { %v2169_v24 = vpop.f32.mrb[23].mxu1  ;;  %4724 = vst.msk [vmem:[%s7558_s22 + $0x90] sm:$0xff] %vm4705_vm4, %v4659_v36  ;;  %v4660_v4 = vadd.f32 %v5809_v61, %v7554_v28 }
 0x21f   : > { %4722 = vst.msk [vmem:[%s7558_s22 + $0x80] sm:$0xff] %vm4705_vm4, %v4657_v42  ;;  %v4658_v11 = vadd.f32 %v5810_v23, %v7554_v28 }
 0x220   : > { %4725 = vst.msk [vmem:[%s7558_s22 + $0x98] sm:$0xff] %vm4705_vm4, %v4660_v4 }
 0x221   : > { %4723 = vst.msk [vmem:[%s7558_s22 + $0x88] sm:$0xff] %vm4705_vm4, %v4658_v11 }
 0x223   : > { %v5749_v16 = vpop.f32.mrb[20].mxu0 }
 0x224   : > { %v5613_v21 = vpop.f32.mrb[24].mxu1  ;;  %v5811_v22 = vadd.f32 %v5749_v16, %v5609_v19  ;;  %v4395_v14 = vpop.f32.mrb[21].mxu0 }
 0x225   : > { %v2182_v38 = vpop.f32.mrb[25].mxu1  ;;  %v5812_v46 = vadd.f32 %v4395_v14, %v2166_v53  ;;  %v5750_v5 = vpop.f32.mrb[22].mxu0 }
 0x226   : > { %v5614_v29 = vpop.f32.mrb[26].mxu1  ;;  %v4663_v52 = vadd.f32 %v5811_v22, %v7554_v28  ;;  %v5813_v33 = vadd.f32 %v5750_v5, %v5610_v13  ;;  %v4398_v0 = vpop.f32.mrb[23].mxu0 }
 0x227   : > { %v2185_v9 = vpop.f32.mrb[27].mxu1  ;;  %v4661_v51 = vadd.f32 %v5812_v46, %v7554_v28  ;;  %v5814_v15 = vadd.f32 %v4398_v0, %v2169_v24 }
 0x228   : > { %4728 = vst.msk [vmem:[%s7558_s22 + $0xb0] sm:$0xff] %vm4705_vm4, %v4663_v52  ;;  %v4664_v32 = vadd.f32 %v5813_v33, %v7554_v28 }
 0x229   : > { %4726 = vst.msk [vmem:[%s7558_s22 + $0xa0] sm:$0xff] %vm4705_vm4, %v4661_v51  ;;  %v4662_v39 = vadd.f32 %v5814_v15, %v7554_v28 }
 0x22a   : > { %4729 = vst.msk [vmem:[%s7558_s22 + $0xb8] sm:$0xff] %vm4705_vm4, %v4664_v32 }
 0x22b   : > { %4727 = vst.msk [vmem:[%s7558_s22 + $0xa8] sm:$0xff] %vm4705_vm4, %v4662_v39 }
 0x22c   : > { %v5617_v7 = vpop.f32.mrb[28].mxu1 }
 0x22d   : > { %v2198_v54 = vpop.f32.mrb[29].mxu1  ;;  %v5753_v40 = vpop.f32.mrb[24].mxu0 }
 0x22e   : > { %v5618_v31 = vpop.f32.mrb[30].mxu1  ;;  %v5815_v45 = vadd.f32 %v5753_v40, %v5613_v21  ;;  %v4411_v2 = vpop.f32.mrb[25].mxu0 }
 0x22f   : > { %v2201_v44 = vpop.f32.mrb[31].mxu1  ;;  %v5816_v63 = vadd.f32 %v4411_v2, %v2182_v38  ;;  %v5754_v17 = vpop.f32.mrb[26].mxu0 }
 0x230   : > { %v4667_v18 = vadd.f32 %v5815_v45, %v7554_v28  ;;  %v5817_v58 = vadd.f32 %v5754_v17, %v5614_v29  ;;  %v4414_v1 = vpop.f32.mrb[27].mxu0 }
 0x231   : > { %v4665_v48 = vadd.f32 %v5816_v63, %v7554_v28  ;;  %v5818_v56 = vadd.f32 %v4414_v1, %v2185_v9 }
 0x232   : > { %4732 = vst.msk [vmem:[%s7558_s22 + $0xd0] sm:$0xff] %vm4705_vm4, %v4667_v18  ;;  %v4668_v27 = vadd.f32 %v5817_v58, %v7554_v28 }
 0x233   : > { %4730 = vst.msk [vmem:[%s7558_s22 + $0xc0] sm:$0xff] %vm4705_vm4, %v4665_v48  ;;  %v4666_v43 = vadd.f32 %v5818_v56, %v7554_v28 }
 0x234   : > { %v5621_v8 = vpop.f32.mrb[32].mxu1  ;;  %4733 = vst.msk [vmem:[%s7558_s22 + $0xd8] sm:$0xff] %vm4705_vm4, %v4668_v27 }
 0x235   : > { %v2214_v41 = vpop.f32.mrb[33].mxu1  ;;  %4731 = vst.msk [vmem:[%s7558_s22 + $0xc8] sm:$0xff] %vm4705_vm4, %v4666_v43 }
 0x236   : > { %v5622_v10 = vpop.f32.mrb[34].mxu1 }
 0x237   : > { %v2217_v57 = vpop.f32.mrb[35].mxu1  ;;  %v5757_v12 = vpop.f32.mrb[28].mxu0 }
 0x238   : > { %v5819_v49 = vadd.f32 %v5757_v12, %v5617_v7  ;;  %v4427_v60 = vpop.f32.mrb[29].mxu0 }
 0x239   : > { %v5820_v55 = vadd.f32 %v4427_v60, %v2198_v54  ;;  %v5758_v50 = vpop.f32.mrb[30].mxu0 }
 0x23a   : > { %v4671_v3 = vadd.f32 %v5819_v49, %v7554_v28  ;;  %v5821_v25 = vadd.f32 %v5758_v50, %v5618_v31  ;;  %v4430_v26 = vpop.f32.mrb[31].mxu0 }
 0x23b   : > { %v4669_v37 = vadd.f32 %v5820_v55, %v7554_v28  ;;  %v5822_v59 = vadd.f32 %v4430_v26, %v2201_v44 }
 0x23c   : > { %4736 = vst.msk [vmem:[%s7558_s22 + $0xf0] sm:$0xff] %vm4705_vm4, %v4671_v3  ;;  %v4672_v19 = vadd.f32 %v5821_v25, %v7554_v28 }
 0x23d   : > { %v5625_v20 = vpop.f32.mrb[36].mxu1  ;;  %4734 = vst.msk [vmem:[%s7558_s22 + $0xe0] sm:$0xff] %vm4705_vm4, %v4669_v37  ;;  %v4670_v34 = vadd.f32 %v5822_v59, %v7554_v28 }
 0x23e   : > { %v2230_v62 = vpop.f32.mrb[37].mxu1  ;;  %4737 = vst.msk [vmem:[%s7558_s22 + $0xf8] sm:$0xff] %vm4705_vm4, %v4672_v19 }
 0x23f   : > { %v5626_v35 = vpop.f32.mrb[38].mxu1  ;;  %4735 = vst.msk [vmem:[%s7558_s22 + $0xe8] sm:$0xff] %vm4705_vm4, %v4670_v34 }
 0x240   : > { %v2233_v53 = vpop.f32.mrb[39].mxu1 }
 0x241   : > { %v5761_v30 = vpop.f32.mrb[32].mxu0 }
 0x242   : > { %v5823_v6 = vadd.f32 %v5761_v30, %v5621_v8  ;;  %v4443_v13 = vpop.f32.mrb[33].mxu0 }
 0x243   : > { %v5824_v36 = vadd.f32 %v4443_v13, %v2214_v41  ;;  %v5762_v61 = vpop.f32.mrb[34].mxu0 }
 0x244   : > { %v4675_v47 = vadd.f32 %v5823_v6, %v7554_v28  ;;  %v5825_v24 = vadd.f32 %v5762_v61, %v5622_v10  ;;  %v4446_v42 = vpop.f32.mrb[35].mxu0 }
 0x245   : > { %v4673_v23 = vadd.f32 %v5824_v36, %v7554_v28  ;;  %v5826_v4 = vadd.f32 %v4446_v42, %v2217_v57 }
 0x246   : > { %4740 = vst.msk [vmem:[%s7558_s22 + $0x110] sm:$0xff] %vm4705_vm4, %v4675_v47  ;;  %v4676_v11 = vadd.f32 %v5825_v24, %v7554_v28 }
 0x247   : > { %4738 = vst.msk [vmem:[%s7558_s22 + $0x100] sm:$0xff] %vm4705_vm4, %v4673_v23  ;;  %v4674_v21 = vadd.f32 %v5826_v4, %v7554_v28  ;;  %v5629_v38 = vpop.f32.mrb[40].mxu1 }
 0x248   : > { %4741 = vst.msk [vmem:[%s7558_s22 + $0x118] sm:$0xff] %vm4705_vm4, %v4676_v11  ;;  %v2246_v16 = vpop.f32.mrb[41].mxu1 }
 0x249   : > { %4739 = vst.msk [vmem:[%s7558_s22 + $0x108] sm:$0xff] %vm4705_vm4, %v4674_v21  ;;  %v5630_v29 = vpop.f32.mrb[42].mxu1 }
 0x24a   : > { %v2249_v22 = vpop.f32.mrb[43].mxu1 }
 0x24b   : > { %v5765_v14 = vpop.f32.mrb[36].mxu0 }
 0x24c   : > { %v5827_v9 = vadd.f32 %v5765_v14, %v5625_v20  ;;  %v4459_v46 = vpop.f32.mrb[37].mxu0 }
 0x24d   : > { %v5828_v5 = vadd.f32 %v4459_v46, %v2230_v62  ;;  %v5766_v52 = vpop.f32.mrb[38].mxu0 }
 0x24e   : > { %v4679_v33 = vadd.f32 %v5827_v9, %v7554_v28  ;;  %v5829_v0 = vadd.f32 %v5766_v52, %v5626_v35  ;;  %v4462_v51 = vpop.f32.mrb[39].mxu0 }
 0x24f   : > { %v4677_v15 = vadd.f32 %v5828_v5, %v7554_v28  ;;  %v5830_v32 = vadd.f32 %v4462_v51, %v2233_v53 }
 0x250   : > { %4744 = vst.msk [vmem:[%s7558_s22 + $0x130] sm:$0xff] %vm4705_vm4, %v4679_v33  ;;  %v4680_v39 = vadd.f32 %v5829_v0, %v7554_v28 }
 0x251   : > { %4742 = vst.msk [vmem:[%s7558_s22 + $0x120] sm:$0xff] %vm4705_vm4, %v4677_v15  ;;  %v4678_v7 = vadd.f32 %v5830_v32, %v7554_v28  ;;  %v5633_v54 = vpop.f32.mrb[44].mxu1 }
 0x252   : > { %4745 = vst.msk [vmem:[%s7558_s22 + $0x138] sm:$0xff] %vm4705_vm4, %v4680_v39  ;;  %v2262_v31 = vpop.f32.mrb[45].mxu1 }
 0x253   : > { %4743 = vst.msk [vmem:[%s7558_s22 + $0x128] sm:$0xff] %vm4705_vm4, %v4678_v7  ;;  %v5634_v40 = vpop.f32.mrb[46].mxu1 }
 0x254   : > { %v2265_v44 = vpop.f32.mrb[47].mxu1 }
 0x255   : > { %v5769_v45 = vpop.f32.mrb[40].mxu0 }
 0x256   : > { %v5831_v2 = vadd.f32 %v5769_v45, %v5629_v38  ;;  %v4475_v63 = vpop.f32.mrb[41].mxu0 }
 0x257   : > { %v5832_v17 = vadd.f32 %v4475_v63, %v2246_v16  ;;  %v5770_v18 = vpop.f32.mrb[42].mxu0 }
 0x258   : > { %v4683_v58 = vadd.f32 %v5831_v2, %v7554_v28  ;;  %v5833_v1 = vadd.f32 %v5770_v18, %v5630_v29  ;;  %v4478_v48 = vpop.f32.mrb[43].mxu0 }
 0x259   : > { %v4681_v56 = vadd.f32 %v5832_v17, %v7554_v28  ;;  %v5834_v27 = vadd.f32 %v4478_v48, %v2249_v22 }
 0x25a   : > { %4748 = vst.msk [vmem:[%s7558_s22 + $0x150] sm:$0xff] %vm4705_vm4, %v4683_v58  ;;  %v4684_v8 = vadd.f32 %v5833_v1, %v7554_v28 }
 0x25b   : > { %4746 = vst.msk [vmem:[%s7558_s22 + $0x140] sm:$0xff] %vm4705_vm4, %v4681_v56  ;;  %v4682_v43 = vadd.f32 %v5834_v27, %v7554_v28  ;;  %v5637_v41 = vpop.f32.mrb[48].mxu1 }
 0x25c   : > { %4749 = vst.msk [vmem:[%s7558_s22 + $0x158] sm:$0xff] %vm4705_vm4, %v4684_v8  ;;  %v2278_v10 = vpop.f32.mrb[49].mxu1 }
 0x25d   : > { %4747 = vst.msk [vmem:[%s7558_s22 + $0x148] sm:$0xff] %vm4705_vm4, %v4682_v43  ;;  %v5638_v57 = vpop.f32.mrb[50].mxu1 }
 0x25e   : > { %v2281_v12 = vpop.f32.mrb[51].mxu1 }
 0x25f   : > { %v5773_v49 = vpop.f32.mrb[44].mxu0 }
 0x260   : > { %v5835_v60 = vadd.f32 %v5773_v49, %v5633_v54  ;;  %v4491_v55 = vpop.f32.mrb[45].mxu0 }
 0x261   : > { %v5836_v50 = vadd.f32 %v4491_v55, %v2262_v31  ;;  %v5774_v3 = vpop.f32.mrb[46].mxu0 }
 0x262   : > { %v4687_v25 = vadd.f32 %v5835_v60, %v7554_v28  ;;  %v5837_v26 = vadd.f32 %v5774_v3, %v5634_v40  ;;  %v4494_v20 = vpop.f32.mrb[47].mxu0 }
 0x263   : > { %v4685_v37 = vadd.f32 %v5836_v50, %v7554_v28  ;;  %v5838_v59 = vadd.f32 %v4494_v20, %v2265_v44 }
 0x264   : > { %4752 = vst.msk [vmem:[%s7558_s22 + $0x170] sm:$0xff] %vm4705_vm4, %v4687_v25  ;;  %v4688_v62 = vadd.f32 %v5837_v26, %v7554_v28 }
 0x265   : > { %4750 = vst.msk [vmem:[%s7558_s22 + $0x160] sm:$0xff] %vm4705_vm4, %v4685_v37  ;;  %v4686_v19 = vadd.f32 %v5838_v59, %v7554_v28  ;;  %v5641_v35 = vpop.f32.mrb[52].mxu1 }
 0x266   : > { %4753 = vst.msk [vmem:[%s7558_s22 + $0x178] sm:$0xff] %vm4705_vm4, %v4688_v62  ;;  %v2294_v34 = vpop.f32.mrb[53].mxu1 }
 0x267   : > { %4751 = vst.msk [vmem:[%s7558_s22 + $0x168] sm:$0xff] %vm4705_vm4, %v4686_v19  ;;  %v5642_v53 = vpop.f32.mrb[54].mxu1 }
 0x268   : > { %v2297_v30 = vpop.f32.mrb[55].mxu1 }
 0x269   : > { %v5777_v6 = vpop.f32.mrb[48].mxu0 }
 0x26a   : > { %v5839_v13 = vadd.f32 %v5777_v6, %v5637_v41  ;;  %v4507_v36 = vpop.f32.mrb[49].mxu0 }
 0x26b   : > { %v5840_v61 = vadd.f32 %v4507_v36, %v2278_v10  ;;  %v5778_v47 = vpop.f32.mrb[50].mxu0 }
 0x26c   : > { %v4691_v24 = vadd.f32 %v5839_v13, %v7554_v28  ;;  %v5841_v42 = vadd.f32 %v5778_v47, %v5638_v57  ;;  %v4510_v23 = vpop.f32.mrb[51].mxu0 }
 0x26d   : > { %v4689_v4 = vadd.f32 %v5840_v61, %v7554_v28  ;;  %v5842_v11 = vadd.f32 %v4510_v23, %v2281_v12 }
 0x26e   : > { %4756 = vst.msk [vmem:[%s7558_s22 + $0x190] sm:$0xff] %vm4705_vm4, %v4691_v24  ;;  %v4692_v21 = vadd.f32 %v5841_v42, %v7554_v28 }
 0x26f   : > { %4754 = vst.msk [vmem:[%s7558_s22 + $0x180] sm:$0xff] %vm4705_vm4, %v4689_v4  ;;  %v4690_v38 = vadd.f32 %v5842_v11, %v7554_v28  ;;  %v5645_v16 = vpop.f32.mrb[56].mxu1 }
 0x270   : > { %4757 = vst.msk [vmem:[%s7558_s22 + $0x198] sm:$0xff] %vm4705_vm4, %v4692_v21  ;;  %v2310_v29 = vpop.f32.mrb[57].mxu1 }
 0x271   : > { %4755 = vst.msk [vmem:[%s7558_s22 + $0x188] sm:$0xff] %vm4705_vm4, %v4690_v38  ;;  %v5646_v22 = vpop.f32.mrb[58].mxu1 }
 0x272   : > { %v2313_v14 = vpop.f32.mrb[59].mxu1 }
 0x273   : > { %v5781_v9 = vpop.f32.mrb[52].mxu0 }
 0x274   : > { %v5843_v46 = vadd.f32 %v5781_v9, %v5641_v35  ;;  %v4523_v5 = vpop.f32.mrb[53].mxu0 }
 0x275   : > { %v5844_v52 = vadd.f32 %v4523_v5, %v2294_v34  ;;  %v5782_v33 = vpop.f32.mrb[54].mxu0 }
 0x276   : > { %v4695_v0 = vadd.f32 %v5843_v46, %v7554_v28  ;;  %v5845_v51 = vadd.f32 %v5782_v33, %v5642_v53  ;;  %v4526_v15 = vpop.f32.mrb[55].mxu0 }
 0x277   : > { %v4693_v32 = vadd.f32 %v5844_v52, %v7554_v28  ;;  %v5846_v39 = vadd.f32 %v4526_v15, %v2297_v30 }
 0x278   : > { %4760 = vst.msk [vmem:[%s7558_s22 + $0x1b0] sm:$0xff] %vm4705_vm4, %v4695_v0  ;;  %v4696_v7 = vadd.f32 %v5845_v51, %v7554_v28 }
 0x279   : > { %4758 = vst.msk [vmem:[%s7558_s22 + $0x1a0] sm:$0xff] %vm4705_vm4, %v4693_v32  ;;  %v4694_v54 = vadd.f32 %v5846_v39, %v7554_v28  ;;  %v5649_v31 = vpop.f32.mrb[60].mxu1 }
 0x27a   : > { %4761 = vst.msk [vmem:[%s7558_s22 + $0x1b8] sm:$0xff] %vm4705_vm4, %v4696_v7  ;;  %v2326_v40 = vpop.f32.mrb[61].mxu1 }
 0x27b   : > { %4759 = vst.msk [vmem:[%s7558_s22 + $0x1a8] sm:$0xff] %vm4705_vm4, %v4694_v54  ;;  %v5650_v44 = vpop.f32.mrb[62].mxu1 }
 0x27c   : > { %v2329_v45 = vpop.f32.mrb[63].mxu1 }
 0x27d   : > { %v5785_v2 = vpop.f32.mrb[56].mxu0 }
 0x27e   : > { %v5847_v63 = vadd.f32 %v5785_v2, %v5645_v16  ;;  %v4539_v17 = vpop.f32.mrb[57].mxu0 }
 0x27f   : > { %v5848_v18 = vadd.f32 %v4539_v17, %v2310_v29  ;;  %v5786_v58 = vpop.f32.mrb[58].mxu0 }
 0x280   : > { %v4699_v1 = vadd.f32 %v5847_v63, %v7554_v28  ;;  %v5849_v48 = vadd.f32 %v5786_v58, %v5646_v22  ;;  %v4542_v56 = vpop.f32.mrb[59].mxu0 }
 0x281   : > { %v4697_v27 = vadd.f32 %v5848_v18, %v7554_v28  ;;  %v5850_v8 = vadd.f32 %v4542_v56, %v2313_v14 }
 0x282   : > { %4764 = vst.msk [vmem:[%s7558_s22 + $0x1d0] sm:$0xff] %vm4705_vm4, %v4699_v1  ;;  %v4700_v43 = vadd.f32 %v5849_v48, %v7554_v28 }
 0x283   : > { %4762 = vst.msk [vmem:[%s7558_s22 + $0x1c0] sm:$0xff] %vm4705_vm4, %v4697_v27  ;;  %v4698_v41 = vadd.f32 %v5850_v8, %v7554_v28 }
 0x284   : > { %4765 = vst.msk [vmem:[%s7558_s22 + $0x1d8] sm:$0xff] %vm4705_vm4, %v4700_v43 }
 0x285   : > { %4763 = vst.msk [vmem:[%s7558_s22 + $0x1c8] sm:$0xff] %vm4705_vm4, %v4698_v41 }
 0x287   : > { %v5789_v10 = vpop.f32.mrb[60].mxu0 }
 0x288   : > { %v5851_v57 = vadd.f32 %v5789_v10, %v5649_v31  ;;  %v4555_v12 = vpop.f32.mrb[61].mxu0 }
 0x289   : > { %v5852_v49 = vadd.f32 %v4555_v12, %v2326_v40  ;;  %v5790_v60 = vpop.f32.mrb[62].mxu0 }
 0x28a   : > { %v4703_v55 = vadd.f32 %v5851_v57, %v7554_v28  ;;  %v5853_v50 = vadd.f32 %v5790_v60, %v5650_v44  ;;  %v4558_v3 = vpop.f32.mrb[63].mxu0 }
 0x28b   : > { %v4701_v25 = vadd.f32 %v5852_v49, %v7554_v28  ;;  %v5854_v26 = vadd.f32 %v4558_v3, %v2329_v45 }
 0x28c   : > { %4768 = vst.msk [vmem:[%s7558_s22 + $0x1f0] sm:$0xff] %vm4705_vm4, %v4703_v55  ;;  %v4704_v20 = vadd.f32 %v5853_v50, %v7554_v28 }
 0x28d   : > { %4766 = vst.msk [vmem:[%s7558_s22 + $0x1e0] sm:$0xff] %vm4705_vm4, %v4701_v25  ;;  %v4702_v37 = vadd.f32 %v5854_v26, %v7554_v28 }
 0x28e   : > { %4769 = vst.msk [vmem:[%s7558_s22 + $0x1f8] sm:$0xff] %vm4705_vm4, %v4704_v20 }
 0x28f   : > { %4767 = vst.msk [vmem:[%s7558_s22 + $0x1e8] sm:$0xff] %vm4705_vm4, %v4702_v37 }
 0x290   : > { %6270 = shalt.err (!%p6267_p2)
}
 0x291   : > { %s6271_s28 = scalar_lea.hbm %s7748_s26, 8192  ;;  %s6275_s8 = scalar_lea.hbm %s7809_s3, 16384 }
 0x292   : > { %p6272_p0 = scmp.ne.s32.totalorder %s7748_s26, %s6271_s28  ;;  %p6276_p6 = scmp.lt.u32.totalorder %s7748_s26, %s7809_s3 }
 0x293   : > { %p6277_p7 = scmp.lt.u32.totalorder %s6275_s8, %s6271_s28  ;;  %p6279_p8 = scmp.lt.u32.totalorder %s6271_s28, %s7748_s26 }
 0x294   : > { %p6273_p4 = pnand %p6272_p0, %p7873_p12 }
 0x295   : > { %p6278_p11 = por %p6277_p7, %p6276_p6 }
 0x296   : > { %p6274_p13 = pneg %p6273_p4 }
 0x297   : > { %p6280_p1 = por %p6279_p8, %p6278_p11 }
 0x299   : > { %p6281_p10 = pnand %p6280_p1, %p6274_p13 }
 0x29b   : > { %6284 = shalt.err (!%p6281_p10)
}
 0x29c   : > { %s6351_s22 = smov 128   ;;  %s6352_s24 = smov 8  }
 0x29d   : > { %5996 = dma.vmem_to_hbm [thread:$0]  (%p7873_p12), %s7750_s11, 8192, %s7748_s26, %s4771_s15, %s6351_s22, %s6351_s22, %s6352_s24  }
 0x29e PF: > { %s4802_s18 = sand.u32 1, %s6323_s12   ;;  %p7874_p3 = scmp.ne.s32.totalorder %s7826_s23, 0 }
 0x29f   : > { %p7875_p5 = scmp.ge.s32.totalorder %s6343_s17, 2  ;;  %s4803_s5 = scalar_lea.sflag [#allocation4], %s4802_s18 }
 0x2a1   : > { %p6010_p9 = pnand %p7875_p5, %p7874_p3 }
 0x2a3   : > { %6318 = dma.done.wait (!%p6010_p9), %s4803_s5, 8192  }
 0x2a4   : > { %6320 = vsyncadd (!%p6010_p9), %s4803_s5, 4294959104  ;;  %s20_s17 = sadd.s32 1, %s6343_s17   ;;  %s7876_s12 = smov %s6327_s13 }
 0x2a5   : > { %p17_p2 = scmp.ge.s32.totalorder %s20_s17, 4   ;;  %s7877_s13 = smov %s6331_s14 }
 0x2a6   : > { %s7878_s14 = smov %s6522_s6  ;;  %s7879_s15 = smov %s6339_s16 }
 0x2a7   : > { %s7880_s16 = smov %s7882_s25  ;;  %19 = sbr.rel (!%p17_p2) target bundleno = 7 (0x7), region = 89 }
 0x2ae   :  { %4808 = vsyncpa [#allocation3], 1 }
 0x2af   :  { %4810 = vsyncpa [#allocation3 + $0x1], 1 }
 0x2b0   :  { %4811 = vsyncpa [#allocation6], 1 }
 0x2b1   :  { %4812 = vsyncpa [#allocation4], 1 }
 0x2b2   :  { %4814 = vsyncpa [#allocation4 + $0x1], 1 }

</bundles_post_ra>
